<compile_context>
chip_gen: v6e
topology: v6e:2x2x1
jax: 0.10.0
libtpu: 0.0.40
codegen_flags: <defaults>
</compile_context>

<pallas_src>
import math
import functools

import jax
import jax.numpy as jnp
from jax import lax
from jax.experimental import pallas as pl
from jax.experimental.pallas import tpu as pltpu

VMEM = pltpu.MemorySpace.VMEM
SMEM = pltpu.MemorySpace.SMEM


# ------------------------------ fused kernel --------------------------------

def _decoder_kernel(e_ref, mem_ref,
                    sa_wqkv_ref, sa_bqkv_ref, sa_wo_ref, sa_bo_ref,
                    ca_wq_ref, ca_bq_ref, ca_wkv_ref, ca_bkv_ref,
                    ca_wo_ref, ca_bo_ref,
                    w1_ref, b1_ref, w2_ref, b2_ref,
                    ln_g_ref, ln_b_ref,
                    wh_ref, bh_ref,
                    tgt_ref, spt_ref, prog_ref,
                    out_ref,
                    *, num_layers, num_heads, bsz, qlen, clen, landuse_dim):
    f32 = jnp.float32
    H, B, L, S, C = num_heads, bsz, qlen, clen, landuse_dim
    T = B * L
    D = e_ref.shape[-1]
    hd = D // H
    HB = H * B
    scale = 1.0 / math.sqrt(hd)

    def sigmoid(z):
        # EUP exp + approx reciprocal (keeps the divide off the VPU path)
        return pl.reciprocal(1.0 + jnp.exp(-z), approx=True)

    def layer_norm(y, g, b):
        mu = jnp.mean(y, axis=-1, keepdims=True)
        yc = y - mu
        var = jnp.mean(yc * yc, axis=-1, keepdims=True)
        return yc * lax.rsqrt(var + 1e-5) * g + b

    def bcast_rows(x3):
        # [B, N, D] -> [H*B, N, D]   (replicate activations across heads)
        return jnp.broadcast_to(x3[None], (H,) + x3.shape).reshape(
            (HB,) + x3.shape[1:])

    def bcast_w(w):
        # [H, A, K] -> [H*B, A, K]   (replicate per-head weights across batch)
        return jnp.broadcast_to(w[:, None], (H, B) + w.shape[1:]).reshape(
            (HB,) + w.shape[1:])

    def bmm(a, b, contract_b):
        # a: [G, M, K]; contract a's last dim with b's dim `contract_b`; batch dim 0.
        dn = (((2,), (contract_b,)), ((0,), (0,)))
        return lax.dot_general(a, b, dn, preferred_element_type=f32)

    def attn_core(q, k, v, wo_hb, bo_row, mask):
        # q: [HB, L, hd], k/v: [HB, Sk, hd], wo_hb: [HB, hd, D], bo_row: [1, D]
        s = bmm(q, k, 2) * scale                        # [HB, L, Sk]
        if mask is not None:
            s = s + mask
        m = jnp.max(s, axis=-1, keepdims=True)
        p = jnp.exp(s - m)
        p = p * pl.reciprocal(jnp.sum(p, axis=-1, keepdims=True), approx=True)
        ctx = bmm(p, v, 1)                              # [HB, L, hd]
        o = bmm(ctx, wo_hb, 1)                          # [HB, L, D]
        o = jnp.sum(o.reshape(H, T, D), axis=0)         # sum over heads -> [T, D]
        return o + bo_row

    # ---- constants hoisted out of the layer loop ----
    ri = lax.broadcasted_iota(jnp.int32, (L, L), 0)
    ci = lax.broadcasted_iota(jnp.int32, (L, L), 1)
    causal = jnp.where(ci > ri, -1e30, 0.0).astype(f32)            # [L, L]
    mem_b = bcast_rows(mem_ref[...].reshape(B, S, D))              # [HB, S, D]

    h = e_ref[...]                                                 # [T, D]
    for l in range(num_layers):                                    # static unroll
        g = ln_g_ref[l]                                            # [3, D]
        bt = ln_b_ref[l]                                           # [3, D]

        # ---- self attention (post-norm) ----
        x_b = bcast_rows(h.reshape(B, L, D))                       # [HB, L, D]
        qkv = bmm(x_b, bcast_w(sa_wqkv_ref[l]), 1) + bcast_w(sa_bqkv_ref[l])
        q = qkv[:, :, 0:hd]
        k = qkv[:, :, hd:2 * hd]
        v = qkv[:, :, 2 * hd:3 * hd]
        sa = attn_core(q, k, v, bcast_w(sa_wo_ref[l]), sa_bo_ref[l], causal)
        h = layer_norm(h + sa, g[0:1, :], bt[0:1, :])

        # ---- cross attention (no mask needed on this path) ----
        x_b = bcast_rows(h.reshape(B, L, D))
        q = bmm(x_b, bcast_w(ca_wq_ref[l]), 1) + bcast_w(ca_bq_ref[l])
        kv = bmm(mem_b, bcast_w(ca_wkv_ref[l]), 1) + bcast_w(ca_bkv_ref[l])
        k = kv[:, :, 0:hd]
        v = kv[:, :, hd:2 * hd]
        ca = attn_core(q, k, v, bcast_w(ca_wo_ref[l]), ca_bo_ref[l], None)
        h = layer_norm(h + ca, g[1:2, :], bt[1:2, :])

        # ---- feed forward ----
        f1 = jnp.dot(h, w1_ref[l], preferred_element_type=f32) + b1_ref[l]
        f1 = jnp.maximum(f1, 0.0)
        f2 = jnp.dot(f1, w2_ref[l], preferred_element_type=f32) + b2_ref[l]
        h = layer_norm(h + f2, g[2:3, :], bt[2:3, :])

    # ---- fused loss heads:  columns = [ logits(C) | progress(C) | spatial(3) ] ----
    head_out = jnp.dot(h, wh_ref[...], preferred_element_type=f32) + bh_ref[...]
    logits = head_out[:, 0:C]
    prog_z = head_out[:, C:2 * C]
    sp_z = head_out[:, 2 * C:2 * C + 3]

    # category cross-entropy (mean over B*L tokens)
    m = jnp.max(logits, axis=-1, keepdims=True)
    lse = m + jnp.log(jnp.sum(jnp.exp(logits - m), axis=-1, keepdims=True))
    ids = lax.broadcasted_iota(jnp.int32, (T, C), 1)
    onehot = (ids == tgt_ref[...]).astype(f32)
    picked = jnp.sum(logits * onehot, axis=-1, keepdims=True)
    out_ref[0] = jnp.sum(lse - picked) * (1.0 / T)

    # spatial sigmoid + L1 (distance / direction / degree4)
    sp = sigmoid(sp_z)
    diff = jnp.abs(sp - spt_ref[...])
    out_ref[1] = jnp.sum(diff[:, 0:1]) * (1.0 / T)
    out_ref[2] = jnp.sum(diff[:, 1:2]) * (1.0 / T)
    out_ref[3] = jnp.sum(diff[:, 2:3]) * (1.0 / T)

    # progress sigmoid + MSE * qlen
    # TODO(synk): progress_dropout evaluated in eval mode (identity).
    pp = sigmoid(prog_z)
    dp = pp - prog_ref[...]
    out_ref[4] = jnp.sum(dp * dp) * (float(L) / (T * C))

    out_ref[5] = jnp.float32(0.0)
    out_ref[6] = jnp.float32(0.0)
    out_ref[7] = jnp.float32(0.0)


# --------------------------- params / wrapper --------------------------------

def init_params(key, landuse_dim, seq_length, model_dim, num_heads, layer_num,
                dim_feedforward):
    D, F, C, H, NL = model_dim, dim_feedforward, landuse_dim, num_heads, layer_num
    hd = D // H
    ks = iter(jax.random.split(key, 16))
    nrm = lambda k, shp, s: jax.random.normal(k, shp, jnp.float32) * s
    sd = D ** -0.5
    return {
        "emb": nrm(next(ks), (C, D), 1.0),
        "pos_emb": nrm(next(ks), (seq_length, D), 1.0),
        # decoder layers stacked along a leading layer axis; attention weights
        # pre-arranged in per-head layout [H, D, hd*k] for batched dot_general.
        "sa_wqkv": nrm(next(ks), (NL, H, D, 3 * hd), sd),
        "sa_bqkv": jnp.zeros((NL, H, 1, 3 * hd), jnp.float32),
        "sa_wo": nrm(next(ks), (NL, H, hd, D), sd),
        "sa_bo": jnp.zeros((NL, 1, D), jnp.float32),
        "ca_wq": nrm(next(ks), (NL, H, D, hd), sd),
        "ca_bq": jnp.zeros((NL, H, 1, hd), jnp.float32),
        "ca_wkv": nrm(next(ks), (NL, H, D, 2 * hd), sd),
        "ca_bkv": jnp.zeros((NL, H, 1, 2 * hd), jnp.float32),
        "ca_wo": nrm(next(ks), (NL, H, hd, D), sd),
        "ca_bo": jnp.zeros((NL, 1, D), jnp.float32),
        "w1": nrm(next(ks), (NL, D, F), sd),
        "b1": jnp.zeros((NL, 1, F), jnp.float32),
        "w2": nrm(next(ks), (NL, F, D), F ** -0.5),
        "b2": jnp.zeros((NL, 1, D), jnp.float32),
        "ln_g": jnp.ones((NL, 3, D), jnp.float32),
        "ln_b": jnp.zeros((NL, 3, D), jnp.float32),
        # fused output heads: [ logits(C) | progress(C) | spatial(3) ]
        "w_heads": nrm(next(ks), (D, 2 * C + 3), sd),
        "b_heads": jnp.zeros((1, 2 * C + 3), jnp.float32),
    }


def forward(params, x, d1, d2, d3, prog, comp_h, *, num_heads, bos_value):
    """x, d1, d2, d3: [B, L]; prog: [B, L, C]; comp_h: [clen, B, D]."""
    B, L = x.shape
    D = params["pos_emb"].shape[1]
    C = params["emb"].shape[0]
    NL = params["sa_wqkv"].shape[0]
    S = comp_h.shape[0]
    T = B * L

    # decode(): BOS shift-right, embedding + positional embedding (tiny gather,
    # left to XLA outside the kernel).
    bos = jnp.full((B, 1), bos_value, dtype=x.dtype)
    x_in = jnp.concatenate([bos, x[:, :-1]], axis=1)
    e = (params["emb"][x_in] + params["pos_emb"][None, :L, :]).astype(jnp.float32)
    e_flat = e.reshape(T, D)

    mem = jnp.transpose(comp_h, (1, 0, 2)).astype(jnp.float32).reshape(B * S, D)

    tgt = x.reshape(T, 1).astype(jnp.int32)
    sp_tgt = jnp.stack([d1, d2, d3], axis=-1).reshape(T, 3).astype(jnp.float32)
    prog_flat = prog.reshape(T, C).astype(jnp.float32)

    kernel = functools.partial(_decoder_kernel, num_layers=NL,
                               num_heads=num_heads, bsz=B, qlen=L, clen=S,
                               landuse_dim=C)
    out = pl.pallas_call(
        kernel,
        out_shape=jax.ShapeDtypeStruct((8,), jnp.float32),
        in_specs=[pl.BlockSpec(memory_space=VMEM)] * 23,
        out_specs=pl.BlockSpec(memory_space=SMEM),
    )(e_flat, mem,
      params["sa_wqkv"], params["sa_bqkv"], params["sa_wo"], params["sa_bo"],
      params["ca_wq"], params["ca_bq"], params["ca_wkv"], params["ca_bkv"],
      params["ca_wo"], params["ca_bo"],
      params["w1"], params["b1"], params["w2"], params["b2"],
      params["ln_g"], params["ln_b"],
      params["w_heads"], params["b_heads"],
      tgt, sp_tgt, prog_flat)
    # (loss_ce, loss1, loss2, loss3, loss_prog)
    return out[0], out[1], out[2], out[3], out[4]


# --------------------------------- main --------------------------------------

if __name__ == "__main__":
    landuse_dim = 8
    seq_length = 8          # == qlen
    model_dim = 32
    head_num = 4
    layer_num = 2
    dim_feedforward = 128   # PyTorch default is 2048; reduced for the demo
    bos_value = 0

    bsz = 2
    qlen = seq_length
    clen = 8

    key = jax.random.PRNGKey(0)
    kp, kx, kd1, kd2, kd3, kpr, kc = jax.random.split(key, 7)

    params = init_params(kp, landuse_dim, seq_length, model_dim, head_num,
                         layer_num, dim_feedforward)

    x = jax.random.randint(kx, (bsz, qlen), 0, landuse_dim, dtype=jnp.int32)
    d1 = jax.random.uniform(kd1, (bsz, qlen), jnp.float32)
    d2 = jax.random.uniform(kd2, (bsz, qlen), jnp.float32)
    d3 = jax.random.uniform(kd3, (bsz, qlen), jnp.float32)
    prog = jax.random.uniform(kpr, (bsz, qlen, landuse_dim), jnp.float32)
    comp_h = jax.random.normal(kc, (clen, bsz, model_dim), jnp.float32)

    fwd = jax.jit(functools.partial(forward, num_heads=head_num,
                                    bos_value=bos_value))
    loss_ce, l1, l2, l3, loss_prog = fwd(params, x, d1, d2, d3, prog, comp_h)
    results = jax.block_until_ready((loss_ce, l1, l2, l3, loss_prog))

    assert all(bool(jnp.isfinite(r)) for r in results)
    print("KERNEL_OK")
</pallas_src>

<mosaic_0001>
module attributes {stable_mosaic.version = 11 : i64} {
  func.func @_decoder_kernel(%arg0: memref<16x32xf32, #tpu.memory_space<vmem>>, %arg1: memref<16x32xf32, #tpu.memory_space<vmem>>, %arg2: memref<2x4x32x24xf32, #tpu.memory_space<vmem>>, %arg3: memref<2x4x1x24xf32, #tpu.memory_space<vmem>>, %arg4: memref<2x4x8x32xf32, #tpu.memory_space<vmem>>, %arg5: memref<2x1x32xf32, #tpu.memory_space<vmem>>, %arg6: memref<2x4x32x8xf32, #tpu.memory_space<vmem>>, %arg7: memref<2x4x1x8xf32, #tpu.memory_space<vmem>>, %arg8: memref<2x4x32x16xf32, #tpu.memory_space<vmem>>, %arg9: memref<2x4x1x16xf32, #tpu.memory_space<vmem>>, %arg10: memref<2x4x8x32xf32, #tpu.memory_space<vmem>>, %arg11: memref<2x1x32xf32, #tpu.memory_space<vmem>>, %arg12: memref<2x32x128xf32, #tpu.memory_space<vmem>>, %arg13: memref<2x1x128xf32, #tpu.memory_space<vmem>>, %arg14: memref<2x128x32xf32, #tpu.memory_space<vmem>>, %arg15: memref<2x1x32xf32, #tpu.memory_space<vmem>>, %arg16: memref<2x3x32xf32, #tpu.memory_space<vmem>>, %arg17: memref<2x3x32xf32, #tpu.memory_space<vmem>>, %arg18: memref<32x19xf32, #tpu.memory_space<vmem>>, %arg19: memref<1x19xf32, #tpu.memory_space<vmem>>, %arg20: memref<16x1xi32, #tpu.memory_space<vmem>>, %arg21: memref<16x3xf32, #tpu.memory_space<vmem>>, %arg22: memref<16x8xf32, #tpu.memory_space<vmem>>, %arg23: memref<8xf32, #tpu.memory_space<smem>>) attributes {dimension_semantics = [], scalar_prefetch = 0 : i64, scratch_operands = 0 : i64, tpu.core_type = #tpu.core_type<tc>} {
    %0 = tpu.iota {dimensions = array<i32: 0>} : vector<8x8xi32>
    %1 = tpu.iota {dimensions = array<i32: 1>} : vector<8x8xi32>
    %2 = arith.cmpi sgt, %1, %0 : vector<8x8xi32>
    %cst = arith.constant -1.000000e+30 : f32
    %cst_0 = arith.constant 0.000000e+00 : f32
    %3 = vector.broadcast %cst : f32 to vector<8x8xf32>
    %4 = vector.broadcast %cst_0 : f32 to vector<8x8xf32>
    %5 = arith.select %2, %3, %4 : vector<8x8xi1>, vector<8x8xf32>
    %c0 = arith.constant 0 : index
    %c0_1 = arith.constant 0 : index
    %6 = vector.load %arg1[%c0, %c0_1] : memref<16x32xf32, #tpu.memory_space<vmem>>, vector<16x32xf32>
    %7 = vector.shape_cast %6 : vector<16x32xf32> to vector<2x8x32xf32>
    %8 = vector.shape_cast %7 : vector<2x8x32xf32> to vector<1x2x8x32xf32>
    %9 = vector.shape_cast %8 : vector<1x2x8x32xf32> to vector<1x2x8x32xf32>
    %10 = vector.broadcast %9 : vector<1x2x8x32xf32> to vector<4x2x8x32xf32>
    %11 = vector.shape_cast %10 : vector<4x2x8x32xf32> to vector<8x8x32xf32>
    %c0_2 = arith.constant 0 : index
    %c0_3 = arith.constant 0 : index
    %12 = vector.load %arg0[%c0_2, %c0_3] : memref<16x32xf32, #tpu.memory_space<vmem>>, vector<16x32xf32>
    %c0_4 = arith.constant 0 : index
    %c0_5 = arith.constant 0 : index
    %c0_6 = arith.constant 0 : index
    %13 = vector.load %arg16[%c0_4, %c0_5, %c0_6] : memref<2x3x32xf32, #tpu.memory_space<vmem>>, vector<1x3x32xf32>
    %14 = vector.shape_cast %13 : vector<1x3x32xf32> to vector<3x32xf32>
    %c0_7 = arith.constant 0 : index
    %c0_8 = arith.constant 0 : index
    %c0_9 = arith.constant 0 : index
    %15 = vector.load %arg17[%c0_7, %c0_8, %c0_9] : memref<2x3x32xf32, #tpu.memory_space<vmem>>, vector<1x3x32xf32>
    %16 = vector.shape_cast %15 : vector<1x3x32xf32> to vector<3x32xf32>
    %17 = vector.shape_cast %12 : vector<16x32xf32> to vector<2x8x32xf32>
    %18 = vector.shape_cast %17 : vector<2x8x32xf32> to vector<1x2x8x32xf32>
    %19 = vector.shape_cast %18 : vector<1x2x8x32xf32> to vector<1x2x8x32xf32>
    %20 = vector.broadcast %19 : vector<1x2x8x32xf32> to vector<4x2x8x32xf32>
    %21 = vector.shape_cast %20 : vector<4x2x8x32xf32> to vector<8x8x32xf32>
    %c0_10 = arith.constant 0 : index
    %c0_11 = arith.constant 0 : index
    %c0_12 = arith.constant 0 : index
    %c0_13 = arith.constant 0 : index
    %22 = vector.load %arg2[%c0_10, %c0_11, %c0_12, %c0_13] : memref<2x4x32x24xf32, #tpu.memory_space<vmem>>, vector<1x4x32x24xf32>
    %23 = vector.shape_cast %22 : vector<1x4x32x24xf32> to vector<4x32x24xf32>
    %24 = vector.shape_cast %23 : vector<4x32x24xf32> to vector<4x1x32x24xf32>
    %25 = vector.shape_cast %24 : vector<4x1x32x24xf32> to vector<4x1x32x24xf32>
    %26 = vector.broadcast %25 : vector<4x1x32x24xf32> to vector<4x2x32x24xf32>
    %27 = vector.shape_cast %26 : vector<4x2x32x24xf32> to vector<8x32x24xf32>
    %cst_14 = arith.constant dense<0.000000e+00> : vector<8x8x24xf32>
    %28 = tpu.matmul %21, %27, %cst_14 {dimension_numbers = #tpu.dot_dimension_numbers<[2], [1], [1], [2], [0, 0, 0, 1, 1, 2], [0], [0]>} : vector<8x8x32xf32>, vector<8x32x24xf32>, vector<8x8x24xf32> -> vector<8x8x24xf32>
    %c0_15 = arith.constant 0 : index
    %c0_16 = arith.constant 0 : index
    %c0_17 = arith.constant 0 : index
    %c0_18 = arith.constant 0 : index
    %29 = vector.load %arg3[%c0_15, %c0_16, %c0_17, %c0_18] : memref<2x4x1x24xf32, #tpu.memory_space<vmem>>, vector<1x4x1x24xf32>
    %30 = vector.shape_cast %29 : vector<1x4x1x24xf32> to vector<4x1x24xf32>
    %31 = vector.shape_cast %30 : vector<4x1x24xf32> to vector<4x1x1x24xf32>
    %32 = vector.shape_cast %31 : vector<4x1x1x24xf32> to vector<4x1x1x24xf32>
    %33 = vector.broadcast %32 : vector<4x1x1x24xf32> to vector<4x2x1x24xf32>
    %34 = vector.shape_cast %33 : vector<4x2x1x24xf32> to vector<8x1x24xf32>
    %35 = vector.broadcast %34 : vector<8x1x24xf32> to vector<8x8x24xf32>
    %36 = arith.addf %28, %35 : vector<8x8x24xf32>
    %37 = vector.extract_strided_slice %36 {offsets = [0, 0, 0], sizes = [8, 8, 8], strides = [1, 1, 1]} : vector<8x8x24xf32> to vector<8x8x8xf32>
    %38 = vector.extract_strided_slice %36 {offsets = [0, 0, 8], sizes = [8, 8, 8], strides = [1, 1, 1]} : vector<8x8x24xf32> to vector<8x8x8xf32>
    %39 = vector.extract_strided_slice %36 {offsets = [0, 0, 16], sizes = [8, 8, 8], strides = [1, 1, 1]} : vector<8x8x24xf32> to vector<8x8x8xf32>
    %c0_19 = arith.constant 0 : index
    %c0_20 = arith.constant 0 : index
    %c0_21 = arith.constant 0 : index
    %c0_22 = arith.constant 0 : index
    %40 = vector.load %arg4[%c0_19, %c0_20, %c0_21, %c0_22] : memref<2x4x8x32xf32, #tpu.memory_space<vmem>>, vector<1x4x8x32xf32>
    %41 = vector.shape_cast %40 : vector<1x4x8x32xf32> to vector<4x8x32xf32>
    %42 = vector.shape_cast %41 : vector<4x8x32xf32> to vector<4x1x8x32xf32>
    %43 = vector.shape_cast %42 : vector<4x1x8x32xf32> to vector<4x1x8x32xf32>
    %44 = vector.broadcast %43 : vector<4x1x8x32xf32> to vector<4x2x8x32xf32>
    %45 = vector.shape_cast %44 : vector<4x2x8x32xf32> to vector<8x8x32xf32>
    %c0_23 = arith.constant 0 : index
    %c0_24 = arith.constant 0 : index
    %c0_25 = arith.constant 0 : index
    %46 = vector.load %arg5[%c0_23, %c0_24, %c0_25] : memref<2x1x32xf32, #tpu.memory_space<vmem>>, vector<1x1x32xf32>
    %47 = vector.shape_cast %46 : vector<1x1x32xf32> to vector<1x32xf32>
    %cst_26 = arith.constant dense<0.000000e+00> : vector<8x8x8xf32>
    %48 = tpu.matmul %37, %38, %cst_26 {dimension_numbers = #tpu.dot_dimension_numbers<[2], [2], [1], [1], [0, 0, 0, 1, 1, 1], [0], [0]>} : vector<8x8x8xf32>, vector<8x8x8xf32>, vector<8x8x8xf32> -> vector<8x8x8xf32>
    %cst_27 = arith.constant 0.353553385 : f32
    %49 = vector.broadcast %cst_27 : f32 to vector<8x8x8xf32>
    %50 = arith.mulf %48, %49 : vector<8x8x8xf32>
    %51 = vector.shape_cast %5 : vector<8x8xf32> to vector<1x8x8xf32>
    %52 = vector.broadcast %51 : vector<1x8x8xf32> to vector<8x8x8xf32>
    %53 = arith.addf %50, %52 : vector<8x8x8xf32>
    %cst_28 = arith.constant dense<0xFF800000> : vector<8x8xf32>
    %54 = vector.multi_reduction <maximumf>, %53, %cst_28 [2] : vector<8x8x8xf32> to vector<8x8xf32>
    %55 = vector.shape_cast %54 : vector<8x8xf32> to vector<8x8x1xf32>
    %56 = vector.broadcast %55 : vector<8x8x1xf32> to vector<8x8x8xf32>
    %57 = arith.subf %53, %56 : vector<8x8x8xf32>
    %58 = math.exp %57 : vector<8x8x8xf32>
    %cst_29 = arith.constant dense<0.000000e+00> : vector<8x8xf32>
    %59 = vector.multi_reduction <add>, %58, %cst_29 [2] : vector<8x8x8xf32> to vector<8x8xf32>
    %60 = vector.shape_cast %59 : vector<8x8xf32> to vector<8x8x1xf32>
    %61 = tpu.reciprocal %60 {approx = true} : vector<8x8x1xf32> -> vector<8x8x1xf32>
    %62 = vector.broadcast %61 : vector<8x8x1xf32> to vector<8x8x8xf32>
    %63 = arith.mulf %58, %62 : vector<8x8x8xf32>
    %cst_30 = arith.constant dense<0.000000e+00> : vector<8x8x8xf32>
    %64 = tpu.matmul %63, %39, %cst_30 {dimension_numbers = #tpu.dot_dimension_numbers<[2], [1], [1], [2], [0, 0, 0, 1, 1, 2], [0], [0]>} : vector<8x8x8xf32>, vector<8x8x8xf32>, vector<8x8x8xf32> -> vector<8x8x8xf32>
    %cst_31 = arith.constant dense<0.000000e+00> : vector<8x8x32xf32>
    %65 = tpu.matmul %64, %45, %cst_31 {dimension_numbers = #tpu.dot_dimension_numbers<[2], [1], [1], [2], [0, 0, 0, 1, 1, 2], [0], [0]>} : vector<8x8x8xf32>, vector<8x8x32xf32>, vector<8x8x32xf32> -> vector<8x8x32xf32>
    %66 = vector.shape_cast %65 : vector<8x8x32xf32> to vector<4x16x32xf32>
    %cst_32 = arith.constant dense<0.000000e+00> : vector<16x32xf32>
    %67 = vector.multi_reduction <add>, %66, %cst_32 [0] : vector<4x16x32xf32> to vector<16x32xf32>
    %68 = vector.broadcast %47 : vector<1x32xf32> to vector<16x32xf32>
    %69 = arith.addf %67, %68 : vector<16x32xf32>
    %70 = arith.addf %12, %69 : vector<16x32xf32>
    %71 = vector.extract_strided_slice %14 {offsets = [0, 0], sizes = [1, 32], strides = [1, 1]} : vector<3x32xf32> to vector<1x32xf32>
    %72 = vector.extract_strided_slice %16 {offsets = [0, 0], sizes = [1, 32], strides = [1, 1]} : vector<3x32xf32> to vector<1x32xf32>
    %cst_33 = arith.constant dense<0.000000e+00> : vector<16xf32>
    %73 = vector.multi_reduction <add>, %70, %cst_33 [1] : vector<16x32xf32> to vector<16xf32>
    %74 = vector.shape_cast %73 : vector<16xf32> to vector<16x1xf32>
    %cst_34 = arith.constant 3.200000e+01 : f32
    %75 = vector.broadcast %cst_34 : f32 to vector<16x1xf32>
    %76 = arith.divf %74, %75 : vector<16x1xf32>
    %77 = vector.broadcast %76 : vector<16x1xf32> to vector<16x32xf32>
    %78 = arith.subf %70, %77 : vector<16x32xf32>
    %79 = arith.mulf %78, %78 : vector<16x32xf32>
    %cst_35 = arith.constant dense<0.000000e+00> : vector<16xf32>
    %80 = vector.multi_reduction <add>, %79, %cst_35 [1] : vector<16x32xf32> to vector<16xf32>
    %81 = vector.shape_cast %80 : vector<16xf32> to vector<16x1xf32>
    %cst_36 = arith.constant 3.200000e+01 : f32
    %82 = vector.broadcast %cst_36 : f32 to vector<16x1xf32>
    %83 = arith.divf %81, %82 : vector<16x1xf32>
    %cst_37 = arith.constant 9.99999974E-6 : f32
    %84 = vector.broadcast %cst_37 : f32 to vector<16x1xf32>
    %85 = arith.addf %83, %84 : vector<16x1xf32>
    %86 = math.rsqrt %85 : vector<16x1xf32>
    %87 = vector.broadcast %86 : vector<16x1xf32> to vector<16x32xf32>
    %88 = arith.mulf %78, %87 : vector<16x32xf32>
    %89 = vector.broadcast %71 : vector<1x32xf32> to vector<16x32xf32>
    %90 = arith.mulf %88, %89 : vector<16x32xf32>
    %91 = vector.broadcast %72 : vector<1x32xf32> to vector<16x32xf32>
    %92 = arith.addf %90, %91 : vector<16x32xf32>
    %93 = vector.shape_cast %92 : vector<16x32xf32> to vector<2x8x32xf32>
    %94 = vector.shape_cast %93 : vector<2x8x32xf32> to vector<1x2x8x32xf32>
    %95 = vector.shape_cast %94 : vector<1x2x8x32xf32> to vector<1x2x8x32xf32>
    %96 = vector.broadcast %95 : vector<1x2x8x32xf32> to vector<4x2x8x32xf32>
    %97 = vector.shape_cast %96 : vector<4x2x8x32xf32> to vector<8x8x32xf32>
    %c0_38 = arith.constant 0 : index
    %c0_39 = arith.constant 0 : index
    %c0_40 = arith.constant 0 : index
    %c0_41 = arith.constant 0 : index
    %98 = vector.load %arg6[%c0_38, %c0_39, %c0_40, %c0_41] : memref<2x4x32x8xf32, #tpu.memory_space<vmem>>, vector<1x4x32x8xf32>
    %99 = vector.shape_cast %98 : vector<1x4x32x8xf32> to vector<4x32x8xf32>
    %100 = vector.shape_cast %99 : vector<4x32x8xf32> to vector<4x1x32x8xf32>
    %101 = vector.shape_cast %100 : vector<4x1x32x8xf32> to vector<4x1x32x8xf32>
    %102 = vector.broadcast %101 : vector<4x1x32x8xf32> to vector<4x2x32x8xf32>
    %103 = vector.shape_cast %102 : vector<4x2x32x8xf32> to vector<8x32x8xf32>
    %cst_42 = arith.constant dense<0.000000e+00> : vector<8x8x8xf32>
    %104 = tpu.matmul %97, %103, %cst_42 {dimension_numbers = #tpu.dot_dimension_numbers<[2], [1], [1], [2], [0, 0, 0, 1, 1, 2], [0], [0]>} : vector<8x8x32xf32>, vector<8x32x8xf32>, vector<8x8x8xf32> -> vector<8x8x8xf32>
    %c0_43 = arith.constant 0 : index
    %c0_44 = arith.constant 0 : index
    %c0_45 = arith.constant 0 : index
    %c0_46 = arith.constant 0 : index
    %105 = vector.load %arg7[%c0_43, %c0_44, %c0_45, %c0_46] : memref<2x4x1x8xf32, #tpu.memory_space<vmem>>, vector<1x4x1x8xf32>
    %106 = vector.shape_cast %105 : vector<1x4x1x8xf32> to vector<4x1x8xf32>
    %107 = vector.shape_cast %106 : vector<4x1x8xf32> to vector<4x1x1x8xf32>
    %108 = vector.shape_cast %107 : vector<4x1x1x8xf32> to vector<4x1x1x8xf32>
    %109 = vector.broadcast %108 : vector<4x1x1x8xf32> to vector<4x2x1x8xf32>
    %110 = vector.shape_cast %109 : vector<4x2x1x8xf32> to vector<8x1x8xf32>
    %111 = vector.broadcast %110 : vector<8x1x8xf32> to vector<8x8x8xf32>
    %112 = arith.addf %104, %111 : vector<8x8x8xf32>
    %c0_47 = arith.constant 0 : index
    %c0_48 = arith.constant 0 : index
    %c0_49 = arith.constant 0 : index
    %c0_50 = arith.constant 0 : index
    %113 = vector.load %arg8[%c0_47, %c0_48, %c0_49, %c0_50] : memref<2x4x32x16xf32, #tpu.memory_space<vmem>>, vector<1x4x32x16xf32>
    %114 = vector.shape_cast %113 : vector<1x4x32x16xf32> to vector<4x32x16xf32>
    %115 = vector.shape_cast %114 : vector<4x32x16xf32> to vector<4x1x32x16xf32>
    %116 = vector.shape_cast %115 : vector<4x1x32x16xf32> to vector<4x1x32x16xf32>
    %117 = vector.broadcast %116 : vector<4x1x32x16xf32> to vector<4x2x32x16xf32>
    %118 = vector.shape_cast %117 : vector<4x2x32x16xf32> to vector<8x32x16xf32>
    %cst_51 = arith.constant dense<0.000000e+00> : vector<8x8x16xf32>
    %119 = tpu.matmul %11, %118, %cst_51 {dimension_numbers = #tpu.dot_dimension_numbers<[2], [1], [1], [2], [0, 0, 0, 1, 1, 2], [0], [0]>} : vector<8x8x32xf32>, vector<8x32x16xf32>, vector<8x8x16xf32> -> vector<8x8x16xf32>
    %c0_52 = arith.constant 0 : index
    %c0_53 = arith.constant 0 : index
    %c0_54 = arith.constant 0 : index
    %c0_55 = arith.constant 0 : index
    %120 = vector.load %arg9[%c0_52, %c0_53, %c0_54, %c0_55] : memref<2x4x1x16xf32, #tpu.memory_space<vmem>>, vector<1x4x1x16xf32>
    %121 = vector.shape_cast %120 : vector<1x4x1x16xf32> to vector<4x1x16xf32>
    %122 = vector.shape_cast %121 : vector<4x1x16xf32> to vector<4x1x1x16xf32>
    %123 = vector.shape_cast %122 : vector<4x1x1x16xf32> to vector<4x1x1x16xf32>
    %124 = vector.broadcast %123 : vector<4x1x1x16xf32> to vector<4x2x1x16xf32>
    %125 = vector.shape_cast %124 : vector<4x2x1x16xf32> to vector<8x1x16xf32>
    %126 = vector.broadcast %125 : vector<8x1x16xf32> to vector<8x8x16xf32>
    %127 = arith.addf %119, %126 : vector<8x8x16xf32>
    %128 = vector.extract_strided_slice %127 {offsets = [0, 0, 0], sizes = [8, 8, 8], strides = [1, 1, 1]} : vector<8x8x16xf32> to vector<8x8x8xf32>
    %129 = vector.extract_strided_slice %127 {offsets = [0, 0, 8], sizes = [8, 8, 8], strides = [1, 1, 1]} : vector<8x8x16xf32> to vector<8x8x8xf32>
    %c0_56 = arith.constant 0 : index
    %c0_57 = arith.constant 0 : index
    %c0_58 = arith.constant 0 : index
    %c0_59 = arith.constant 0 : index
    %130 = vector.load %arg10[%c0_56, %c0_57, %c0_58, %c0_59] : memref<2x4x8x32xf32, #tpu.memory_space<vmem>>, vector<1x4x8x32xf32>
    %131 = vector.shape_cast %130 : vector<1x4x8x32xf32> to vector<4x8x32xf32>
    %132 = vector.shape_cast %131 : vector<4x8x32xf32> to vector<4x1x8x32xf32>
    %133 = vector.shape_cast %132 : vector<4x1x8x32xf32> to vector<4x1x8x32xf32>
    %134 = vector.broadcast %133 : vector<4x1x8x32xf32> to vector<4x2x8x32xf32>
    %135 = vector.shape_cast %134 : vector<4x2x8x32xf32> to vector<8x8x32xf32>
    %c0_60 = arith.constant 0 : index
    %c0_61 = arith.constant 0 : index
    %c0_62 = arith.constant 0 : index
    %136 = vector.load %arg11[%c0_60, %c0_61, %c0_62] : memref<2x1x32xf32, #tpu.memory_space<vmem>>, vector<1x1x32xf32>
    %137 = vector.shape_cast %136 : vector<1x1x32xf32> to vector<1x32xf32>
    %cst_63 = arith.constant dense<0.000000e+00> : vector<8x8x8xf32>
    %138 = tpu.matmul %112, %128, %cst_63 {dimension_numbers = #tpu.dot_dimension_numbers<[2], [2], [1], [1], [0, 0, 0, 1, 1, 1], [0], [0]>} : vector<8x8x8xf32>, vector<8x8x8xf32>, vector<8x8x8xf32> -> vector<8x8x8xf32>
    %cst_64 = arith.constant 0.353553385 : f32
    %139 = vector.broadcast %cst_64 : f32 to vector<8x8x8xf32>
    %140 = arith.mulf %138, %139 : vector<8x8x8xf32>
    %cst_65 = arith.constant dense<0xFF800000> : vector<8x8xf32>
    %141 = vector.multi_reduction <maximumf>, %140, %cst_65 [2] : vector<8x8x8xf32> to vector<8x8xf32>
    %142 = vector.shape_cast %141 : vector<8x8xf32> to vector<8x8x1xf32>
    %143 = vector.broadcast %142 : vector<8x8x1xf32> to vector<8x8x8xf32>
    %144 = arith.subf %140, %143 : vector<8x8x8xf32>
    %145 = math.exp %144 : vector<8x8x8xf32>
    %cst_66 = arith.constant dense<0.000000e+00> : vector<8x8xf32>
    %146 = vector.multi_reduction <add>, %145, %cst_66 [2] : vector<8x8x8xf32> to vector<8x8xf32>
    %147 = vector.shape_cast %146 : vector<8x8xf32> to vector<8x8x1xf32>
    %148 = tpu.reciprocal %147 {approx = true} : vector<8x8x1xf32> -> vector<8x8x1xf32>
    %149 = vector.broadcast %148 : vector<8x8x1xf32> to vector<8x8x8xf32>
    %150 = arith.mulf %145, %149 : vector<8x8x8xf32>
    %cst_67 = arith.constant dense<0.000000e+00> : vector<8x8x8xf32>
    %151 = tpu.matmul %150, %129, %cst_67 {dimension_numbers = #tpu.dot_dimension_numbers<[2], [1], [1], [2], [0, 0, 0, 1, 1, 2], [0], [0]>} : vector<8x8x8xf32>, vector<8x8x8xf32>, vector<8x8x8xf32> -> vector<8x8x8xf32>
    %cst_68 = arith.constant dense<0.000000e+00> : vector<8x8x32xf32>
    %152 = tpu.matmul %151, %135, %cst_68 {dimension_numbers = #tpu.dot_dimension_numbers<[2], [1], [1], [2], [0, 0, 0, 1, 1, 2], [0], [0]>} : vector<8x8x8xf32>, vector<8x8x32xf32>, vector<8x8x32xf32> -> vector<8x8x32xf32>
    %153 = vector.shape_cast %152 : vector<8x8x32xf32> to vector<4x16x32xf32>
    %cst_69 = arith.constant dense<0.000000e+00> : vector<16x32xf32>
    %154 = vector.multi_reduction <add>, %153, %cst_69 [0] : vector<4x16x32xf32> to vector<16x32xf32>
    %155 = vector.broadcast %137 : vector<1x32xf32> to vector<16x32xf32>
    %156 = arith.addf %154, %155 : vector<16x32xf32>
    %157 = arith.addf %92, %156 : vector<16x32xf32>
    %158 = vector.extract_strided_slice %14 {offsets = [1, 0], sizes = [1, 32], strides = [1, 1]} : vector<3x32xf32> to vector<1x32xf32>
    %159 = vector.extract_strided_slice %16 {offsets = [1, 0], sizes = [1, 32], strides = [1, 1]} : vector<3x32xf32> to vector<1x32xf32>
    %cst_70 = arith.constant dense<0.000000e+00> : vector<16xf32>
    %160 = vector.multi_reduction <add>, %157, %cst_70 [1] : vector<16x32xf32> to vector<16xf32>
    %161 = vector.shape_cast %160 : vector<16xf32> to vector<16x1xf32>
    %cst_71 = arith.constant 3.200000e+01 : f32
    %162 = vector.broadcast %cst_71 : f32 to vector<16x1xf32>
    %163 = arith.divf %161, %162 : vector<16x1xf32>
    %164 = vector.broadcast %163 : vector<16x1xf32> to vector<16x32xf32>
    %165 = arith.subf %157, %164 : vector<16x32xf32>
    %166 = arith.mulf %165, %165 : vector<16x32xf32>
    %cst_72 = arith.constant dense<0.000000e+00> : vector<16xf32>
    %167 = vector.multi_reduction <add>, %166, %cst_72 [1] : vector<16x32xf32> to vector<16xf32>
    %168 = vector.shape_cast %167 : vector<16xf32> to vector<16x1xf32>
    %cst_73 = arith.constant 3.200000e+01 : f32
    %169 = vector.broadcast %cst_73 : f32 to vector<16x1xf32>
    %170 = arith.divf %168, %169 : vector<16x1xf32>
    %cst_74 = arith.constant 9.99999974E-6 : f32
    %171 = vector.broadcast %cst_74 : f32 to vector<16x1xf32>
    %172 = arith.addf %170, %171 : vector<16x1xf32>
    %173 = math.rsqrt %172 : vector<16x1xf32>
    %174 = vector.broadcast %173 : vector<16x1xf32> to vector<16x32xf32>
    %175 = arith.mulf %165, %174 : vector<16x32xf32>
    %176 = vector.broadcast %158 : vector<1x32xf32> to vector<16x32xf32>
    %177 = arith.mulf %175, %176 : vector<16x32xf32>
    %178 = vector.broadcast %159 : vector<1x32xf32> to vector<16x32xf32>
    %179 = arith.addf %177, %178 : vector<16x32xf32>
    %c0_75 = arith.constant 0 : index
    %c0_76 = arith.constant 0 : index
    %c0_77 = arith.constant 0 : index
    %180 = vector.load %arg12[%c0_75, %c0_76, %c0_77] : memref<2x32x128xf32, #tpu.memory_space<vmem>>, vector<1x32x128xf32>
    %181 = vector.shape_cast %180 : vector<1x32x128xf32> to vector<32x128xf32>
    %cst_78 = arith.constant dense<0.000000e+00> : vector<16x128xf32>
    %182 = tpu.matmul %179, %181, %cst_78 {dimension_numbers = #tpu.dot_dimension_numbers<[1], [0], [0], [1], [0, 0, 1, 1], [], []>} : vector<16x32xf32>, vector<32x128xf32>, vector<16x128xf32> -> vector<16x128xf32>
    %c0_79 = arith.constant 0 : index
    %c0_80 = arith.constant 0 : index
    %c0_81 = arith.constant 0 : index
    %183 = vector.load %arg13[%c0_79, %c0_80, %c0_81] : memref<2x1x128xf32, #tpu.memory_space<vmem>>, vector<1x1x128xf32>
    %184 = vector.shape_cast %183 : vector<1x1x128xf32> to vector<1x128xf32>
    %185 = vector.broadcast %184 : vector<1x128xf32> to vector<16x128xf32>
    %186 = arith.addf %182, %185 : vector<16x128xf32>
    %cst_82 = arith.constant 0.000000e+00 : f32
    %187 = vector.broadcast %cst_82 : f32 to vector<16x128xf32>
    %188 = arith.maximumf %186, %187 : vector<16x128xf32>
    %c0_83 = arith.constant 0 : index
    %c0_84 = arith.constant 0 : index
    %c0_85 = arith.constant 0 : index
    %189 = vector.load %arg14[%c0_83, %c0_84, %c0_85] : memref<2x128x32xf32, #tpu.memory_space<vmem>>, vector<1x128x32xf32>
    %190 = vector.shape_cast %189 : vector<1x128x32xf32> to vector<128x32xf32>
    %cst_86 = arith.constant dense<0.000000e+00> : vector<16x32xf32>
    %191 = tpu.matmul %188, %190, %cst_86 {dimension_numbers = #tpu.dot_dimension_numbers<[1], [0], [0], [1], [0, 0, 1, 1], [], []>} : vector<16x128xf32>, vector<128x32xf32>, vector<16x32xf32> -> vector<16x32xf32>
    %c0_87 = arith.constant 0 : index
    %c0_88 = arith.constant 0 : index
    %c0_89 = arith.constant 0 : index
    %192 = vector.load %arg15[%c0_87, %c0_88, %c0_89] : memref<2x1x32xf32, #tpu.memory_space<vmem>>, vector<1x1x32xf32>
    %193 = vector.shape_cast %192 : vector<1x1x32xf32> to vector<1x32xf32>
    %194 = vector.broadcast %193 : vector<1x32xf32> to vector<16x32xf32>
    %195 = arith.addf %191, %194 : vector<16x32xf32>
    %196 = arith.addf %179, %195 : vector<16x32xf32>
    %197 = vector.extract_strided_slice %14 {offsets = [2, 0], sizes = [1, 32], strides = [1, 1]} : vector<3x32xf32> to vector<1x32xf32>
    %198 = vector.extract_strided_slice %16 {offsets = [2, 0], sizes = [1, 32], strides = [1, 1]} : vector<3x32xf32> to vector<1x32xf32>
    %cst_90 = arith.constant dense<0.000000e+00> : vector<16xf32>
    %199 = vector.multi_reduction <add>, %196, %cst_90 [1] : vector<16x32xf32> to vector<16xf32>
    %200 = vector.shape_cast %199 : vector<16xf32> to vector<16x1xf32>
    %cst_91 = arith.constant 3.200000e+01 : f32
    %201 = vector.broadcast %cst_91 : f32 to vector<16x1xf32>
    %202 = arith.divf %200, %201 : vector<16x1xf32>
    %203 = vector.broadcast %202 : vector<16x1xf32> to vector<16x32xf32>
    %204 = arith.subf %196, %203 : vector<16x32xf32>
    %205 = arith.mulf %204, %204 : vector<16x32xf32>
    %cst_92 = arith.constant dense<0.000000e+00> : vector<16xf32>
    %206 = vector.multi_reduction <add>, %205, %cst_92 [1] : vector<16x32xf32> to vector<16xf32>
    %207 = vector.shape_cast %206 : vector<16xf32> to vector<16x1xf32>
    %cst_93 = arith.constant 3.200000e+01 : f32
    %208 = vector.broadcast %cst_93 : f32 to vector<16x1xf32>
    %209 = arith.divf %207, %208 : vector<16x1xf32>
    %cst_94 = arith.constant 9.99999974E-6 : f32
    %210 = vector.broadcast %cst_94 : f32 to vector<16x1xf32>
    %211 = arith.addf %209, %210 : vector<16x1xf32>
    %212 = math.rsqrt %211 : vector<16x1xf32>
    %213 = vector.broadcast %212 : vector<16x1xf32> to vector<16x32xf32>
    %214 = arith.mulf %204, %213 : vector<16x32xf32>
    %215 = vector.broadcast %197 : vector<1x32xf32> to vector<16x32xf32>
    %216 = arith.mulf %214, %215 : vector<16x32xf32>
    %217 = vector.broadcast %198 : vector<1x32xf32> to vector<16x32xf32>
    %218 = arith.addf %216, %217 : vector<16x32xf32>
    %c1 = arith.constant 1 : index
    %c0_95 = arith.constant 0 : index
    %c0_96 = arith.constant 0 : index
    %219 = vector.load %arg16[%c1, %c0_95, %c0_96] : memref<2x3x32xf32, #tpu.memory_space<vmem>>, vector<1x3x32xf32>
    %220 = vector.shape_cast %219 : vector<1x3x32xf32> to vector<3x32xf32>
    %c1_97 = arith.constant 1 : index
    %c0_98 = arith.constant 0 : index
    %c0_99 = arith.constant 0 : index
    %221 = vector.load %arg17[%c1_97, %c0_98, %c0_99] : memref<2x3x32xf32, #tpu.memory_space<vmem>>, vector<1x3x32xf32>
    %222 = vector.shape_cast %221 : vector<1x3x32xf32> to vector<3x32xf32>
    %223 = vector.shape_cast %218 : vector<16x32xf32> to vector<2x8x32xf32>
    %224 = vector.shape_cast %223 : vector<2x8x32xf32> to vector<1x2x8x32xf32>
    %225 = vector.shape_cast %224 : vector<1x2x8x32xf32> to vector<1x2x8x32xf32>
    %226 = vector.broadcast %225 : vector<1x2x8x32xf32> to vector<4x2x8x32xf32>
    %227 = vector.shape_cast %226 : vector<4x2x8x32xf32> to vector<8x8x32xf32>
    %c1_100 = arith.constant 1 : index
    %c0_101 = arith.constant 0 : index
    %c0_102 = arith.constant 0 : index
    %c0_103 = arith.constant 0 : index
    %228 = vector.load %arg2[%c1_100, %c0_101, %c0_102, %c0_103] : memref<2x4x32x24xf32, #tpu.memory_space<vmem>>, vector<1x4x32x24xf32>
    %229 = vector.shape_cast %228 : vector<1x4x32x24xf32> to vector<4x32x24xf32>
    %230 = vector.shape_cast %229 : vector<4x32x24xf32> to vector<4x1x32x24xf32>
    %231 = vector.shape_cast %230 : vector<4x1x32x24xf32> to vector<4x1x32x24xf32>
    %232 = vector.broadcast %231 : vector<4x1x32x24xf32> to vector<4x2x32x24xf32>
    %233 = vector.shape_cast %232 : vector<4x2x32x24xf32> to vector<8x32x24xf32>
    %cst_104 = arith.constant dense<0.000000e+00> : vector<8x8x24xf32>
    %234 = tpu.matmul %227, %233, %cst_104 {dimension_numbers = #tpu.dot_dimension_numbers<[2], [1], [1], [2], [0, 0, 0, 1, 1, 2], [0], [0]>} : vector<8x8x32xf32>, vector<8x32x24xf32>, vector<8x8x24xf32> -> vector<8x8x24xf32>
    %c1_105 = arith.constant 1 : index
    %c0_106 = arith.constant 0 : index
    %c0_107 = arith.constant 0 : index
    %c0_108 = arith.constant 0 : index
    %235 = vector.load %arg3[%c1_105, %c0_106, %c0_107, %c0_108] : memref<2x4x1x24xf32, #tpu.memory_space<vmem>>, vector<1x4x1x24xf32>
    %236 = vector.shape_cast %235 : vector<1x4x1x24xf32> to vector<4x1x24xf32>
    %237 = vector.shape_cast %236 : vector<4x1x24xf32> to vector<4x1x1x24xf32>
    %238 = vector.shape_cast %237 : vector<4x1x1x24xf32> to vector<4x1x1x24xf32>
    %239 = vector.broadcast %238 : vector<4x1x1x24xf32> to vector<4x2x1x24xf32>
    %240 = vector.shape_cast %239 : vector<4x2x1x24xf32> to vector<8x1x24xf32>
    %241 = vector.broadcast %240 : vector<8x1x24xf32> to vector<8x8x24xf32>
    %242 = arith.addf %234, %241 : vector<8x8x24xf32>
    %243 = vector.extract_strided_slice %242 {offsets = [0, 0, 0], sizes = [8, 8, 8], strides = [1, 1, 1]} : vector<8x8x24xf32> to vector<8x8x8xf32>
    %244 = vector.extract_strided_slice %242 {offsets = [0, 0, 8], sizes = [8, 8, 8], strides = [1, 1, 1]} : vector<8x8x24xf32> to vector<8x8x8xf32>
    %245 = vector.extract_strided_slice %242 {offsets = [0, 0, 16], sizes = [8, 8, 8], strides = [1, 1, 1]} : vector<8x8x24xf32> to vector<8x8x8xf32>
    %c1_109 = arith.constant 1 : index
    %c0_110 = arith.constant 0 : index
    %c0_111 = arith.constant 0 : index
    %c0_112 = arith.constant 0 : index
    %246 = vector.load %arg4[%c1_109, %c0_110, %c0_111, %c0_112] : memref<2x4x8x32xf32, #tpu.memory_space<vmem>>, vector<1x4x8x32xf32>
    %247 = vector.shape_cast %246 : vector<1x4x8x32xf32> to vector<4x8x32xf32>
    %248 = vector.shape_cast %247 : vector<4x8x32xf32> to vector<4x1x8x32xf32>
    %249 = vector.shape_cast %248 : vector<4x1x8x32xf32> to vector<4x1x8x32xf32>
    %250 = vector.broadcast %249 : vector<4x1x8x32xf32> to vector<4x2x8x32xf32>
    %251 = vector.shape_cast %250 : vector<4x2x8x32xf32> to vector<8x8x32xf32>
    %c1_113 = arith.constant 1 : index
    %c0_114 = arith.constant 0 : index
    %c0_115 = arith.constant 0 : index
    %252 = vector.load %arg5[%c1_113, %c0_114, %c0_115] : memref<2x1x32xf32, #tpu.memory_space<vmem>>, vector<1x1x32xf32>
    %253 = vector.shape_cast %252 : vector<1x1x32xf32> to vector<1x32xf32>
    %cst_116 = arith.constant dense<0.000000e+00> : vector<8x8x8xf32>
    %254 = tpu.matmul %243, %244, %cst_116 {dimension_numbers = #tpu.dot_dimension_numbers<[2], [2], [1], [1], [0, 0, 0, 1, 1, 1], [0], [0]>} : vector<8x8x8xf32>, vector<8x8x8xf32>, vector<8x8x8xf32> -> vector<8x8x8xf32>
    %cst_117 = arith.constant 0.353553385 : f32
    %255 = vector.broadcast %cst_117 : f32 to vector<8x8x8xf32>
    %256 = arith.mulf %254, %255 : vector<8x8x8xf32>
    %257 = vector.shape_cast %5 : vector<8x8xf32> to vector<1x8x8xf32>
    %258 = vector.broadcast %257 : vector<1x8x8xf32> to vector<8x8x8xf32>
    %259 = arith.addf %256, %258 : vector<8x8x8xf32>
    %cst_118 = arith.constant dense<0xFF800000> : vector<8x8xf32>
    %260 = vector.multi_reduction <maximumf>, %259, %cst_118 [2] : vector<8x8x8xf32> to vector<8x8xf32>
    %261 = vector.shape_cast %260 : vector<8x8xf32> to vector<8x8x1xf32>
    %262 = vector.broadcast %261 : vector<8x8x1xf32> to vector<8x8x8xf32>
    %263 = arith.subf %259, %262 : vector<8x8x8xf32>
    %264 = math.exp %263 : vector<8x8x8xf32>
    %cst_119 = arith.constant dense<0.000000e+00> : vector<8x8xf32>
    %265 = vector.multi_reduction <add>, %264, %cst_119 [2] : vector<8x8x8xf32> to vector<8x8xf32>
    %266 = vector.shape_cast %265 : vector<8x8xf32> to vector<8x8x1xf32>
    %267 = tpu.reciprocal %266 {approx = true} : vector<8x8x1xf32> -> vector<8x8x1xf32>
    %268 = vector.broadcast %267 : vector<8x8x1xf32> to vector<8x8x8xf32>
    %269 = arith.mulf %264, %268 : vector<8x8x8xf32>
    %cst_120 = arith.constant dense<0.000000e+00> : vector<8x8x8xf32>
    %270 = tpu.matmul %269, %245, %cst_120 {dimension_numbers = #tpu.dot_dimension_numbers<[2], [1], [1], [2], [0, 0, 0, 1, 1, 2], [0], [0]>} : vector<8x8x8xf32>, vector<8x8x8xf32>, vector<8x8x8xf32> -> vector<8x8x8xf32>
    %cst_121 = arith.constant dense<0.000000e+00> : vector<8x8x32xf32>
    %271 = tpu.matmul %270, %251, %cst_121 {dimension_numbers = #tpu.dot_dimension_numbers<[2], [1], [1], [2], [0, 0, 0, 1, 1, 2], [0], [0]>} : vector<8x8x8xf32>, vector<8x8x32xf32>, vector<8x8x32xf32> -> vector<8x8x32xf32>
    %272 = vector.shape_cast %271 : vector<8x8x32xf32> to vector<4x16x32xf32>
    %cst_122 = arith.constant dense<0.000000e+00> : vector<16x32xf32>
    %273 = vector.multi_reduction <add>, %272, %cst_122 [0] : vector<4x16x32xf32> to vector<16x32xf32>
    %274 = vector.broadcast %253 : vector<1x32xf32> to vector<16x32xf32>
    %275 = arith.addf %273, %274 : vector<16x32xf32>
    %276 = arith.addf %218, %275 : vector<16x32xf32>
    %277 = vector.extract_strided_slice %220 {offsets = [0, 0], sizes = [1, 32], strides = [1, 1]} : vector<3x32xf32> to vector<1x32xf32>
    %278 = vector.extract_strided_slice %222 {offsets = [0, 0], sizes = [1, 32], strides = [1, 1]} : vector<3x32xf32> to vector<1x32xf32>
    %cst_123 = arith.constant dense<0.000000e+00> : vector<16xf32>
    %279 = vector.multi_reduction <add>, %276, %cst_123 [1] : vector<16x32xf32> to vector<16xf32>
    %280 = vector.shape_cast %279 : vector<16xf32> to vector<16x1xf32>
    %cst_124 = arith.constant 3.200000e+01 : f32
    %281 = vector.broadcast %cst_124 : f32 to vector<16x1xf32>
    %282 = arith.divf %280, %281 : vector<16x1xf32>
    %283 = vector.broadcast %282 : vector<16x1xf32> to vector<16x32xf32>
    %284 = arith.subf %276, %283 : vector<16x32xf32>
    %285 = arith.mulf %284, %284 : vector<16x32xf32>
    %cst_125 = arith.constant dense<0.000000e+00> : vector<16xf32>
    %286 = vector.multi_reduction <add>, %285, %cst_125 [1] : vector<16x32xf32> to vector<16xf32>
    %287 = vector.shape_cast %286 : vector<16xf32> to vector<16x1xf32>
    %cst_126 = arith.constant 3.200000e+01 : f32
    %288 = vector.broadcast %cst_126 : f32 to vector<16x1xf32>
    %289 = arith.divf %287, %288 : vector<16x1xf32>
    %cst_127 = arith.constant 9.99999974E-6 : f32
    %290 = vector.broadcast %cst_127 : f32 to vector<16x1xf32>
    %291 = arith.addf %289, %290 : vector<16x1xf32>
    %292 = math.rsqrt %291 : vector<16x1xf32>
    %293 = vector.broadcast %292 : vector<16x1xf32> to vector<16x32xf32>
    %294 = arith.mulf %284, %293 : vector<16x32xf32>
    %295 = vector.broadcast %277 : vector<1x32xf32> to vector<16x32xf32>
    %296 = arith.mulf %294, %295 : vector<16x32xf32>
    %297 = vector.broadcast %278 : vector<1x32xf32> to vector<16x32xf32>
    %298 = arith.addf %296, %297 : vector<16x32xf32>
    %299 = vector.shape_cast %298 : vector<16x32xf32> to vector<2x8x32xf32>
    %300 = vector.shape_cast %299 : vector<2x8x32xf32> to vector<1x2x8x32xf32>
    %301 = vector.shape_cast %300 : vector<1x2x8x32xf32> to vector<1x2x8x32xf32>
    %302 = vector.broadcast %301 : vector<1x2x8x32xf32> to vector<4x2x8x32xf32>
    %303 = vector.shape_cast %302 : vector<4x2x8x32xf32> to vector<8x8x32xf32>
    %c1_128 = arith.constant 1 : index
    %c0_129 = arith.constant 0 : index
    %c0_130 = arith.constant 0 : index
    %c0_131 = arith.constant 0 : index
    %304 = vector.load %arg6[%c1_128, %c0_129, %c0_130, %c0_131] : memref<2x4x32x8xf32, #tpu.memory_space<vmem>>, vector<1x4x32x8xf32>
    %305 = vector.shape_cast %304 : vector<1x4x32x8xf32> to vector<4x32x8xf32>
    %306 = vector.shape_cast %305 : vector<4x32x8xf32> to vector<4x1x32x8xf32>
    %307 = vector.shape_cast %306 : vector<4x1x32x8xf32> to vector<4x1x32x8xf32>
    %308 = vector.broadcast %307 : vector<4x1x32x8xf32> to vector<4x2x32x8xf32>
    %309 = vector.shape_cast %308 : vector<4x2x32x8xf32> to vector<8x32x8xf32>
    %cst_132 = arith.constant dense<0.000000e+00> : vector<8x8x8xf32>
    %310 = tpu.matmul %303, %309, %cst_132 {dimension_numbers = #tpu.dot_dimension_numbers<[2], [1], [1], [2], [0, 0, 0, 1, 1, 2], [0], [0]>} : vector<8x8x32xf32>, vector<8x32x8xf32>, vector<8x8x8xf32> -> vector<8x8x8xf32>
    %c1_133 = arith.constant 1 : index
    %c0_134 = arith.constant 0 : index
    %c0_135 = arith.constant 0 : index
    %c0_136 = arith.constant 0 : index
    %311 = vector.load %arg7[%c1_133, %c0_134, %c0_135, %c0_136] : memref<2x4x1x8xf32, #tpu.memory_space<vmem>>, vector<1x4x1x8xf32>
    %312 = vector.shape_cast %311 : vector<1x4x1x8xf32> to vector<4x1x8xf32>
    %313 = vector.shape_cast %312 : vector<4x1x8xf32> to vector<4x1x1x8xf32>
    %314 = vector.shape_cast %313 : vector<4x1x1x8xf32> to vector<4x1x1x8xf32>
    %315 = vector.broadcast %314 : vector<4x1x1x8xf32> to vector<4x2x1x8xf32>
    %316 = vector.shape_cast %315 : vector<4x2x1x8xf32> to vector<8x1x8xf32>
    %317 = vector.broadcast %316 : vector<8x1x8xf32> to vector<8x8x8xf32>
    %318 = arith.addf %310, %317 : vector<8x8x8xf32>
    %c1_137 = arith.constant 1 : index
    %c0_138 = arith.constant 0 : index
    %c0_139 = arith.constant 0 : index
    %c0_140 = arith.constant 0 : index
    %319 = vector.load %arg8[%c1_137, %c0_138, %c0_139, %c0_140] : memref<2x4x32x16xf32, #tpu.memory_space<vmem>>, vector<1x4x32x16xf32>
    %320 = vector.shape_cast %319 : vector<1x4x32x16xf32> to vector<4x32x16xf32>
    %321 = vector.shape_cast %320 : vector<4x32x16xf32> to vector<4x1x32x16xf32>
    %322 = vector.shape_cast %321 : vector<4x1x32x16xf32> to vector<4x1x32x16xf32>
    %323 = vector.broadcast %322 : vector<4x1x32x16xf32> to vector<4x2x32x16xf32>
    %324 = vector.shape_cast %323 : vector<4x2x32x16xf32> to vector<8x32x16xf32>
    %cst_141 = arith.constant dense<0.000000e+00> : vector<8x8x16xf32>
    %325 = tpu.matmul %11, %324, %cst_141 {dimension_numbers = #tpu.dot_dimension_numbers<[2], [1], [1], [2], [0, 0, 0, 1, 1, 2], [0], [0]>} : vector<8x8x32xf32>, vector<8x32x16xf32>, vector<8x8x16xf32> -> vector<8x8x16xf32>
    %c1_142 = arith.constant 1 : index
    %c0_143 = arith.constant 0 : index
    %c0_144 = arith.constant 0 : index
    %c0_145 = arith.constant 0 : index
    %326 = vector.load %arg9[%c1_142, %c0_143, %c0_144, %c0_145] : memref<2x4x1x16xf32, #tpu.memory_space<vmem>>, vector<1x4x1x16xf32>
    %327 = vector.shape_cast %326 : vector<1x4x1x16xf32> to vector<4x1x16xf32>
    %328 = vector.shape_cast %327 : vector<4x1x16xf32> to vector<4x1x1x16xf32>
    %329 = vector.shape_cast %328 : vector<4x1x1x16xf32> to vector<4x1x1x16xf32>
    %330 = vector.broadcast %329 : vector<4x1x1x16xf32> to vector<4x2x1x16xf32>
    %331 = vector.shape_cast %330 : vector<4x2x1x16xf32> to vector<8x1x16xf32>
    %332 = vector.broadcast %331 : vector<8x1x16xf32> to vector<8x8x16xf32>
    %333 = arith.addf %325, %332 : vector<8x8x16xf32>
    %334 = vector.extract_strided_slice %333 {offsets = [0, 0, 0], sizes = [8, 8, 8], strides = [1, 1, 1]} : vector<8x8x16xf32> to vector<8x8x8xf32>
    %335 = vector.extract_strided_slice %333 {offsets = [0, 0, 8], sizes = [8, 8, 8], strides = [1, 1, 1]} : vector<8x8x16xf32> to vector<8x8x8xf32>
    %c1_146 = arith.constant 1 : index
    %c0_147 = arith.constant 0 : index
    %c0_148 = arith.constant 0 : index
    %c0_149 = arith.constant 0 : index
    %336 = vector.load %arg10[%c1_146, %c0_147, %c0_148, %c0_149] : memref<2x4x8x32xf32, #tpu.memory_space<vmem>>, vector<1x4x8x32xf32>
    %337 = vector.shape_cast %336 : vector<1x4x8x32xf32> to vector<4x8x32xf32>
    %338 = vector.shape_cast %337 : vector<4x8x32xf32> to vector<4x1x8x32xf32>
    %339 = vector.shape_cast %338 : vector<4x1x8x32xf32> to vector<4x1x8x32xf32>
    %340 = vector.broadcast %339 : vector<4x1x8x32xf32> to vector<4x2x8x32xf32>
    %341 = vector.shape_cast %340 : vector<4x2x8x32xf32> to vector<8x8x32xf32>
    %c1_150 = arith.constant 1 : index
    %c0_151 = arith.constant 0 : index
    %c0_152 = arith.constant 0 : index
    %342 = vector.load %arg11[%c1_150, %c0_151, %c0_152] : memref<2x1x32xf32, #tpu.memory_space<vmem>>, vector<1x1x32xf32>
    %343 = vector.shape_cast %342 : vector<1x1x32xf32> to vector<1x32xf32>
    %cst_153 = arith.constant dense<0.000000e+00> : vector<8x8x8xf32>
    %344 = tpu.matmul %318, %334, %cst_153 {dimension_numbers = #tpu.dot_dimension_numbers<[2], [2], [1], [1], [0, 0, 0, 1, 1, 1], [0], [0]>} : vector<8x8x8xf32>, vector<8x8x8xf32>, vector<8x8x8xf32> -> vector<8x8x8xf32>
    %cst_154 = arith.constant 0.353553385 : f32
    %345 = vector.broadcast %cst_154 : f32 to vector<8x8x8xf32>
    %346 = arith.mulf %344, %345 : vector<8x8x8xf32>
    %cst_155 = arith.constant dense<0xFF800000> : vector<8x8xf32>
    %347 = vector.multi_reduction <maximumf>, %346, %cst_155 [2] : vector<8x8x8xf32> to vector<8x8xf32>
    %348 = vector.shape_cast %347 : vector<8x8xf32> to vector<8x8x1xf32>
    %349 = vector.broadcast %348 : vector<8x8x1xf32> to vector<8x8x8xf32>
    %350 = arith.subf %346, %349 : vector<8x8x8xf32>
    %351 = math.exp %350 : vector<8x8x8xf32>
    %cst_156 = arith.constant dense<0.000000e+00> : vector<8x8xf32>
    %352 = vector.multi_reduction <add>, %351, %cst_156 [2] : vector<8x8x8xf32> to vector<8x8xf32>
    %353 = vector.shape_cast %352 : vector<8x8xf32> to vector<8x8x1xf32>
    %354 = tpu.reciprocal %353 {approx = true} : vector<8x8x1xf32> -> vector<8x8x1xf32>
    %355 = vector.broadcast %354 : vector<8x8x1xf32> to vector<8x8x8xf32>
    %356 = arith.mulf %351, %355 : vector<8x8x8xf32>
    %cst_157 = arith.constant dense<0.000000e+00> : vector<8x8x8xf32>
    %357 = tpu.matmul %356, %335, %cst_157 {dimension_numbers = #tpu.dot_dimension_numbers<[2], [1], [1], [2], [0, 0, 0, 1, 1, 2], [0], [0]>} : vector<8x8x8xf32>, vector<8x8x8xf32>, vector<8x8x8xf32> -> vector<8x8x8xf32>
    %cst_158 = arith.constant dense<0.000000e+00> : vector<8x8x32xf32>
    %358 = tpu.matmul %357, %341, %cst_158 {dimension_numbers = #tpu.dot_dimension_numbers<[2], [1], [1], [2], [0, 0, 0, 1, 1, 2], [0], [0]>} : vector<8x8x8xf32>, vector<8x8x32xf32>, vector<8x8x32xf32> -> vector<8x8x32xf32>
    %359 = vector.shape_cast %358 : vector<8x8x32xf32> to vector<4x16x32xf32>
    %cst_159 = arith.constant dense<0.000000e+00> : vector<16x32xf32>
    %360 = vector.multi_reduction <add>, %359, %cst_159 [0] : vector<4x16x32xf32> to vector<16x32xf32>
    %361 = vector.broadcast %343 : vector<1x32xf32> to vector<16x32xf32>
    %362 = arith.addf %360, %361 : vector<16x32xf32>
    %363 = arith.addf %298, %362 : vector<16x32xf32>
    %364 = vector.extract_strided_slice %220 {offsets = [1, 0], sizes = [1, 32], strides = [1, 1]} : vector<3x32xf32> to vector<1x32xf32>
    %365 = vector.extract_strided_slice %222 {offsets = [1, 0], sizes = [1, 32], strides = [1, 1]} : vector<3x32xf32> to vector<1x32xf32>
    %cst_160 = arith.constant dense<0.000000e+00> : vector<16xf32>
    %366 = vector.multi_reduction <add>, %363, %cst_160 [1] : vector<16x32xf32> to vector<16xf32>
    %367 = vector.shape_cast %366 : vector<16xf32> to vector<16x1xf32>
    %cst_161 = arith.constant 3.200000e+01 : f32
    %368 = vector.broadcast %cst_161 : f32 to vector<16x1xf32>
    %369 = arith.divf %367, %368 : vector<16x1xf32>
    %370 = vector.broadcast %369 : vector<16x1xf32> to vector<16x32xf32>
    %371 = arith.subf %363, %370 : vector<16x32xf32>
    %372 = arith.mulf %371, %371 : vector<16x32xf32>
    %cst_162 = arith.constant dense<0.000000e+00> : vector<16xf32>
    %373 = vector.multi_reduction <add>, %372, %cst_162 [1] : vector<16x32xf32> to vector<16xf32>
    %374 = vector.shape_cast %373 : vector<16xf32> to vector<16x1xf32>
    %cst_163 = arith.constant 3.200000e+01 : f32
    %375 = vector.broadcast %cst_163 : f32 to vector<16x1xf32>
    %376 = arith.divf %374, %375 : vector<16x1xf32>
    %cst_164 = arith.constant 9.99999974E-6 : f32
    %377 = vector.broadcast %cst_164 : f32 to vector<16x1xf32>
    %378 = arith.addf %376, %377 : vector<16x1xf32>
    %379 = math.rsqrt %378 : vector<16x1xf32>
    %380 = vector.broadcast %379 : vector<16x1xf32> to vector<16x32xf32>
    %381 = arith.mulf %371, %380 : vector<16x32xf32>
    %382 = vector.broadcast %364 : vector<1x32xf32> to vector<16x32xf32>
    %383 = arith.mulf %381, %382 : vector<16x32xf32>
    %384 = vector.broadcast %365 : vector<1x32xf32> to vector<16x32xf32>
    %385 = arith.addf %383, %384 : vector<16x32xf32>
    %c1_165 = arith.constant 1 : index
    %c0_166 = arith.constant 0 : index
    %c0_167 = arith.constant 0 : index
    %386 = vector.load %arg12[%c1_165, %c0_166, %c0_167] : memref<2x32x128xf32, #tpu.memory_space<vmem>>, vector<1x32x128xf32>
    %387 = vector.shape_cast %386 : vector<1x32x128xf32> to vector<32x128xf32>
    %cst_168 = arith.constant dense<0.000000e+00> : vector<16x128xf32>
    %388 = tpu.matmul %385, %387, %cst_168 {dimension_numbers = #tpu.dot_dimension_numbers<[1], [0], [0], [1], [0, 0, 1, 1], [], []>} : vector<16x32xf32>, vector<32x128xf32>, vector<16x128xf32> -> vector<16x128xf32>
    %c1_169 = arith.constant 1 : index
    %c0_170 = arith.constant 0 : index
    %c0_171 = arith.constant 0 : index
    %389 = vector.load %arg13[%c1_169, %c0_170, %c0_171] : memref<2x1x128xf32, #tpu.memory_space<vmem>>, vector<1x1x128xf32>
    %390 = vector.shape_cast %389 : vector<1x1x128xf32> to vector<1x128xf32>
    %391 = vector.broadcast %390 : vector<1x128xf32> to vector<16x128xf32>
    %392 = arith.addf %388, %391 : vector<16x128xf32>
    %cst_172 = arith.constant 0.000000e+00 : f32
    %393 = vector.broadcast %cst_172 : f32 to vector<16x128xf32>
    %394 = arith.maximumf %392, %393 : vector<16x128xf32>
    %c1_173 = arith.constant 1 : index
    %c0_174 = arith.constant 0 : index
    %c0_175 = arith.constant 0 : index
    %395 = vector.load %arg14[%c1_173, %c0_174, %c0_175] : memref<2x128x32xf32, #tpu.memory_space<vmem>>, vector<1x128x32xf32>
    %396 = vector.shape_cast %395 : vector<1x128x32xf32> to vector<128x32xf32>
    %cst_176 = arith.constant dense<0.000000e+00> : vector<16x32xf32>
    %397 = tpu.matmul %394, %396, %cst_176 {dimension_numbers = #tpu.dot_dimension_numbers<[1], [0], [0], [1], [0, 0, 1, 1], [], []>} : vector<16x128xf32>, vector<128x32xf32>, vector<16x32xf32> -> vector<16x32xf32>
    %c1_177 = arith.constant 1 : index
    %c0_178 = arith.constant 0 : index
    %c0_179 = arith.constant 0 : index
    %398 = vector.load %arg15[%c1_177, %c0_178, %c0_179] : memref<2x1x32xf32, #tpu.memory_space<vmem>>, vector<1x1x32xf32>
    %399 = vector.shape_cast %398 : vector<1x1x32xf32> to vector<1x32xf32>
    %400 = vector.broadcast %399 : vector<1x32xf32> to vector<16x32xf32>
    %401 = arith.addf %397, %400 : vector<16x32xf32>
    %402 = arith.addf %385, %401 : vector<16x32xf32>
    %403 = vector.extract_strided_slice %220 {offsets = [2, 0], sizes = [1, 32], strides = [1, 1]} : vector<3x32xf32> to vector<1x32xf32>
    %404 = vector.extract_strided_slice %222 {offsets = [2, 0], sizes = [1, 32], strides = [1, 1]} : vector<3x32xf32> to vector<1x32xf32>
    %cst_180 = arith.constant dense<0.000000e+00> : vector<16xf32>
    %405 = vector.multi_reduction <add>, %402, %cst_180 [1] : vector<16x32xf32> to vector<16xf32>
    %406 = vector.shape_cast %405 : vector<16xf32> to vector<16x1xf32>
    %cst_181 = arith.constant 3.200000e+01 : f32
    %407 = vector.broadcast %cst_181 : f32 to vector<16x1xf32>
    %408 = arith.divf %406, %407 : vector<16x1xf32>
    %409 = vector.broadcast %408 : vector<16x1xf32> to vector<16x32xf32>
    %410 = arith.subf %402, %409 : vector<16x32xf32>
    %411 = arith.mulf %410, %410 : vector<16x32xf32>
    %cst_182 = arith.constant dense<0.000000e+00> : vector<16xf32>
    %412 = vector.multi_reduction <add>, %411, %cst_182 [1] : vector<16x32xf32> to vector<16xf32>
    %413 = vector.shape_cast %412 : vector<16xf32> to vector<16x1xf32>
    %cst_183 = arith.constant 3.200000e+01 : f32
    %414 = vector.broadcast %cst_183 : f32 to vector<16x1xf32>
    %415 = arith.divf %413, %414 : vector<16x1xf32>
    %cst_184 = arith.constant 9.99999974E-6 : f32
    %416 = vector.broadcast %cst_184 : f32 to vector<16x1xf32>
    %417 = arith.addf %415, %416 : vector<16x1xf32>
    %418 = math.rsqrt %417 : vector<16x1xf32>
    %419 = vector.broadcast %418 : vector<16x1xf32> to vector<16x32xf32>
    %420 = arith.mulf %410, %419 : vector<16x32xf32>
    %421 = vector.broadcast %403 : vector<1x32xf32> to vector<16x32xf32>
    %422 = arith.mulf %420, %421 : vector<16x32xf32>
    %423 = vector.broadcast %404 : vector<1x32xf32> to vector<16x32xf32>
    %424 = arith.addf %422, %423 : vector<16x32xf32>
    %c0_185 = arith.constant 0 : index
    %c0_186 = arith.constant 0 : index
    %425 = vector.load %arg18[%c0_185, %c0_186] : memref<32x19xf32, #tpu.memory_space<vmem>>, vector<32x19xf32>
    %cst_187 = arith.constant dense<0.000000e+00> : vector<16x19xf32>
    %426 = tpu.matmul %424, %425, %cst_187 {dimension_numbers = #tpu.dot_dimension_numbers<[1], [0], [0], [1], [0, 0, 1, 1], [], []>} : vector<16x32xf32>, vector<32x19xf32>, vector<16x19xf32> -> vector<16x19xf32>
    %c0_188 = arith.constant 0 : index
    %c0_189 = arith.constant 0 : index
    %427 = vector.load %arg19[%c0_188, %c0_189] : memref<1x19xf32, #tpu.memory_space<vmem>>, vector<1x19xf32>
    %428 = vector.broadcast %427 : vector<1x19xf32> to vector<16x19xf32>
    %429 = arith.addf %426, %428 : vector<16x19xf32>
    %430 = vector.extract_strided_slice %429 {offsets = [0, 0], sizes = [16, 8], strides = [1, 1]} : vector<16x19xf32> to vector<16x8xf32>
    %431 = vector.extract_strided_slice %429 {offsets = [0, 8], sizes = [16, 8], strides = [1, 1]} : vector<16x19xf32> to vector<16x8xf32>
    %432 = vector.extract_strided_slice %429 {offsets = [0, 16], sizes = [16, 3], strides = [1, 1]} : vector<16x19xf32> to vector<16x3xf32>
    %cst_190 = arith.constant dense<0xFF800000> : vector<16xf32>
    %433 = vector.multi_reduction <maximumf>, %430, %cst_190 [1] : vector<16x8xf32> to vector<16xf32>
    %434 = vector.shape_cast %433 : vector<16xf32> to vector<16x1xf32>
    %435 = vector.broadcast %434 : vector<16x1xf32> to vector<16x8xf32>
    %436 = arith.subf %430, %435 : vector<16x8xf32>
    %437 = math.exp %436 : vector<16x8xf32>
    %cst_191 = arith.constant dense<0.000000e+00> : vector<16xf32>
    %438 = vector.multi_reduction <add>, %437, %cst_191 [1] : vector<16x8xf32> to vector<16xf32>
    %439 = vector.shape_cast %438 : vector<16xf32> to vector<16x1xf32>
    %440 = math.log %439 : vector<16x1xf32>
    %441 = arith.addf %434, %440 : vector<16x1xf32>
    %442 = tpu.iota {dimensions = array<i32: 1>} : vector<16x8xi32>
    %c0_192 = arith.constant 0 : index
    %c0_193 = arith.constant 0 : index
    %443 = vector.load %arg20[%c0_192, %c0_193] : memref<16x1xi32, #tpu.memory_space<vmem>>, vector<16x1xi32>
    %444 = vector.broadcast %443 : vector<16x1xi32> to vector<16x8xi32>
    %445 = arith.cmpi eq, %442, %444 : vector<16x8xi32>
    %446 = arith.extui %445 : vector<16x8xi1> to vector<16x8xi32>
    %447 = arith.sitofp %446 : vector<16x8xi32> to vector<16x8xf32>
    %448 = arith.mulf %430, %447 : vector<16x8xf32>
    %cst_194 = arith.constant dense<0.000000e+00> : vector<16xf32>
    %449 = vector.multi_reduction <add>, %448, %cst_194 [1] : vector<16x8xf32> to vector<16xf32>
    %450 = vector.shape_cast %449 : vector<16xf32> to vector<16x1xf32>
    %451 = arith.subf %441, %450 : vector<16x1xf32>
    %452 = vector.shape_cast %451 : vector<16x1xf32> to vector<1x16x1xf32>
    %cst_195 = arith.constant dense<0.000000e+00> : vector<1xf32>
    %453 = vector.multi_reduction <add>, %452, %cst_195 [1, 2] : vector<1x16x1xf32> to vector<1xf32>
    %454 = vector.shape_cast %453 : vector<1xf32> to vector<1x1x1xf32>
    %455 = vector.extract %454[0, 0, 0] : f32 from vector<1x1x1xf32>
    %cst_196 = arith.constant 6.250000e-02 : f32
    %456 = arith.mulf %455, %cst_196 : f32
    %c0_197 = arith.constant 0 : index
    %457 = memref.load %arg23[%c0_197] : memref<8xf32, #tpu.memory_space<smem>>
    memref.store %456, %arg23[%c0_197] : memref<8xf32, #tpu.memory_space<smem>>
    %cst_198 = arith.constant 0.000000e+00 : f32
    %458 = vector.broadcast %cst_198 : f32 to vector<16x3xf32>
    %459 = arith.subf %458, %432 : vector<16x3xf32>
    %460 = math.exp %459 : vector<16x3xf32>
    %cst_199 = arith.constant 1.000000e+00 : f32
    %461 = vector.broadcast %cst_199 : f32 to vector<16x3xf32>
    %462 = arith.addf %461, %460 : vector<16x3xf32>
    %463 = tpu.reciprocal %462 {approx = true} : vector<16x3xf32> -> vector<16x3xf32>
    %c0_200 = arith.constant 0 : index
    %c0_201 = arith.constant 0 : index
    %464 = vector.load %arg21[%c0_200, %c0_201] : memref<16x3xf32, #tpu.memory_space<vmem>>, vector<16x3xf32>
    %465 = arith.subf %463, %464 : vector<16x3xf32>
    %466 = math.absf %465 : vector<16x3xf32>
    %467 = vector.extract_strided_slice %466 {offsets = [0, 0], sizes = [16, 1], strides = [1, 1]} : vector<16x3xf32> to vector<16x1xf32>
    %468 = vector.shape_cast %467 : vector<16x1xf32> to vector<1x16x1xf32>
    %cst_202 = arith.constant dense<0.000000e+00> : vector<1xf32>
    %469 = vector.multi_reduction <add>, %468, %cst_202 [1, 2] : vector<1x16x1xf32> to vector<1xf32>
    %470 = vector.shape_cast %469 : vector<1xf32> to vector<1x1x1xf32>
    %471 = vector.extract %470[0, 0, 0] : f32 from vector<1x1x1xf32>
    %cst_203 = arith.constant 6.250000e-02 : f32
    %472 = arith.mulf %471, %cst_203 : f32
    %c1_204 = arith.constant 1 : index
    %473 = memref.load %arg23[%c1_204] : memref<8xf32, #tpu.memory_space<smem>>
    memref.store %472, %arg23[%c1_204] : memref<8xf32, #tpu.memory_space<smem>>
    %474 = vector.extract_strided_slice %466 {offsets = [0, 1], sizes = [16, 1], strides = [1, 1]} : vector<16x3xf32> to vector<16x1xf32>
    %475 = vector.shape_cast %474 : vector<16x1xf32> to vector<1x16x1xf32>
    %cst_205 = arith.constant dense<0.000000e+00> : vector<1xf32>
    %476 = vector.multi_reduction <add>, %475, %cst_205 [1, 2] : vector<1x16x1xf32> to vector<1xf32>
    %477 = vector.shape_cast %476 : vector<1xf32> to vector<1x1x1xf32>
    %478 = vector.extract %477[0, 0, 0] : f32 from vector<1x1x1xf32>
    %cst_206 = arith.constant 6.250000e-02 : f32
    %479 = arith.mulf %478, %cst_206 : f32
    %c2 = arith.constant 2 : index
    %480 = memref.load %arg23[%c2] : memref<8xf32, #tpu.memory_space<smem>>
    memref.store %479, %arg23[%c2] : memref<8xf32, #tpu.memory_space<smem>>
    %481 = vector.extract_strided_slice %466 {offsets = [0, 2], sizes = [16, 1], strides = [1, 1]} : vector<16x3xf32> to vector<16x1xf32>
    %482 = vector.shape_cast %481 : vector<16x1xf32> to vector<1x16x1xf32>
    %cst_207 = arith.constant dense<0.000000e+00> : vector<1xf32>
    %483 = vector.multi_reduction <add>, %482, %cst_207 [1, 2] : vector<1x16x1xf32> to vector<1xf32>
    %484 = vector.shape_cast %483 : vector<1xf32> to vector<1x1x1xf32>
    %485 = vector.extract %484[0, 0, 0] : f32 from vector<1x1x1xf32>
    %cst_208 = arith.constant 6.250000e-02 : f32
    %486 = arith.mulf %485, %cst_208 : f32
    %c3 = arith.constant 3 : index
    %487 = memref.load %arg23[%c3] : memref<8xf32, #tpu.memory_space<smem>>
    memref.store %486, %arg23[%c3] : memref<8xf32, #tpu.memory_space<smem>>
    %cst_209 = arith.constant 0.000000e+00 : f32
    %488 = vector.broadcast %cst_209 : f32 to vector<16x8xf32>
    %489 = arith.subf %488, %431 : vector<16x8xf32>
    %490 = math.exp %489 : vector<16x8xf32>
    %cst_210 = arith.constant 1.000000e+00 : f32
    %491 = vector.broadcast %cst_210 : f32 to vector<16x8xf32>
    %492 = arith.addf %491, %490 : vector<16x8xf32>
    %493 = tpu.reciprocal %492 {approx = true} : vector<16x8xf32> -> vector<16x8xf32>
    %c0_211 = arith.constant 0 : index
    %c0_212 = arith.constant 0 : index
    %494 = vector.load %arg22[%c0_211, %c0_212] : memref<16x8xf32, #tpu.memory_space<vmem>>, vector<16x8xf32>
    %495 = arith.subf %493, %494 : vector<16x8xf32>
    %496 = arith.mulf %495, %495 : vector<16x8xf32>
    %497 = vector.shape_cast %496 : vector<16x8xf32> to vector<1x16x8xf32>
    %cst_213 = arith.constant dense<0.000000e+00> : vector<1xf32>
    %498 = vector.multi_reduction <add>, %497, %cst_213 [1, 2] : vector<1x16x8xf32> to vector<1xf32>
    %499 = vector.shape_cast %498 : vector<1xf32> to vector<1x1x1xf32>
    %500 = vector.extract %499[0, 0, 0] : f32 from vector<1x1x1xf32>
    %cst_214 = arith.constant 6.250000e-02 : f32
    %501 = arith.mulf %500, %cst_214 : f32
    %c4 = arith.constant 4 : index
    %502 = memref.load %arg23[%c4] : memref<8xf32, #tpu.memory_space<smem>>
    memref.store %501, %arg23[%c4] : memref<8xf32, #tpu.memory_space<smem>>
    %cst_215 = arith.constant 0.000000e+00 : f32
    %c5 = arith.constant 5 : index
    %503 = memref.load %arg23[%c5] : memref<8xf32, #tpu.memory_space<smem>>
    memref.store %cst_215, %arg23[%c5] : memref<8xf32, #tpu.memory_space<smem>>
    %cst_216 = arith.constant 0.000000e+00 : f32
    %c6 = arith.constant 6 : index
    %504 = memref.load %arg23[%c6] : memref<8xf32, #tpu.memory_space<smem>>
    memref.store %cst_216, %arg23[%c6] : memref<8xf32, #tpu.memory_space<smem>>
    %cst_217 = arith.constant 0.000000e+00 : f32
    %c7 = arith.constant 7 : index
    %505 = memref.load %arg23[%c7] : memref<8xf32, #tpu.memory_space<smem>>
    memref.store %cst_217, %arg23[%c7] : memref<8xf32, #tpu.memory_space<smem>>
    return
  }
}

</mosaic_0001>

<bundles_post_ra>
// kernel: forward.1
= control target key start
LH: loop header
LB: loop body
LE: loop exit
PB: predicated region body
PF: predicated region fallthrough
CT: control target
= control target key end

     0   :  { %s16641_s0 = inlined_call_operand.vmem [shape: f32[16,32], index: 0, kind: input, shape index: {}]   ;;  %s16642_s1 = inlined_call_operand.vmem [shape: f32[16,32], index: 1, kind: input, shape index: {}]   ;;  %s16643_s2 = inlined_call_operand.vmem [shape: f32[2,4,32,24], index: 2, kind: input, shape index: {}]   ;;  %s16644_s3 = inlined_call_operand.vmem [shape: f32[2,4,1,24], index: 3, kind: input, shape index: {}]   ;;  %s16645_s4 = inlined_call_operand.vmem [shape: f32[2,4,8,32], index: 4, kind: input, shape index: {}]   ;;  %s16646_s5 = inlined_call_operand.vmem [shape: f32[2,1,32], index: 5, kind: input, shape index: {}]   ;;  %s16647_s6 = inlined_call_operand.vmem [shape: f32[2,4,32,8], index: 6, kind: input, shape index: {}]   ;;  %s16648_s7 = inlined_call_operand.vmem [shape: f32[2,4,1,8], index: 7, kind: input, shape index: {}]   ;;  %s16649_s8 = inlined_call_operand.vmem [shape: f32[2,4,32,16], index: 8, kind: input, shape index: {}]   ;;  %s16650_s9 = inlined_call_operand.vmem [shape: f32[2,4,1,16], index: 9, kind: input, shape index: {}]   ;;  %s16651_s10 = inlined_call_operand.vmem [shape: f32[2,4,8,32], index: 10, kind: input, shape index: {}]   ;;  %s16652_s11 = inlined_call_operand.vmem [shape: f32[2,1,32], index: 11, kind: input, shape index: {}]   ;;  %s16653_s12 = inlined_call_operand.vmem [shape: f32[2,32,128], index: 12, kind: input, shape index: {}]   ;;  %s16654_s13 = inlined_call_operand.vmem [shape: f32[2,1,128], index: 13, kind: input, shape index: {}]   ;;  %s16655_s14 = inlined_call_operand.vmem [shape: f32[2,128,32], index: 14, kind: input, shape index: {}]   ;;  %s16656_s15 = inlined_call_operand.vmem [shape: f32[2,1,32], index: 15, kind: input, shape index: {}]   ;;  %s16657_s16 = inlined_call_operand.vmem [shape: f32[2,3,32], index: 16, kind: input, shape index: {}]   ;;  %s16658_s17 = inlined_call_operand.vmem [shape: f32[2,3,32], index: 17, kind: input, shape index: {}]   ;;  %s16659_s18 = inlined_call_operand.vmem [shape: f32[32,19], index: 18, kind: input, shape index: {}]   ;;  %s16660_s19 = inlined_call_operand.vmem [shape: f32[1,19], index: 19, kind: input, shape index: {}]   ;;  %s16661_s20 = inlined_call_operand.vmem [shape: s32[16,1], index: 20, kind: input, shape index: {}]   ;;  %s16662_s21 = inlined_call_operand.vmem [shape: f32[16,3], index: 21, kind: input, shape index: {}]   ;;  %s16663_s22 = inlined_call_operand.vmem [shape: f32[16,8], index: 22, kind: input, shape index: {}]   ;;  %s16664_s23 = inlined_call_operand.vmem [shape: f32[8], index: 23, kind: output, shape index: {}]  }
   0x1   :  { %16677 = sst [smem:[#allocation5_spill]] %s16641_s0 }
   0x2   :  { %16678 = sst [smem:[#allocation6_spill]] %s16642_s1 }
   0x3   :  { %16679 = sst [smem:[#allocation7_spill]] %s16643_s2 }
   0x4   :  { %16680 = sst [smem:[#allocation8_spill]] %s16644_s3 }
   0x5   :  { %16681 = sst [smem:[#allocation9_spill]] %s16645_s4 }
   0x6   :  { %16682 = sst [smem:[#allocation10_spill]] %s16646_s5 }
   0x7   :  { %16683 = sst [smem:[#allocation11_spill]] %s16647_s6 }
   0x8   :  { %16684 = sst [smem:[#allocation12_spill]] %s16648_s7 }
   0x9   :  { %s16685_s24 = sld [smem:[#allocation7_spill]]  ;;  %v14532_v1 = vmov 0.0   ;;  %vm14533_vm0 = vmmov 0   ;;  %vm131_vm1 = vcmask 261120  }
   0xa   :  { %13210 = vmatprep.subr.mxu0 %v14532_v1  ;;  %13218 = vmatprep.mubr.msk.f32.mxu0 %vm14533_vm0, %v14532_v1  ;;  %s16686_s25 = sld [smem:[#allocation5_spill]] }
   0xb   :  { %13243 = vmatprep.subr.mxu1 %v14532_v1 }
   0xf   :  { %v90_v0 = vld [vmem:[%s16685_s24 + $0x18] sm:$0xff]  ;;  %v89_v2 = vld [vmem:[%s16685_s24 + $0x10] sm:$0xff]  ;;  %v88_v5 = vld [vmem:[%s16685_s24 + $0x8] sm:$0xff] }
  0x10   :  { %v94_v3 = vld [vmem:[%s16685_s24 + $0x38] sm:$0xff]  ;;  %13211 = vmatpush3.msra.mxu0 %v90_v0  ;;  %v93_v4 = vld [vmem:[%s16685_s24 + $0x30] sm:$0xff]  ;;  %v92_v6 = vld [vmem:[%s16685_s24 + $0x28] sm:$0xff] }
  0x11   :  { %13212 = vmatprep.subr.mxu0 %v14532_v1  ;;  %13244 = vmatpush3.msra.mxu1 %v94_v3  ;;  %v87_v7 = vld [vmem:[%s16685_s24] sm:$0xff] }
  0x12   :  { %13213 = vmatpush3.msra.mxu0 %v89_v2  ;;  %13245 = vmatprep.subr.mxu1 %v14532_v1  ;;  %v14694_v8 = vld [vmem:[%s16686_s25] sm:$0xff] }
  0x13   :  { %13214 = vmatprep.subr.mxu0 %v14532_v1  ;;  %13246 = vmatpush3.msra.mxu1 %v93_v4 }
  0x14   :  { %13215 = vmatpush3.msra.mxu0 %v88_v5  ;;  %13247 = vmatprep.subr.mxu1 %v14532_v1 }
  0x15   :  { %28 = vsyncpa [#allocation3], 0  ;;  %13216 = vmatprep.subr.mxu0 %v14532_v1  ;;  %13248 = vmatpush3.msra.mxu1 %v92_v6  ;;  %v91_v9 = vld [vmem:[%s16685_s24 + $0x20] sm:$0xff]  ;;  %v98_v10 = vld [vmem:[%s16685_s24 + $0x58] sm:$0xff]  ;;  %s16687_s29 = sld [smem:[#allocation8_spill]]  ;;  %s16675_s3 = smov 120   ;;  %v75_v55 = vlaneseq }
  0x16   :  { %13217 = vmatpush3.msra.mxu0 %v87_v7  ;;  %13249 = vmatprep.subr.mxu1 %v14532_v1  ;;  %v14717_v11 = vld [vmem:[%s16686_s25 + $0x8] sm:$0xff]  ;;  %v97_v12 = vld [vmem:[%s16685_s24 + $0x50] sm:$0xff]  ;;  %v95_v14 = vld [vmem:[%s16685_s24 + $0x40] sm:$0xff]  ;;  %vm706_vm2 = vcmask 64512   ;;  %s16673_s26 = smov 112   ;;  %s16688_s27 = sld [smem:[#allocation9_spill]] }
  0x17   :  { %13219 = vmatmul.mubr.msk.f32.vlgmr.msra.gmra.mxu0 %vm131_vm1, %v14694_v8  ;;  %13221 = vmatprep.subr.mxu0 %v14532_v1  ;;  %v96_v13 = vld [vmem:[%s16685_s24 + $0x48] sm:$0xff]  ;;  %v102_v15 = vld [vmem:[%s16685_s24 + $0x78] sm:$0xff]  ;;  %v101_v16 = vld [vmem:[%s16685_s24 + $0x70] sm:$0xff]  ;;  %v14883_v56 = vshrl.u32 %v75_v55, 7  ;;  %v14885_v57 = vand.u32 127, %v75_v55  ;;  %s16689_s2 = sld [smem:[#allocation10_spill]] }
  0x18   :  { %13222 = vmatpush3.msra.mxu0 %v90_v0  ;;  %13229 = vmatprep.mubr.msk.f32.mxu0 %vm14533_vm0, %v14532_v1  ;;  %v100_v17 = vld [vmem:[%s16685_s24 + $0x68] sm:$0xff]  ;;  %v99_v18 = vld [vmem:[%s16685_s24 + $0x60] sm:$0xff]  ;;  %s16690_s28 = sld [smem:[#allocation11_spill]]  ;;  %s16693_s6 = smov 120   ;;  %vm12250_vm6 = vcmask 7168  }
  0x19   :  { %13223 = vmatprep.subr.mxu0 %v14532_v1  ;;  %13250 = vmatpush3.msra.mxu1 %v91_v9  ;;  %vm79_vm3 = vcmp.gt.s32.totalorder %v14885_v57, %v14883_v56  ;;  %s16691_s5 = sld [smem:[#allocation6_spill]] }
  0x1a   :  { %13224 = vmatpush3.msra.mxu0 %v89_v2  ;;  %13251 = vmatprep.mubr.msk.f32.mxu1 %vm14533_vm0, %v14532_v1  ;;  %v14890_v59 = vsel %vm79_vm3, -1e+30, %v14532_v1  ;;  %s16692_s7 = sld [smem:[#allocation12_spill]] }
  0x1b   :  { %13225 = vmatprep.subr.mxu0 %v14532_v1  ;;  %13265 = vmatprep.subr.mxu1 %v14532_v1  ;;  %v12413_v19 = vld [vmem:[%s16687_s29] ss:$0 sm:$0xff]  ;;  %v12414_v28 = vld [vmem:[%s16687_s29 + $0x1] ss:$0 sm:$0xff]  ;;  %v12415_v34 = vld [vmem:[%s16687_s29 + $0x2] ss:$0 sm:$0xff] }
  0x1c   :  { %13226 = vmatpush3.msra.mxu0 %v88_v5  ;;  %13252 = vmatmul.mubr.msk.f32.vlgmr.msra.gmra.mxu1 %vm131_vm1, %v14717_v11  ;;  %v12416_v40 = vld [vmem:[%s16687_s29 + $0x3] ss:$0 sm:$0xff] }
  0x1d   :  { %13227 = vmatprep.subr.mxu0 %v14532_v1  ;;  %13266 = vmatpush3.msra.mxu1 %v98_v10 }
  0x1e   :  { %13228 = vmatpush3.msra.mxu0 %v87_v7  ;;  %13267 = vmatprep.subr.mxu1 %v14532_v1 }
  0x1f   :  { %13230 = vmatmul.mubr.msk.f32.vlgmr.msra.gmra.mxu0 %vm131_vm1, %v14717_v11  ;;  %13232 = vmatprep.subr.mxu0 %v14532_v1 }
  0x20   :  { %13233 = vmatpush3.msra.mxu0 %v94_v3  ;;  %13240 = vmatprep.mubr.msk.f32.mxu0 %vm14533_vm0, %v14532_v1 }
  0x21   :  { %13234 = vmatprep.subr.mxu0 %v14532_v1  ;;  %13268 = vmatpush3.msra.mxu1 %v97_v12 }
  0x22   :  { %13235 = vmatpush3.msra.mxu0 %v93_v4  ;;  %13269 = vmatprep.subr.mxu1 %v14532_v1 }
  0x23   :  { %13236 = vmatprep.subr.mxu0 %v14532_v1  ;;  %13270 = vmatpush3.msra.mxu1 %v96_v13 }
  0x24   :  { %13237 = vmatpush3.msra.mxu0 %v92_v6  ;;  %13271 = vmatprep.subr.mxu1 %v14532_v1 }
  0x25   :  { %13238 = vmatprep.subr.mxu0 %v14532_v1  ;;  %13272 = vmatpush3.msra.mxu1 %v95_v14 }
  0x26   :  { %13239 = vmatpush3.msra.mxu0 %v91_v9  ;;  %13273 = vmatprep.mubr.msk.f32.mxu1 %vm14533_vm0, %v14532_v1 }
  0x27   :  { %13241 = vmatmul.mubr.msk.f32.vlgmr.msra.gmra.mxu0 %vm131_vm1, %v14694_v8  ;;  %13254 = vmatprep.subr.mxu0 %v14532_v1 }
  0x28   :  { %13255 = vmatpush3.msra.mxu0 %v98_v10  ;;  %13287 = vmatprep.subr.mxu1 %v14532_v1 }
  0x29   :  { %13256 = vmatprep.subr.mxu0 %v14532_v1  ;;  %13274 = vmatmul.mubr.msk.f32.vlgmr.msra.gmra.mxu1 %vm131_vm1, %v14717_v11 }
  0x2a   :  { %13257 = vmatpush3.msra.mxu0 %v97_v12  ;;  %13288 = vmatpush3.msra.mxu1 %v102_v15 }
  0x2b   :  { %13258 = vmatprep.subr.mxu0 %v14532_v1  ;;  %13289 = vmatprep.subr.mxu1 %v14532_v1 }
  0x2c   :  { %13259 = vmatpush3.msra.mxu0 %v96_v13  ;;  %13262 = vmatprep.mubr.msk.f32.mxu0 %vm14533_vm0, %v14532_v1 }
  0x2d   :  { %13260 = vmatprep.subr.mxu0 %v14532_v1  ;;  %13290 = vmatpush3.msra.mxu1 %v101_v16 }
  0x2e   :  { %13261 = vmatpush3.msra.mxu0 %v95_v14  ;;  %13291 = vmatprep.subr.mxu1 %v14532_v1 }
  0x2f   :  { %13263 = vmatmul.mubr.msk.f32.vlgmr.msra.gmra.mxu0 %vm131_vm1, %v14694_v8  ;;  %13276 = vmatprep.subr.mxu0 %v14532_v1 }
  0x30   :  { %13277 = vmatpush3.msra.mxu0 %v102_v15  ;;  %13292 = vmatpush3.msra.mxu1 %v100_v17 }
  0x31   :  { %13278 = vmatprep.subr.mxu0 %v14532_v1  ;;  %13293 = vmatprep.subr.mxu1 %v14532_v1 }
  0x32   :  { %13279 = vmatpush3.msra.mxu0 %v101_v16  ;;  %13294 = vmatpush3.msra.mxu1 %v99_v18 }
  0x33   :  { %13295 = vmatprep.mubr.msk.f32.mxu1 %vm14533_vm0, %v14532_v1  ;;  %13280 = vmatprep.subr.mxu0 %v14532_v1 }
  0x34   :  { %13296 = vmatmul.mubr.msk.f32.vlgmr.msra.gmra.mxu1 %vm131_vm1, %v14717_v11  ;;  %13281 = vmatpush3.msra.mxu0 %v100_v17 }
  0x35   :  { %13282 = vmatprep.subr.mxu0 %v14532_v1  ;;  %13284 = vmatprep.mubr.msk.f32.mxu0 %vm14533_vm0, %v14532_v1 }
  0x36   :  { %13283 = vmatpush3.msra.mxu0 %v99_v18  ;;  %13303 = vmatprep.subr.mxu1 %v14532_v1 }
  0x37   :  { %13285 = vmatmul.mubr.msk.f32.vlgmr.msra.gmra.mxu0 %vm131_vm1, %v14694_v8  ;;  %13298 = vmatprep.subr.mxu0 %v14532_v1 }
  0x38   :  { %13300 = vmatprep.mubr.msk.f32.mxu0 %vm14533_vm0, %v14532_v1  ;;  %13305 = vmatprep.mubr.msk.f32.mxu1 %vm14533_vm0, %v14532_v1 }
  0xd7   :  { %v201_v20 = vpop.f32.mrf.mxu0 }
  0xd8   :  { %v14794_v21 = vadd.f32 %v12413_v19, %v201_v20 }
  0xd9   :  { %v13220_v22 = vpop.f32.mrf.mxu0 }
  0xda   :  { %704 = vrot.lane.b32.xlu0 %v14794_v21, %s16675_s3 }
  0xdc   :  { %v414_v23 = vpop.f32.mrf.mxu1 }
  0xdd   :  { %v14807_v33 = vadd.f32 %v12414_v28, %v414_v23 }
  0xde   :  { %v13253_v24 = vpop.f32.mrf.mxu1 }
  0xdf   :  { %v274_v25 = vpop.f32.mrf.mxu0 }
  0xe0   :  { %v14798_v26 = vadd.f32 %v12413_v19, %v274_v25 }
  0xe1   :  { %v13231_v27 = vpop.f32.mrf.mxu0 }
  0xe2   :  { %782 = vrot.lane.b32.xlu0 %v14798_v26, %s16675_s3 }
  0xe7   :  { %v344_v29 = vpop.f32.mrf.mxu0 }
  0xe8   :  { %v14805_v30 = vadd.f32 %v12414_v28, %v344_v29 }
  0xe9   :  { %v13242_v31 = vpop.f32.mrf.mxu0  ;;  %v554_v32 = vpop.f32.mrf.mxu1 }
  0xea   :  { %859 = vrot.lane.b32.xlu1 %v14805_v30, %s16675_s3  ;;  %v14816_v36 = vadd.f32 %v12415_v34, %v554_v32 }
  0xeb   :  { %v13275_v35 = vpop.f32.mrf.mxu1 }
  0xee   :  { %936 = vrot.lane.b32.xlu1 %v14807_v33, %s16675_s3 }
  0xef   :  { %v484_v37 = vpop.f32.mrf.mxu0 }
  0xf0   :  { %v14818_v38 = vadd.f32 %v12415_v34, %v484_v37 }
  0xf1   :  { %v13264_v39 = vpop.f32.mrf.mxu0 }
  0xf2   :  { %1090 = vrot.lane.b32.xlu1 %v14816_v36, %s16675_s3  ;;  %1013 = vrot.lane.b32.xlu0 %v14818_v38, %s16675_s3 }
  0xf4   :  { %v694_v41 = vpop.f32.mrf.mxu1 }
  0xf5   :  { %v14827_v42 = vadd.f32 %v12416_v40, %v694_v41 }
  0xf6   :  { %v13297_v43 = vpop.f32.mrf.mxu1 }
  0xf7   :  { %1244 = vrot.lane.b32.xlu1 %v14827_v42, %s16675_s3  ;;  %v624_v44 = vpop.f32.mrf.mxu0 }
  0xf8   :  { %v14831_v45 = vadd.f32 %v12416_v40, %v624_v44 }
  0xf9   :  { %v13286_v46 = vpop.f32.mrf.mxu0 }
  0xfa   :  { %1167 = vrot.lane.b32.xlu0 %v14831_v45, %s16675_s3 }
 0x14c   :  { %v705_v47 = vpop.permute.xlu0 %704 }
 0x14d   :  { %13299 = vmatpush3.xpose.msk.msra.mxu0 %vm706_vm2, %v705_v47 }
 0x14e   :  { %13308 = vmatprep.subr.mxu0 %v14532_v1 }
 0x150   :  { %13301 = vmatmul.mubr.msk.f32.vlgmr.msra.gmra.mxu0 %vm706_vm2, %v14794_v21 }
 0x151   :  { %13310 = vmatprep.mubr.msk.f32.mxu0 %vm14533_vm0, %v14532_v1 }
 0x154   :  { %v783_v48 = vpop.permute.xlu0 %782 }
 0x155   :  { %13304 = vmatpush3.xpose.msk.msra.mxu1 %vm706_vm2, %v783_v48 }
 0x156   :  { %13313 = vmatprep.subr.mxu1 %v14532_v1 }
 0x158   :  { %13306 = vmatmul.mubr.msk.f32.vlgmr.msra.gmra.mxu1 %vm706_vm2, %v14798_v26 }
 0x159   :  { %13315 = vmatprep.mubr.msk.f32.mxu1 %vm14533_vm0, %v14532_v1 }
 0x15c   :  { %v860_v49 = vpop.permute.xlu1 %859 }
 0x15d   :  { %13309 = vmatpush3.xpose.msk.msra.mxu0 %vm706_vm2, %v860_v49 }
 0x15e   :  { %13318 = vmatprep.subr.mxu0 %v14532_v1 }
 0x160   :  { %13311 = vmatmul.mubr.msk.f32.vlgmr.msra.gmra.mxu0 %vm706_vm2, %v14805_v30  ;;  %v937_v50 = vpop.permute.xlu1 %936 }
 0x161   :  { %13314 = vmatpush3.xpose.msk.msra.mxu1 %vm706_vm2, %v937_v50  ;;  %13320 = vmatprep.mubr.msk.f32.mxu0 %vm14533_vm0, %v14532_v1 }
 0x162   :  { %13323 = vmatprep.subr.mxu1 %v14532_v1 }
 0x164   :  { %13316 = vmatmul.mubr.msk.f32.vlgmr.msra.gmra.mxu1 %vm706_vm2, %v14807_v33  ;;  %v1091_v51 = vpop.permute.xlu1 %1090  ;;  %v1014_v52 = vpop.permute.xlu0 %1013 }
 0x165   :  { %13319 = vmatpush3.xpose.msk.msra.mxu0 %vm706_vm2, %v1014_v52  ;;  %13324 = vmatpush3.xpose.msk.msra.mxu1 %vm706_vm2, %v1091_v51 }
 0x166   :  { %13325 = vmatprep.mubr.msk.f32.mxu1 %vm14533_vm0, %v14532_v1  ;;  %13333 = vmatprep.subr.mxu1 %v14532_v1 }
 0x167   :  { %13328 = vmatprep.subr.mxu0 %v14532_v1 }
 0x168   :  { %13326 = vmatmul.mubr.msk.f32.vlgmr.msra.gmra.mxu1 %vm706_vm2, %v14816_v36  ;;  %13321 = vmatmul.mubr.msk.f32.vlgmr.msra.gmra.mxu0 %vm706_vm2, %v14818_v38 }
 0x169   :  { %v1245_v53 = vpop.permute.xlu1 %1244  ;;  %13335 = vmatprep.mubr.msk.f32.mxu1 %vm14533_vm0, %v14532_v1  ;;  %13330 = vmatprep.mubr.msk.f32.mxu0 %vm14533_vm0, %v14532_v1 }
 0x16a   :  { %13334 = vmatpush3.xpose.msk.msra.mxu1 %vm706_vm2, %v1245_v53 }
 0x16b   :  { %13343 = vmatprep.subr.mxu1 %v14532_v1 }
 0x16c   :  { %v1168_v54 = vpop.permute.xlu0 %1167 }
 0x16d   :  { %13336 = vmatmul.mubr.msk.f32.vlgmr.msra.gmra.mxu1 %vm706_vm2, %v14827_v42  ;;  %13329 = vmatpush3.xpose.msk.msra.mxu0 %vm706_vm2, %v1168_v54 }
 0x16e   :  { %13338 = vmatprep.subr.mxu0 %v14532_v1  ;;  %13345 = vmatprep.mubr.msk.f32.mxu1 %vm14533_vm0, %v14532_v1 }
 0x170   :  { %13331 = vmatmul.mubr.msk.f32.vlgmr.msra.gmra.mxu0 %vm706_vm2, %v14831_v45 }
 0x171   :  { %13340 = vmatprep.mubr.msk.f32.mxu0 %vm14533_vm0, %v14532_v1 }
 0x210   :  { %v777_v58 = vpop.f32.mrf.mxu0 }
 0x211   :  { %v1320_v60 = vmul.f32 0.35355338, %v777_v58 }
 0x212   :  { %v13302_v61 = vpop.f32.mrf.mxu0 }
 0x213   :  { %v1328_v62 = vadd.f32 %v1320_v60, %v14890_v59 }
 0x215   :  { %v1336_v63 = vsel %vm706_vm2, %v1328_v62, -inf }
 0x216   :  { %1337 = vmax.xlane.f32.xlu0 %v1336_v63 }
 0x218   :  { %v854_v0 = vpop.f32.mrf.mxu1 }
 0x219   :  { %v1321_v2 = vmul.f32 0.35355338, %v854_v0 }
 0x21a   :  { %v13307_v3 = vpop.f32.mrf.mxu1 }
 0x21b   :  { %v1329_v4 = vadd.f32 %v1321_v2, %v14890_v59 }
 0x21d   :  { %v1339_v5 = vsel %vm706_vm2, %v1329_v4, -inf }
 0x21e   :  { %1340 = vmax.xlane.f32.xlu1 %v1339_v5 }
 0x220   :  { %v931_v6 = vpop.f32.mrf.mxu0 }
 0x221   :  { %v1322_v7 = vmul.f32 0.35355338, %v931_v6 }
 0x222   :  { %v13312_v9 = vpop.f32.mrf.mxu0 }
 0x223   :  { %v1330_v10 = vadd.f32 %v1322_v7, %v14890_v59 }
 0x224   :  { %v1008_v12 = vpop.f32.mrf.mxu1 }
 0x225   :  { %v1323_v13 = vmul.f32 0.35355338, %v1008_v12  ;;  %v1342_v14 = vsel %vm706_vm2, %v1330_v10, -inf }
 0x226   :  { %v13317_v15 = vpop.f32.mrf.mxu1  ;;  %1343 = vmax.xlane.f32.xlu0 %v1342_v14 }
 0x227   :  { %v1331_v16 = vadd.f32 %v1323_v13, %v14890_v59 }
 0x228   :  { %v1085_v17 = vpop.f32.mrf.mxu0  ;;  %v1162_v18 = vpop.f32.mrf.mxu1 }
 0x229   :  { %v1324_v19 = vmul.f32 0.35355338, %v1085_v17  ;;  %v1325_v20 = vmul.f32 0.35355338, %v1162_v18  ;;  %v1345_v22 = vsel %vm706_vm2, %v1331_v16, -inf }
 0x22a   :  { %v13322_v23 = vpop.f32.mrf.mxu0  ;;  %v13327_v24 = vpop.f32.mrf.mxu1  ;;  %1346 = vmax.xlane.f32.xlu0 %v1345_v22 }
 0x22b   :  { %v1332_v25 = vadd.f32 %v1324_v19, %v14890_v59  ;;  %v1333_v27 = vadd.f32 %v1325_v20, %v14890_v59 }
 0x22d   :  { %v1316_v28 = vpop.f32.mrf.mxu1  ;;  %v1348_v29 = vsel %vm706_vm2, %v1332_v25, -inf  ;;  %v1351_v31 = vsel %vm706_vm2, %v1333_v27, -inf }
 0x22e   :  { %v1327_v32 = vmul.f32 0.35355338, %v1316_v28  ;;  %1349 = vmax.xlane.f32.xlu1 %v1348_v29  ;;  %1352 = vmax.xlane.f32.xlu0 %v1351_v31 }
 0x22f   :  { %v13337_v34 = vpop.f32.mrf.mxu1 }
 0x230   :  { %v1239_v35 = vpop.f32.mrf.mxu0  ;;  %v1335_v37 = vadd.f32 %v1327_v32, %v14890_v59 }
 0x231   :  { %v1326_v39 = vmul.f32 0.35355338, %v1239_v35 }
 0x232   :  { %v13332_v40 = vpop.f32.mrf.mxu0  ;;  %v1357_v41 = vsel %vm706_vm2, %v1335_v37, -inf }
 0x233   :  { %1358 = vmax.xlane.f32.xlu0 %v1357_v41  ;;  %v1334_v43 = vadd.f32 %v1326_v39, %v14890_v59 }
 0x235   :  { %v1354_v44 = vsel %vm706_vm2, %v1334_v43, -inf }
 0x236   :  { %1355 = vmax.xlane.f32.xlu1 %v1354_v44 }
 0x247   :  { %1424 = vrot.lane.b32.xlu1 %v14794_v21, %s16673_s26 }
 0x249   :  { %1500 = vrot.lane.b32.xlu0 %v14798_v26, %s16673_s26 }
 0x24b   :  { %1576 = vrot.lane.b32.xlu1 %v14805_v30, %s16673_s26 }
 0x24d   :  { %1728 = vrot.lane.b32.xlu0 %v14818_v38, %s16673_s26 }
 0x24f   :  { %1652 = vrot.lane.b32.xlu1 %v14807_v33, %s16673_s26 }
 0x253   :  { %1804 = vrot.lane.b32.xlu1 %v14816_v36, %s16673_s26 }
 0x29f   :  { %v1338_v46 = vpop.xlane.xlu0 %1337 }
 0x2a0   :  { %v1360_v47 = vsub.f32 %v1328_v62, %v1338_v46 }
 0x2a2   :  { %v1368_v48 = vmul.f32 1.442695, %v1360_v47 }
 0x2a4   :  { %14344 = vpow2.f32 %v1368_v48 }
 0x2a7   :  { %v1341_v21 = vpop.xlane.xlu1 %1340 }
 0x2a8   :  { %v1361_v49 = vsub.f32 %v1329_v4, %v1341_v21 }
 0x2aa   :  { %v1370_v50 = vmul.f32 1.442695, %v1361_v49 }
 0x2ac   :  { %14346 = vpow2.f32 %v1370_v50 }
 0x2af   :  { %v1344_v26 = vpop.xlane.xlu0 %1343 }
 0x2b0   :  { %v1362_v51 = vsub.f32 %v1330_v10, %v1344_v26 }
 0x2b1   :  { %v14920_v30 = vpop.eup %14344 }
 0x2b2   :  { %v1372_v52 = vmul.f32 1.442695, %v1362_v51  ;;  %v1384_v38 = vsel %vm706_vm2, %v14920_v30, 0.0 }
 0x2b3   :  { %1385 = vadd.xlane.f32.xlu1 %v1384_v38  ;;  %v1347_v33 = vpop.xlane.xlu0 %1346 }
 0x2b4   :  { %14348 = vpow2.f32 %v1372_v52  ;;  %v1363_v36 = vsub.f32 %v1331_v16, %v1347_v33 }
 0x2b6   :  { %v1374_v53 = vmul.f32 1.442695, %v1363_v36 }
 0x2b7   :  { %v1350_v54 = vpop.xlane.xlu1 %1349  ;;  %v1353_v55 = vpop.xlane.xlu0 %1352 }
 0x2b8   :  { %14350 = vpow2.f32 %v1374_v53  ;;  %v1364_v58 = vsub.f32 %v1332_v25, %v1350_v54  ;;  %v1365_v60 = vsub.f32 %v1333_v27, %v1353_v55  ;;  %v698_v54 = vld [vmem:[%s16688_s27] sm:$0xff]  ;;  %v699_v55 = vld [vmem:[%s16688_s27 + $0x8] sm:$0xff] }
 0x2b9   :  { %v14347_v61 = vpop.eup %14346 }
 0x2ba   :  { %v1376_v62 = vmul.f32 1.442695, %v1364_v58  ;;  %v1378_v63 = vmul.f32 1.442695, %v1365_v60  ;;  %v1387_v0 = vsel %vm706_vm2, %v14347_v61, 0.0 }
 0x2bb   :  { %1388 = vadd.xlane.f32.xlu0 %v1387_v0 }
 0x2bc   :  { %14352 = vpow2.f32 %v1376_v62  ;;  %v1359_v2 = vpop.xlane.xlu0 %1358 }
 0x2bd   :  { %14354 = vpow2.f32 %v1378_v63  ;;  %v1367_v3 = vsub.f32 %v1335_v37, %v1359_v2  ;;  %v700_v63 = vld [vmem:[%s16688_s27 + $0x10] sm:$0xff] }
 0x2bf   :  { %v1382_v4 = vmul.f32 1.442695, %v1367_v3  ;;  %v1356_v5 = vpop.xlane.xlu1 %1355 }
 0x2c0   :  { %v1366_v6 = vsub.f32 %v1334_v43, %v1356_v5  ;;  %v1501_v7 = vpop.permute.xlu0 %1500 }
 0x2c1   :  { %v14349_v9 = vpop.eup %14348  ;;  %14356 = vpow2.f32 %v1382_v4  ;;  %13344 = vmatpush3.msra.mxu1 %v1501_v7 }
 0x2c2   :  { %v1380_v10 = vmul.f32 1.442695, %v1366_v6  ;;  %v1390_v12 = vsel %vm706_vm2, %v14349_v9, 0.0  ;;  %13353 = vmatprep.subr.mxu1 %v14532_v1  ;;  %v701_v6 = vld [vmem:[%s16688_s27 + $0x18] sm:$0xff] }
 0x2c3   :  { %v1425_v13 = vpop.permute.xlu1 %1424  ;;  %1391 = vadd.xlane.f32.xlu1 %v1390_v12 }
 0x2c4   :  { %14358 = vpow2.f32 %v1380_v10  ;;  %13339 = vmatpush3.msra.mxu0 %v1425_v13  ;;  %v1729_v31 = vpop.permute.xlu0 %1728 }
 0x2c5   :  { %v14351_v14 = vpop.eup %14350  ;;  %13348 = vmatprep.subr.mxu0 %v14532_v1 }
 0x2c6   :  { %v1393_v15 = vsel %vm706_vm2, %v14351_v14, 0.0 }
 0x2c7   :  { %1394 = vadd.xlane.f32.xlu0 %v1393_v15  ;;  %v1577_v25 = vpop.permute.xlu1 %1576 }
 0x2c9   :  { %v14353_v16 = vpop.eup %14352 }
 0x2ca   :  { %v14355_v17 = vpop.eup %14354  ;;  %v1396_v18 = vsel %vm706_vm2, %v14353_v16, 0.0 }
 0x2cb   :  { %1397 = vadd.xlane.f32.xlu1 %v1396_v18  ;;  %v1399_v19 = vsel %vm706_vm2, %v14355_v17, 0.0  ;;  %v1653_v27 = vpop.permute.xlu1 %1652 }
 0x2cc   :  { %1400 = vadd.xlane.f32.xlu0 %v1399_v19 }
 0x2ce   :  { %v14931_v20 = vpop.eup %14356 }
 0x2cf   :  { %v1405_v22 = vsel %vm706_vm2, %v14931_v20, 0.0  ;;  %v1805_v28 = vpop.permute.xlu1 %1804 }
 0x2d0   :  { %1406 = vadd.xlane.f32.xlu0 %v1405_v22 }
 0x2d1   :  { %v14935_v23 = vpop.eup %14358 }
 0x2d2   :  { %v1402_v24 = vsel %vm706_vm2, %v14935_v23, 0.0 }
 0x2d3   :  { %1403 = vadd.xlane.f32.xlu1 %v1402_v24 }
 0x2e4   :  { %1956 = vrot.lane.b32.xlu1 %v14827_v42, %s16673_s26 }
 0x2e6   :  { %1880 = vrot.lane.b32.xlu0 %v14831_v45, %s16673_s26  ;;  %s14538_s26 = smov 8  }
 0x33c   :  { %v1386_v29 = vpop.xlane.xlu1 %1385 }
 0x33d   :  { %14360 = vrcp.f32 %v1386_v29 }
 0x344   :  { %v1389_v32 = vpop.xlane.xlu0 %1388 }
 0x345   :  { %14362 = vrcp.f32 %v1389_v32 }
 0x34a   :  { %v14361_v34 = vpop.eup %14360 }
 0x34b   :  { %v1416_v35 = vmul.f32 %v14361_v34, %v14920_v30 }
 0x34c   :  { %v1392_v37 = vpop.xlane.xlu1 %1391 }
 0x34d   :  { %14364 = vrcp.f32 %v1392_v37  ;;  %13341 = vmatmul.mubr.msk.f32.vlgmr.msra.gmra.mxu0 %vm706_vm2, %v1416_v35 }
 0x34e   :  { %13349 = vmatpush3.msra.mxu0 %v1577_v25  ;;  %13350 = vmatprep.mubr.msk.f32.mxu0 %vm14533_vm0, %v14532_v1 }
 0x34f   :  { %13358 = vmatprep.subr.mxu0 %v14532_v1 }
 0x350   :  { %v1395_v42 = vpop.xlane.xlu0 %1394 }
 0x351   :  { %14366 = vrcp.f32 %v1395_v42 }
 0x352   :  { %v14363_v45 = vpop.eup %14362 }
 0x353   :  { %v1417_v39 = vmul.f32 %v14363_v45, %v14347_v61 }
 0x354   :  { %v1398_v40 = vpop.xlane.xlu1 %1397 }
 0x355   :  { %14368 = vrcp.f32 %v1398_v40  ;;  %v1401_v41 = vpop.xlane.xlu0 %1400  ;;  %13346 = vmatmul.mubr.msk.f32.vlgmr.msra.gmra.mxu1 %vm706_vm2, %v1417_v39 }
 0x356   :  { %14370 = vrcp.f32 %v1401_v41  ;;  %13354 = vmatpush3.msra.mxu1 %v1653_v27  ;;  %13355 = vmatprep.mubr.msk.f32.mxu1 %vm14533_vm0, %v14532_v1 }
 0x357   :  { %13363 = vmatprep.subr.mxu1 %v14532_v1 }
 0x359   :  { %v1407_v43 = vpop.xlane.xlu0 %1406 }
 0x35a   :  { %v14365_v44 = vpop.eup %14364  ;;  %14372 = vrcp.f32 %v1407_v43  ;;  %v12457_v43 = vld [vmem:[%s16689_s2] ss:$0 sm:$0xff] }
 0x35b   :  { %v1418_v46 = vmul.f32 %v14365_v44, %v14349_v9 }
 0x35c   :  { %v1404_v47 = vpop.xlane.xlu1 %1403 }
 0x35d   :  { %14374 = vrcp.f32 %v1404_v47  ;;  %13351 = vmatmul.mubr.msk.f32.vlgmr.msra.gmra.mxu0 %vm706_vm2, %v1418_v46  ;;  %v1881_v30 = vpop.permute.xlu0 %1880 }
 0x35e   :  { %v14367_v48 = vpop.eup %14366  ;;  %13359 = vmatpush3.msra.mxu0 %v1729_v31  ;;  %13360 = vmatprep.mubr.msk.f32.mxu0 %vm14533_vm0, %v14532_v1 }
 0x35f   :  { %v1419_v21 = vmul.f32 %v14367_v48, %v14351_v14  ;;  %13368 = vmatprep.subr.mxu0 %v14532_v1 }
 0x360   :  { %v1957_v52 = vpop.permute.xlu1 %1956 }
 0x361   :  { %13356 = vmatmul.mubr.msk.f32.vlgmr.msra.gmra.mxu1 %vm706_vm2, %v1419_v21 }
 0x362   :  { %v14369_v49 = vpop.eup %14368  ;;  %13364 = vmatpush3.msra.mxu1 %v1805_v28  ;;  %13365 = vmatprep.mubr.msk.f32.mxu1 %vm14533_vm0, %v14532_v1 }
 0x363   :  { %v14371_v50 = vpop.eup %14370  ;;  %13373 = vmatprep.subr.mxu1 %v14532_v1  ;;  %v1420_v26 = vmul.f32 %v14369_v49, %v14353_v16 }
 0x364   :  { %v1421_v51 = vmul.f32 %v14371_v50, %v14355_v17 }
 0x365   :  { %13361 = vmatmul.mubr.msk.f32.vlgmr.msra.gmra.mxu0 %vm706_vm2, %v1420_v26 }
 0x366   :  { %13366 = vmatmul.mubr.msk.f32.vlgmr.msra.gmra.mxu1 %vm706_vm2, %v1421_v51  ;;  %13369 = vmatpush3.msra.mxu0 %v1881_v30 }
 0x367   :  { %v14373_v38 = vpop.eup %14372  ;;  %13374 = vmatpush3.msra.mxu1 %v1957_v52  ;;  %13375 = vmatprep.mubr.msk.f32.mxu1 %vm14533_vm0, %v14532_v1 }
 0x368   :  { %v1423_v33 = vmul.f32 %v14373_v38, %v14931_v20  ;;  %13370 = vmatprep.mubr.msk.f32.mxu0 %vm14533_vm0, %v14532_v1  ;;  %13378 = vmatprep.subr.mxu0 %v14532_v1 }
 0x369   :  { %13383 = vmatprep.subr.mxu1 %v14532_v1 }
 0x36a   :  { %v14375_v36 = vpop.eup %14374  ;;  %13376 = vmatmul.mubr.msk.f32.vlgmr.msra.gmra.mxu1 %vm706_vm2, %v1423_v33 }
 0x36b   :  { %v1422_v53 = vmul.f32 %v14375_v36, %v14935_v23  ;;  %13385 = vmatprep.mubr.msk.f32.mxu1 %vm14533_vm0, %v14532_v1  ;;  %13384 = vmatpush3.msra.mxu1 %v698_v54 }
 0x36c   :  { %13393 = vmatprep.subr.mxu1 %v14532_v1 }
 0x36d   :  { %13371 = vmatmul.mubr.msk.f32.vlgmr.msra.gmra.mxu0 %vm706_vm2, %v1422_v53 }
 0x36e   :  { %13380 = vmatprep.mubr.msk.f32.mxu0 %vm14533_vm0, %v14532_v1  ;;  %13379 = vmatpush3.msra.mxu0 %v698_v54 }
 0x36f   :  { %13388 = vmatprep.subr.mxu0 %v14532_v1 }
 0x40d   :  { %v1496_v58 = vpop.f32.mrf.mxu0 }
 0x40e   :  { %13381 = vmatmul.mubr.msk.f32.vlgmr.msra.gmra.mxu0 %vm706_vm2, %v1496_v58 }
 0x40f   :  { %v13342_v60 = vpop.f32.mrf.mxu0  ;;  %13389 = vmatpush3.msra.mxu0 %v699_v55  ;;  %13390 = vmatprep.mubr.msk.f32.mxu0 %vm14533_vm0, %v14532_v1 }
 0x410   :  { %13398 = vmatprep.subr.mxu0 %v14532_v1 }
 0x415   :  { %v1572_v61 = vpop.f32.mrf.mxu1 }
 0x416   :  { %13386 = vmatmul.mubr.msk.f32.vlgmr.msra.gmra.mxu1 %vm706_vm2, %v1572_v61 }
 0x417   :  { %v13347_v62 = vpop.f32.mrf.mxu1  ;;  %13394 = vmatpush3.msra.mxu1 %v699_v55  ;;  %13395 = vmatprep.mubr.msk.f32.mxu1 %vm14533_vm0, %v14532_v1 }
 0x418   :  { %13403 = vmatprep.subr.mxu1 %v14532_v1 }
 0x41d   :  { %v1648_v0 = vpop.f32.mrf.mxu0 }
 0x41e   :  { %13391 = vmatmul.mubr.msk.f32.vlgmr.msra.gmra.mxu0 %vm706_vm2, %v1648_v0 }
 0x41f   :  { %v13352_v2 = vpop.f32.mrf.mxu0  ;;  %13399 = vmatpush3.msra.mxu0 %v700_v63  ;;  %13400 = vmatprep.mubr.msk.f32.mxu0 %vm14533_vm0, %v14532_v1 }
 0x420   :  { %13408 = vmatprep.subr.mxu0 %v14532_v1  ;;  %v2681_v2 = vld [vmem:[%s16690_s28 + $0x10] sm:$0xff] }
 0x421   :  { %v1724_v3 = vpop.f32.mrf.mxu1 }
 0x422   :  { %13396 = vmatmul.mubr.msk.f32.vlgmr.msra.gmra.mxu1 %vm706_vm2, %v1724_v3  ;;  %v2680_v3 = vld [vmem:[%s16690_s28 + $0x8] sm:$0xff] }
 0x423   :  { %v13357_v4 = vpop.f32.mrf.mxu1  ;;  %13404 = vmatpush3.msra.mxu1 %v700_v63  ;;  %13405 = vmatprep.mubr.msk.f32.mxu1 %vm14533_vm0, %v14532_v1 }
 0x424   :  { %13413 = vmatprep.subr.mxu1 %v14532_v1  ;;  %v2679_v4 = vld [vmem:[%s16690_s28] sm:$0xff] }
 0x425   :  { %v1800_v5 = vpop.f32.mrf.mxu0 }
 0x426   :  { %v1876_v7 = vpop.f32.mrf.mxu1  ;;  %13401 = vmatmul.mubr.msk.f32.vlgmr.msra.gmra.mxu0 %vm706_vm2, %v1800_v5 }
 0x427   :  { %13406 = vmatmul.mubr.msk.f32.vlgmr.msra.gmra.mxu1 %vm706_vm2, %v1876_v7  ;;  %v13362_v9 = vpop.f32.mrf.mxu0  ;;  %13409 = vmatpush3.msra.mxu0 %v701_v6 }
 0x428   :  { %v13367_v10 = vpop.f32.mrf.mxu1  ;;  %13414 = vmatpush3.msra.mxu1 %v701_v6  ;;  %13415 = vmatprep.mubr.msk.f32.mxu1 %vm14533_vm0, %v14532_v1 }
 0x429   :  { %13410 = vmatprep.mubr.msk.f32.mxu0 %vm14533_vm0, %v14532_v1  ;;  %13418 = vmatprep.subr.mxu0 %v14532_v1 }
 0x42a   :  { %v2028_v12 = vpop.f32.mrf.mxu1  ;;  %13429 = vmatprep.subr.mxu1 %v14532_v1 }
 0x42b   :  { %13416 = vmatmul.mubr.msk.f32.vlgmr.msra.gmra.mxu1 %vm706_vm2, %v2028_v12 }
 0x42c   :  { %v13377_v13 = vpop.f32.mrf.mxu1  ;;  %13437 = vmatprep.mubr.msk.f32.mxu1 %vm14533_vm0, %v14532_v1 }
 0x42d   :  { %v1952_v14 = vpop.f32.mrf.mxu0  ;;  %v15058_v13 = vsub.s32 0, %v14883_v56 }
 0x42e   :  { %13411 = vmatmul.mubr.msk.f32.vlgmr.msra.gmra.mxu0 %vm706_vm2, %v1952_v14  ;;  %v85_v14 = vld [vmem:[%s16657_s16] sm:$0x7] }
 0x42f   :  { %v13372_v15 = vpop.f32.mrf.mxu0  ;;  %13426 = vmatprep.mubr.msk.f32.mxu0 %vm14533_vm0, %v14532_v1 }
 0x430   :  { %v86_v15 = vld [vmem:[%s16658_s17] sm:$0x7] }
 0x4ce   :  { %v2101_v16 = vpop.f32.mrf.mxu0 }
 0x4cf   :  { %v2616_v42 = vsel %vm131_vm1, %v2101_v16, 0.0  ;;  %v2670_v16 = vrot.slane %v85_v14, %v15058_v13 }
 0x4d0   :  { %v13382_v17 = vpop.f32.mrf.mxu0 }
 0x4d6   :  { %v2174_v18 = vpop.f32.mrf.mxu1 }
 0x4d7   :  { %v2623_v29 = vsel %vm131_vm1, %v2174_v18, 0.0 }
 0x4d8   :  { %v13387_v19 = vpop.f32.mrf.mxu1 }
 0x4d9   :  { %v2676_v19 = vrot.slane %v86_v15, %v15058_v13  ;;  %v12458_v15 = vld [vmem:[%s16692_s7] ss:$0 sm:$0xff] }
 0x4de   :  { %v2247_v20 = vpop.f32.mrf.mxu0 }
 0x4df   :  { %v2617_v34 = vsel %vm131_vm1, %v2247_v20, 0.0 }
 0x4e0   :  { %v13392_v22 = vpop.f32.mrf.mxu0  ;;  %v2618_v41 = vadd.f32 %v2617_v34, %v2616_v42  ;;  %v2690_v34 = vld [vmem:[%s16690_s28 + $0x58] sm:$0xff]  ;;  %v2687_v42 = vld [vmem:[%s16690_s28 + $0x40] sm:$0xff] }
 0x4e2   :  { %v2320_v23 = vpop.f32.mrf.mxu1 }
 0x4e3   :  { %v2624_v25 = vsel %vm131_vm1, %v2320_v23, 0.0 }
 0x4e4   :  { %v13397_v24 = vpop.f32.mrf.mxu1  ;;  %v2625_v35 = vadd.f32 %v2624_v25, %v2623_v29 }
 0x4e5   :  { %v2686_v24 = vld [vmem:[%s16690_s28 + $0x38] sm:$0xff] }
 0x4e6   :  { %v2393_v27 = vpop.f32.mrf.mxu0 }
 0x4e7   :  { %v2466_v28 = vpop.f32.mrf.mxu1  ;;  %v2619_v45 = vsel %vm131_vm1, %v2393_v27, 0.0  ;;  %v2685_v27 = vld [vmem:[%s16690_s28 + $0x30] sm:$0xff] }
 0x4e8   :  { %v2626_v31 = vsel %vm131_vm1, %v2466_v28, 0.0  ;;  %v13402_v32 = vpop.f32.mrf.mxu0  ;;  %v2620_v48 = vadd.f32 %v2619_v45, %v2618_v41  ;;  %v2694_v45 = vld [vmem:[%s16690_s28 + $0x78] sm:$0xff]  ;;  %v2691_v41 = vld [vmem:[%s16690_s28 + $0x60] sm:$0xff] }
 0x4e9   :  { %v13407_v37 = vpop.f32.mrf.mxu1  ;;  %v2627_v39 = vadd.f32 %v2626_v31, %v2625_v35  ;;  %v2684_v31 = vld [vmem:[%s16690_s28 + $0x28] sm:$0xff]  ;;  %v2683_v32 = vld [vmem:[%s16690_s28 + $0x20] sm:$0xff]  ;;  %v2689_v35 = vld [vmem:[%s16690_s28 + $0x50] sm:$0xff] }
 0x4ea   :  { %v2688_v37 = vld [vmem:[%s16690_s28 + $0x48] sm:$0xff] }
 0x4eb   :  { %v2612_v40 = vpop.f32.mrf.mxu1 }
 0x4ec   :  { %v2628_v44 = vsel %vm131_vm1, %v2612_v40, 0.0  ;;  %v2692_v40 = vld [vmem:[%s16690_s28 + $0x68] sm:$0xff] }
 0x4ed   :  { %v2629_v46 = vadd.f32 %v2628_v44, %v2627_v39  ;;  %v13417_v47 = vpop.f32.mrf.mxu1  ;;  %v2693_v39 = vld [vmem:[%s16690_s28 + $0x70] sm:$0xff] }
 0x4ee   :  { %v2539_v21 = vpop.f32.mrf.mxu0  ;;  %v3291_v44 = vld [vmem:[%s16649_s8 + $0x10] sm:$0xff]  ;;  %v3289_v47 = vld [vmem:[%s16649_s8] sm:$0xff] }
 0x4ef   :  { %v2637_v49 = vadd.f32 %v12457_v43, %v2629_v46  ;;  %v2621_v50 = vsel %vm131_vm1, %v2539_v21, 0.0  ;;  %v3290_v46 = vld [vmem:[%s16649_s8 + $0x8] sm:$0xff]  ;;  %v3296_v21 = vld [vmem:[%s16649_s8 + $0x38] sm:$0xff] }
 0x4f0   :  { %v2622_v26 = vadd.f32 %v2621_v50, %v2620_v48  ;;  %v13412_v51 = vpop.f32.mrf.mxu0  ;;  %v15178_v48 = vld [vmem:[%s16691_s5] sm:$0xff]  ;;  %v15197_v50 = vld [vmem:[%s16691_s5 + $0x8] sm:$0xff] }
 0x4f1   :  { %v2639_v30 = vadd.f32 %v2637_v49, %v14717_v11  ;;  %v3295_v49 = vld [vmem:[%s16649_s8 + $0x30] sm:$0xff]  ;;  %v3293_v51 = vld [vmem:[%s16649_s8 + $0x20] sm:$0xff] }
 0x4f2   :  { %v2636_v52 = vadd.f32 %v12457_v43, %v2622_v26  ;;  %v3292_v43 = vld [vmem:[%s16649_s8 + $0x18] sm:$0xff]  ;;  %v3294_v26 = vld [vmem:[%s16649_s8 + $0x28] sm:$0xff] }
 0x4f3   :  { %v2643_v38 = vsel %vm131_vm1, %v2639_v30, 0.0 }
 0x4f4   :  { %2644 = vadd.xlane.f32.xlu1 %v2643_v38  ;;  %v2638_v33 = vadd.f32 %v2636_v52, %v14694_v8  ;;  %v2682_v8 = vld [vmem:[%s16690_s28 + $0x18] sm:$0xff]  ;;  %v3299_v52 = vld [vmem:[%s16649_s8 + $0x50] sm:$0xff]  ;;  %v3298_v38 = vld [vmem:[%s16649_s8 + $0x48] sm:$0xff] }
 0x4f5   :  { %13419 = vmatpush3.msra.mxu0 %v2682_v8  ;;  %13430 = vmatpush3.msra.mxu1 %v2682_v8 }
 0x4f6   :  { %v2640_v36 = vsel %vm131_vm1, %v2638_v33, 0.0  ;;  %13420 = vmatprep.subr.mxu0 %v14532_v1  ;;  %13431 = vmatprep.subr.mxu1 %v14532_v1 }
 0x4f7   :  { %2641 = vadd.xlane.f32.xlu0 %v2640_v36  ;;  %13421 = vmatpush3.msra.mxu0 %v2681_v2  ;;  %v3304_v36 = vld [vmem:[%s16649_s8 + $0x78] sm:$0xff] }
 0x4f8   :  { %13432 = vmatpush3.msra.mxu1 %v2681_v2  ;;  %13422 = vmatprep.subr.mxu0 %v14532_v1 }
 0x4f9   :  { %13433 = vmatprep.subr.mxu1 %v14532_v1  ;;  %13423 = vmatpush3.msra.mxu0 %v2680_v3 }
 0x4fa   :  { %13434 = vmatpush3.msra.mxu1 %v2680_v3  ;;  %13424 = vmatprep.subr.mxu0 %v14532_v1 }
 0x4fb   :  { %13435 = vmatprep.subr.mxu1 %v14532_v1  ;;  %13425 = vmatpush3.msra.mxu0 %v2679_v4 }
 0x4fc   :  { %13436 = vmatpush3.msra.mxu1 %v2679_v4  ;;  %13440 = vmatprep.subr.mxu0 %v14532_v1 }
 0x4fd   :  { %13451 = vmatprep.subr.mxu1 %v14532_v1 }
 0x57d   :  { %v2645_v53 = vpop.xlane.xlu1 %2644 }
 0x57e   :  { %v2648_v54 = vmul.f32 0.03125, %v2645_v53  ;;  %v3303_v53 = vld [vmem:[%s16649_s8 + $0x70] sm:$0xff] }
 0x580   :  { %v2642_v55 = vpop.xlane.xlu0 %2641  ;;  %v2650_v60 = vsub.f32 %v2639_v30, %v2648_v54  ;;  %v3300_v30 = vld [vmem:[%s16649_s8 + $0x58] sm:$0xff]  ;;  %v3302_v54 = vld [vmem:[%s16649_s8 + $0x68] sm:$0xff] }
 0x581   :  { %v2647_v58 = vmul.f32 0.03125, %v2642_v55  ;;  %v3301_v55 = vld [vmem:[%s16649_s8 + $0x60] sm:$0xff] }
 0x582   :  { %v2652_v0 = vmul.f32 %v2650_v60, %v2650_v60 }
 0x583   :  { %v2649_v61 = vsub.f32 %v2638_v33, %v2647_v58  ;;  %v3297_v33 = vld [vmem:[%s16649_s8 + $0x40] sm:$0xff] }
 0x584   :  { %v2656_v11 = vsel %vm131_vm1, %v2652_v0, 0.0 }
 0x585   :  { %v2651_v62 = vmul.f32 %v2649_v61, %v2649_v61 }
 0x587   :  { %v2653_v63 = vsel %vm131_vm1, %v2651_v62, 0.0 }
 0x588   :  { %2654 = vadd.xlane.f32.xlu0 %v2653_v63 }
 0x58c   :  { %2657 = vadd.xlane.f32.xlu0 %v2656_v11 }
 0x611   :  { %v2655_v5 = vpop.xlane.xlu0 %2654 }
 0x612   :  { %v2659_v6 = vmul.f32 0.03125, %v2655_v5 }
 0x614   :  { %v2661_v7 = vadd.f32 1e-05, %v2659_v6 }
 0x615   :  { %v2658_v9 = vpop.xlane.xlu0 %2657 }
 0x616   :  { %14376 = vrsqrt.f32 %v2661_v7  ;;  %v2660_v10 = vmul.f32 0.03125, %v2658_v9 }
 0x618   :  { %v2662_v12 = vadd.f32 1e-05, %v2660_v10 }
 0x61a   :  { %14378 = vrsqrt.f32 %v2662_v12  ;;  %v12470_v12 = vld [vmem:[%s16650_s9] ss:$0 sm:$0xff] }
 0x623   :  { %v14377_v17 = vpop.eup %14376 }
 0x624   :  { %v2665_v18 = vmul.f32 %v14377_v17, %v2649_v61 }
 0x626   :  { %v2671_v20 = vmul.f32 %v2670_v16, %v2665_v18 }
 0x627   :  { %v14379_v22 = vpop.eup %14378 }
 0x628   :  { %v15068_v23 = vadd.f32 %v2676_v19, %v2671_v20  ;;  %v2666_v25 = vmul.f32 %v14379_v22, %v2650_v60 }
 0x62a   :  { %13427 = vmatmul.mubr.msk.f32.vlgmr.msra.gmra.mxu0 %vm131_vm1, %v15068_v23  ;;  %v2672_v28 = vmul.f32 %v2670_v16, %v2666_v25 }
 0x62b   :  { %13441 = vmatpush3.msra.mxu0 %v2686_v24  ;;  %13448 = vmatprep.mubr.msk.f32.mxu0 %vm14533_vm0, %v14532_v1 }
 0x62c   :  { %13442 = vmatprep.subr.mxu0 %v14532_v1  ;;  %v15081_v29 = vadd.f32 %v2676_v19, %v2672_v28  ;;  %v12459_v28 = vld [vmem:[%s16692_s7 + $0x1] ss:$0 sm:$0xff] }
 0x62d   :  { %13443 = vmatpush3.msra.mxu0 %v2685_v27 }
 0x62e   :  { %13444 = vmatprep.subr.mxu0 %v14532_v1  ;;  %13438 = vmatmul.mubr.msk.f32.vlgmr.msra.gmra.mxu1 %vm131_vm1, %v15081_v29 }
 0x62f   :  { %13445 = vmatpush3.msra.mxu0 %v2684_v31  ;;  %13452 = vmatpush3.msra.mxu1 %v2686_v24  ;;  %v12471_v24 = vld [vmem:[%s16650_s9 + $0x1] ss:$0 sm:$0xff] }
 0x630   :  { %13446 = vmatprep.subr.mxu0 %v14532_v1  ;;  %13453 = vmatprep.subr.mxu1 %v14532_v1 }
 0x631   :  { %13447 = vmatpush3.msra.mxu0 %v2683_v32  ;;  %13454 = vmatpush3.msra.mxu1 %v2685_v27 }
 0x632   :  { %13449 = vmatmul.mubr.msk.f32.vlgmr.msra.gmra.mxu0 %vm131_vm1, %v15068_v23  ;;  %13455 = vmatprep.subr.mxu1 %v14532_v1 }
 0x633   :  { %13462 = vmatprep.subr.mxu0 %v14532_v1  ;;  %13456 = vmatpush3.msra.mxu1 %v2684_v31 }
 0x634   :  { %13463 = vmatpush3.msra.mxu0 %v2690_v34  ;;  %13457 = vmatprep.subr.mxu1 %v14532_v1 }
 0x635   :  { %13464 = vmatprep.subr.mxu0 %v14532_v1  ;;  %13458 = vmatpush3.msra.mxu1 %v2683_v32 }
 0x636   :  { %13459 = vmatprep.mubr.msk.f32.mxu1 %vm14533_vm0, %v14532_v1  ;;  %13465 = vmatpush3.msra.mxu0 %v2689_v35 }
 0x637   :  { %13460 = vmatmul.mubr.msk.f32.vlgmr.msra.gmra.mxu1 %vm131_vm1, %v15081_v29  ;;  %13466 = vmatprep.subr.mxu0 %v14532_v1 }
 0x638   :  { %13473 = vmatprep.subr.mxu1 %v14532_v1  ;;  %13467 = vmatpush3.msra.mxu0 %v2688_v37 }
 0x639   :  { %13474 = vmatpush3.msra.mxu1 %v2690_v34  ;;  %13468 = vmatprep.subr.mxu0 %v14532_v1 }
 0x63a   :  { %13475 = vmatprep.subr.mxu1 %v14532_v1  ;;  %13469 = vmatpush3.msra.mxu0 %v2687_v42 }
 0x63b   :  { %13470 = vmatprep.mubr.msk.f32.mxu0 %vm14533_vm0, %v14532_v1  ;;  %13476 = vmatpush3.msra.mxu1 %v2689_v35 }
 0x63c   :  { %13471 = vmatmul.mubr.msk.f32.vlgmr.msra.gmra.mxu0 %vm131_vm1, %v15068_v23  ;;  %13477 = vmatprep.subr.mxu1 %v14532_v1 }
 0x63d   :  { %13484 = vmatprep.subr.mxu0 %v14532_v1  ;;  %13478 = vmatpush3.msra.mxu1 %v2688_v37 }
 0x63e   :  { %13485 = vmatpush3.msra.mxu0 %v2694_v45  ;;  %13479 = vmatprep.subr.mxu1 %v14532_v1 }
 0x63f   :  { %13486 = vmatprep.subr.mxu0 %v14532_v1  ;;  %13480 = vmatpush3.msra.mxu1 %v2687_v42 }
 0x640   :  { %13481 = vmatprep.mubr.msk.f32.mxu1 %vm14533_vm0, %v14532_v1  ;;  %13487 = vmatpush3.msra.mxu0 %v2693_v39 }
 0x641   :  { %13482 = vmatmul.mubr.msk.f32.vlgmr.msra.gmra.mxu1 %vm131_vm1, %v15081_v29  ;;  %13488 = vmatprep.subr.mxu0 %v14532_v1 }
 0x642   :  { %13495 = vmatprep.subr.mxu1 %v14532_v1  ;;  %13489 = vmatpush3.msra.mxu0 %v2692_v40 }
 0x643   :  { %13496 = vmatpush3.msra.mxu1 %v2694_v45  ;;  %13490 = vmatprep.subr.mxu0 %v14532_v1  ;;  %v12472_v45 = vld [vmem:[%s16650_s9 + $0x2] ss:$0 sm:$0xff] }
 0x644   :  { %13497 = vmatprep.subr.mxu1 %v14532_v1  ;;  %13491 = vmatpush3.msra.mxu0 %v2691_v41 }
 0x645   :  { %13492 = vmatprep.mubr.msk.f32.mxu0 %vm14533_vm0, %v14532_v1  ;;  %13498 = vmatpush3.msra.mxu1 %v2693_v39 }
 0x646   :  { %13493 = vmatmul.mubr.msk.f32.vlgmr.msra.gmra.mxu0 %vm131_vm1, %v15068_v23  ;;  %13499 = vmatprep.subr.mxu1 %v14532_v1 }
 0x647   :  { %13506 = vmatprep.subr.mxu0 %v14532_v1  ;;  %13500 = vmatpush3.msra.mxu1 %v2692_v40 }
 0x648   :  { %13507 = vmatpush3.msra.mxu0 %v3292_v43  ;;  %13501 = vmatprep.subr.mxu1 %v14532_v1 }
 0x649   :  { %13508 = vmatprep.subr.mxu0 %v14532_v1  ;;  %13502 = vmatpush3.msra.mxu1 %v2691_v41  ;;  %v12460_v41 = vld [vmem:[%s16692_s7 + $0x2] ss:$0 sm:$0xff] }
 0x64a   :  { %13503 = vmatprep.mubr.msk.f32.mxu1 %vm14533_vm0, %v14532_v1  ;;  %13509 = vmatpush3.msra.mxu0 %v3291_v44 }
 0x64b   :  { %13504 = vmatmul.mubr.msk.f32.vlgmr.msra.gmra.mxu1 %vm131_vm1, %v15081_v29  ;;  %13510 = vmatprep.subr.mxu0 %v14532_v1 }
 0x64c   :  { %13517 = vmatprep.subr.mxu1 %v14532_v1  ;;  %13511 = vmatpush3.msra.mxu0 %v3290_v46 }
 0x64d   :  { %13518 = vmatpush3.msra.mxu1 %v3292_v43  ;;  %13512 = vmatprep.subr.mxu0 %v14532_v1 }
 0x64e   :  { %13519 = vmatprep.subr.mxu1 %v14532_v1  ;;  %13513 = vmatpush3.msra.mxu0 %v3289_v47 }
 0x64f   :  { %13514 = vmatprep.mubr.msk.f32.mxu0 %vm14533_vm0, %v14532_v1  ;;  %13520 = vmatpush3.msra.mxu1 %v3291_v44 }
 0x650   :  { %13515 = vmatmul.mubr.msk.f32.vlgmr.msra.gmra.mxu0 %vm131_vm1, %v15178_v48  ;;  %13521 = vmatprep.subr.mxu1 %v14532_v1 }
 0x651   :  { %13528 = vmatprep.subr.mxu0 %v14532_v1  ;;  %13522 = vmatpush3.msra.mxu1 %v3290_v46 }
 0x652   :  { %13529 = vmatpush3.msra.mxu0 %v3296_v21  ;;  %13523 = vmatprep.subr.mxu1 %v14532_v1 }
 0x653   :  { %13530 = vmatprep.subr.mxu0 %v14532_v1  ;;  %13524 = vmatpush3.msra.mxu1 %v3289_v47 }
 0x654   :  { %13525 = vmatprep.mubr.msk.f32.mxu1 %vm14533_vm0, %v14532_v1  ;;  %13531 = vmatpush3.msra.mxu0 %v3295_v49 }
 0x655   :  { %13526 = vmatmul.mubr.msk.f32.vlgmr.msra.gmra.mxu1 %vm131_vm1, %v15197_v50  ;;  %13532 = vmatprep.subr.mxu0 %v14532_v1 }
 0x656   :  { %13539 = vmatprep.subr.mxu1 %v14532_v1  ;;  %13533 = vmatpush3.msra.mxu0 %v3294_v26 }
 0x657   :  { %13540 = vmatpush3.msra.mxu1 %v3296_v21  ;;  %13534 = vmatprep.subr.mxu0 %v14532_v1 }
 0x658   :  { %13541 = vmatprep.subr.mxu1 %v14532_v1  ;;  %13535 = vmatpush3.msra.mxu0 %v3293_v51 }
 0x659   :  { %13536 = vmatprep.mubr.msk.f32.mxu0 %vm14533_vm0, %v14532_v1  ;;  %13542 = vmatpush3.msra.mxu1 %v3295_v49  ;;  %v12473_v49 = vld [vmem:[%s16650_s9 + $0x3] ss:$0 sm:$0xff] }
 0x65a   :  { %13537 = vmatmul.mubr.msk.f32.vlgmr.msra.gmra.mxu0 %vm131_vm1, %v15178_v48  ;;  %13543 = vmatprep.subr.mxu1 %v14532_v1 }
 0x65b   :  { %13550 = vmatprep.subr.mxu0 %v14532_v1  ;;  %13544 = vmatpush3.msra.mxu1 %v3294_v26 }
 0x65c   :  { %13551 = vmatpush3.msra.mxu0 %v3300_v30  ;;  %13545 = vmatprep.subr.mxu1 %v14532_v1 }
 0x65d   :  { %13552 = vmatprep.subr.mxu0 %v14532_v1  ;;  %13546 = vmatpush3.msra.mxu1 %v3293_v51  ;;  %v12461_v51 = vld [vmem:[%s16692_s7 + $0x3] ss:$0 sm:$0xff] }
 0x65e   :  { %13547 = vmatprep.mubr.msk.f32.mxu1 %vm14533_vm0, %v14532_v1  ;;  %13553 = vmatpush3.msra.mxu0 %v3299_v52 }
 0x65f   :  { %13548 = vmatmul.mubr.msk.f32.vlgmr.msra.gmra.mxu1 %vm131_vm1, %v15197_v50  ;;  %13554 = vmatprep.subr.mxu0 %v14532_v1 }
 0x660   :  { %13561 = vmatprep.subr.mxu1 %v14532_v1  ;;  %13555 = vmatpush3.msra.mxu0 %v3298_v38 }
 0x661   :  { %13562 = vmatpush3.msra.mxu1 %v3300_v30  ;;  %13556 = vmatprep.subr.mxu0 %v14532_v1 }
 0x662   :  { %13563 = vmatprep.subr.mxu1 %v14532_v1  ;;  %13557 = vmatpush3.msra.mxu0 %v3297_v33 }
 0x663   :  { %13558 = vmatprep.mubr.msk.f32.mxu0 %vm14533_vm0, %v14532_v1  ;;  %13564 = vmatpush3.msra.mxu1 %v3299_v52 }
 0x664   :  { %13559 = vmatmul.mubr.msk.f32.vlgmr.msra.gmra.mxu0 %vm131_vm1, %v15178_v48  ;;  %13565 = vmatprep.subr.mxu1 %v14532_v1 }
 0x665   :  { %13572 = vmatprep.subr.mxu0 %v14532_v1  ;;  %13566 = vmatpush3.msra.mxu1 %v3298_v38 }
 0x666   :  { %13573 = vmatpush3.msra.mxu0 %v3304_v36  ;;  %13567 = vmatprep.subr.mxu1 %v14532_v1 }
 0x667   :  { %13574 = vmatprep.subr.mxu0 %v14532_v1  ;;  %13568 = vmatpush3.msra.mxu1 %v3297_v33 }
 0x668   :  { %13569 = vmatprep.mubr.msk.f32.mxu1 %vm14533_vm0, %v14532_v1  ;;  %13575 = vmatpush3.msra.mxu0 %v3303_v53 }
 0x669   :  { %13570 = vmatmul.mubr.msk.f32.vlgmr.msra.gmra.mxu1 %vm131_vm1, %v15197_v50  ;;  %13576 = vmatprep.subr.mxu0 %v14532_v1 }
 0x66a   :  { %13583 = vmatprep.subr.mxu1 %v14532_v1  ;;  %13577 = vmatpush3.msra.mxu0 %v3302_v54 }
 0x66b   :  { %13584 = vmatpush3.msra.mxu1 %v3304_v36  ;;  %13578 = vmatprep.subr.mxu0 %v14532_v1 }
 0x66c   :  { %13585 = vmatprep.subr.mxu1 %v14532_v1  ;;  %13579 = vmatpush3.msra.mxu0 %v3301_v55 }
 0x66d   :  { %13580 = vmatprep.mubr.msk.f32.mxu0 %vm14533_vm0, %v14532_v1  ;;  %13586 = vmatpush3.msra.mxu1 %v3303_v53 }
 0x66e   :  { %13581 = vmatmul.mubr.msk.f32.vlgmr.msra.gmra.mxu0 %vm131_vm1, %v15178_v48  ;;  %13587 = vmatprep.subr.mxu1 %v14532_v1 }
 0x66f   :  { %13588 = vmatpush3.msra.mxu1 %v3302_v54  ;;  %13591 = vmatprep.mubr.msk.f32.mxu1 %vm14533_vm0, %v14532_v1 }
 0x670   :  { %13589 = vmatprep.subr.mxu1 %v14532_v1  ;;  %13594 = vmatprep.subr.mxu0 %v14532_v1 }
 0x671   :  { %13590 = vmatpush3.msra.mxu1 %v3301_v55  ;;  %13596 = vmatprep.mubr.msk.f32.mxu0 %vm14533_vm0, %v14532_v1 }
 0x672   :  { %13592 = vmatmul.mubr.msk.f32.vlgmr.msra.gmra.mxu1 %vm131_vm1, %v15197_v50  ;;  %13599 = vmatprep.subr.mxu1 %v14532_v1 }
 0x673   :  { %13601 = vmatprep.mubr.msk.f32.mxu1 %vm14533_vm0, %v14532_v1 }
 0x6ea   :  { %v2792_v58 = vpop.f32.mrf.mxu0 }
 0x6eb   :  { %v2793_v18 = vadd.f32 %v12458_v15, %v2792_v58 }
 0x6ec   :  { %v13428_v60 = vpop.f32.mrf.mxu0 }
 0x6ee   :  { %v2865_v61 = vpop.f32.mrf.mxu1 }
 0x6ef   :  { %v2866_v25 = vadd.f32 %v12458_v15, %v2865_v61 }
 0x6f0   :  { %v13439_v62 = vpop.f32.mrf.mxu1 }
 0x6f2   :  { %v2935_v63 = vpop.f32.mrf.mxu0 }
 0x6f3   :  { %v2936_v34 = vadd.f32 %v12459_v28, %v2935_v63 }
 0x6f4   :  { %v13450_v0 = vpop.f32.mrf.mxu0 }
 0x6f7   :  { %v3005_v11 = vpop.f32.mrf.mxu1 }
 0x6f8   :  { %v3006_v39 = vadd.f32 %v12459_v28, %v3005_v11 }
 0x6f9   :  { %v13461_v8 = vpop.f32.mrf.mxu1 }
 0x6fc   :  { %v3075_v2 = vpop.f32.mrf.mxu0 }
 0x6fd   :  { %v3076_v46 = vadd.f32 %v12460_v41, %v3075_v2 }
 0x6fe   :  { %v13472_v3 = vpop.f32.mrf.mxu0 }
 0x701   :  { %v3145_v4 = vpop.f32.mrf.mxu1 }
 0x702   :  { %v3146_v50 = vadd.f32 %v12460_v41, %v3145_v4 }
 0x703   :  { %v13483_v5 = vpop.f32.mrf.mxu1 }
 0x706   :  { %v15286_v6 = vpop.f32.mrf.mxu0 }
 0x707   :  { %v3216_v38 = vadd.f32 %v12461_v51, %v15286_v6 }
 0x708   :  { %v13494_v7 = vpop.f32.mrf.mxu0 }
 0x70b   :  { %v15288_v9 = vpop.f32.mrf.mxu1 }
 0x70c   :  { %v3286_v54 = vadd.f32 %v12461_v51, %v15288_v9 }
 0x70d   :  { %v13505_v10 = vpop.f32.mrf.mxu1 }
 0x710   :  { %v3402_v14 = vpop.f32.mrf.mxu0 }
 0x711   :  { %v15296_v16 = vadd.f32 %v12470_v12, %v3402_v14 }
 0x712   :  { %v13516_v17 = vpop.f32.mrf.mxu0 }
 0x713   :  { %13595 = vmatpush3.xpose.msk.msra.mxu0 %vm706_vm2, %v15296_v16 }
 0x714   :  { %13604 = vmatprep.subr.mxu0 %v14532_v1 }
 0x715   :  { %v3475_v19 = vpop.f32.mrf.mxu1 }
 0x716   :  { %v15301_v20 = vadd.f32 %v12470_v12, %v3475_v19  ;;  %13597 = vmatmul.mubr.msk.f32.vlgmr.msra.gmra.mxu0 %vm706_vm2, %v2793_v18 }
 0x717   :  { %v13527_v22 = vpop.f32.mrf.mxu1  ;;  %13606 = vmatprep.mubr.msk.f32.mxu0 %vm14533_vm0, %v14532_v1 }
 0x718   :  { %13600 = vmatpush3.xpose.msk.msra.mxu1 %vm706_vm2, %v15301_v20 }
 0x719   :  { %13609 = vmatprep.subr.mxu1 %v14532_v1 }
 0x71a   :  { %v3545_v27 = vpop.f32.mrf.mxu0 }
 0x71b   :  { %v15315_v31 = vadd.f32 %v12471_v24, %v3545_v27  ;;  %13602 = vmatmul.mubr.msk.f32.vlgmr.msra.gmra.mxu1 %vm706_vm2, %v2866_v25 }
 0x71c   :  { %v13538_v32 = vpop.f32.mrf.mxu0  ;;  %13611 = vmatprep.mubr.msk.f32.mxu1 %vm14533_vm0, %v14532_v1 }
 0x71d   :  { %13605 = vmatpush3.xpose.msk.msra.mxu0 %vm706_vm2, %v15315_v31 }
 0x71e   :  { %13614 = vmatprep.subr.mxu0 %v14532_v1 }
 0x71f   :  { %v3615_v35 = vpop.f32.mrf.mxu1 }
 0x720   :  { %v15323_v37 = vadd.f32 %v12471_v24, %v3615_v35  ;;  %13607 = vmatmul.mubr.msk.f32.vlgmr.msra.gmra.mxu0 %vm706_vm2, %v2936_v34 }
 0x721   :  { %v13549_v42 = vpop.f32.mrf.mxu1  ;;  %13616 = vmatprep.mubr.msk.f32.mxu0 %vm14533_vm0, %v14532_v1 }
 0x722   :  { %13610 = vmatpush3.xpose.msk.msra.mxu1 %vm706_vm2, %v15323_v37 }
 0x723   :  { %13619 = vmatprep.subr.mxu1 %v14532_v1 }
 0x724   :  { %v3685_v40 = vpop.f32.mrf.mxu0 }
 0x725   :  { %v15337_v43 = vadd.f32 %v12472_v45, %v3685_v40  ;;  %13612 = vmatmul.mubr.msk.f32.vlgmr.msra.gmra.mxu1 %vm706_vm2, %v3006_v39 }
 0x726   :  { %v13560_v44 = vpop.f32.mrf.mxu0  ;;  %13621 = vmatprep.mubr.msk.f32.mxu1 %vm14533_vm0, %v14532_v1 }
 0x727   :  { %13615 = vmatpush3.xpose.msk.msra.mxu0 %vm706_vm2, %v15337_v43 }
 0x728   :  { %13624 = vmatprep.subr.mxu0 %v14532_v1 }
 0x729   :  { %v3755_v47 = vpop.f32.mrf.mxu1 }
 0x72a   :  { %v15345_v48 = vadd.f32 %v12472_v45, %v3755_v47  ;;  %13617 = vmatmul.mubr.msk.f32.vlgmr.msra.gmra.mxu0 %vm706_vm2, %v3076_v46 }
 0x72b   :  { %v13571_v21 = vpop.f32.mrf.mxu1  ;;  %13626 = vmatprep.mubr.msk.f32.mxu0 %vm14533_vm0, %v14532_v1 }
 0x72c   :  { %13620 = vmatpush3.xpose.msk.msra.mxu1 %vm706_vm2, %v15345_v48 }
 0x72d   :  { %13629 = vmatprep.subr.mxu1 %v14532_v1 }
 0x72e   :  { %v3825_v26 = vpop.f32.mrf.mxu0 }
 0x72f   :  { %v15359_v30 = vadd.f32 %v12473_v49, %v3825_v26  ;;  %13622 = vmatmul.mubr.msk.f32.vlgmr.msra.gmra.mxu1 %vm706_vm2, %v3146_v50 }
 0x730   :  { %v13582_v52 = vpop.f32.mrf.mxu0  ;;  %13631 = vmatprep.mubr.msk.f32.mxu1 %vm14533_vm0, %v14532_v1 }
 0x731   :  { %13625 = vmatpush3.xpose.msk.msra.mxu0 %vm706_vm2, %v15359_v30 }
 0x732   :  { %v3895_v33 = vpop.f32.mrf.mxu1  ;;  %13634 = vmatprep.subr.mxu0 %v14532_v1 }
 0x733   :  { %v15368_v36 = vadd.f32 %v12473_v49, %v3895_v33 }
 0x734   :  { %v13593_v53 = vpop.f32.mrf.mxu1  ;;  %13627 = vmatmul.mubr.msk.f32.vlgmr.msra.gmra.mxu0 %vm706_vm2, %v3216_v38 }
 0x735   :  { %13630 = vmatpush3.xpose.msk.msra.mxu1 %vm706_vm2, %v15368_v36  ;;  %13636 = vmatprep.mubr.msk.f32.mxu0 %vm14533_vm0, %v14532_v1 }
 0x736   :  { %13639 = vmatprep.subr.mxu1 %v14532_v1 }
 0x738   :  { %13632 = vmatmul.mubr.msk.f32.vlgmr.msra.gmra.mxu1 %vm706_vm2, %v3286_v54 }
 0x739   :  { %13641 = vmatprep.mubr.msk.f32.mxu1 %vm14533_vm0, %v14532_v1 }
 0x7d6   :  { %v3976_v55 = vpop.f32.mrf.mxu0 }
 0x7d7   :  { %v4512_v58 = vmul.f32 0.35355338, %v3976_v55 }
 0x7d8   :  { %v13598_v60 = vpop.f32.mrf.mxu0 }
 0x7d9   :  { %v4520_v61 = vsel %vm706_vm2, %v4512_v58, -inf }
 0x7da   :  { %4521 = vmax.xlane.f32.xlu1 %v4520_v61 }
 0x7db   :  { %v4052_v62 = vpop.f32.mrf.mxu1 }
 0x7dc   :  { %v4513_v63 = vmul.f32 0.35355338, %v4052_v62 }
 0x7dd   :  { %v13603_v0 = vpop.f32.mrf.mxu1 }
 0x7de   :  { %v4523_v11 = vsel %vm706_vm2, %v4513_v63, -inf }
 0x7df   :  { %4524 = vmax.xlane.f32.xlu0 %v4523_v11 }
 0x7e0   :  { %v4128_v8 = vpop.f32.mrf.mxu0 }
 0x7e1   :  { %v4514_v2 = vmul.f32 0.35355338, %v4128_v8 }
 0x7e2   :  { %v13608_v3 = vpop.f32.mrf.mxu0 }
 0x7e3   :  { %v4526_v4 = vsel %vm706_vm2, %v4514_v2, -inf }
 0x7e4   :  { %4527 = vmax.xlane.f32.xlu1 %v4526_v4 }
 0x7e5   :  { %v4204_v5 = vpop.f32.mrf.mxu1 }
 0x7e6   :  { %v4515_v6 = vmul.f32 0.35355338, %v4204_v5 }
 0x7e7   :  { %v13613_v7 = vpop.f32.mrf.mxu1 }
 0x7e8   :  { %v4529_v9 = vsel %vm706_vm2, %v4515_v6, -inf }
 0x7e9   :  { %4530 = vmax.xlane.f32.xlu0 %v4529_v9 }
 0x7ea   :  { %v4280_v10 = vpop.f32.mrf.mxu0 }
 0x7eb   :  { %v4516_v12 = vmul.f32 0.35355338, %v4280_v10 }
 0x7ec   :  { %v13618_v14 = vpop.f32.mrf.mxu0 }
 0x7ed   :  { %v4532_v15 = vsel %vm706_vm2, %v4516_v12, -inf }
 0x7ee   :  { %4533 = vmax.xlane.f32.xlu1 %v4532_v15 }
 0x7ef   :  { %v4356_v17 = vpop.f32.mrf.mxu1 }
 0x7f0   :  { %v4517_v18 = vmul.f32 0.35355338, %v4356_v17 }
 0x7f1   :  { %v13623_v19 = vpop.f32.mrf.mxu1 }
 0x7f2   :  { %v4535_v22 = vsel %vm706_vm2, %v4517_v18, -inf }
 0x7f3   :  { %4536 = vmax.xlane.f32.xlu0 %v4535_v22 }
 0x7f4   :  { %v4432_v24 = vpop.f32.mrf.mxu0 }
 0x7f5   :  { %v4518_v25 = vmul.f32 0.35355338, %v4432_v24 }
 0x7f6   :  { %v13628_v27 = vpop.f32.mrf.mxu0 }
 0x7f7   :  { %v4538_v28 = vsel %vm706_vm2, %v4518_v25, -inf }
 0x7f8   :  { %v4508_v32 = vpop.f32.mrf.mxu1  ;;  %4539 = vmax.xlane.f32.xlu1 %v4538_v28 }
 0x7f9   :  { %v4519_v34 = vmul.f32 0.35355338, %v4508_v32 }
 0x7fa   :  { %v13633_v35 = vpop.f32.mrf.mxu1 }
 0x7fb   :  { %v4541_v42 = vsel %vm706_vm2, %v4519_v34, -inf }
 0x7fc   :  { %4542 = vmax.xlane.f32.xlu0 %v4541_v42 }
 0x809   :  { %4608 = vrot.lane.b32.xlu1 %v15296_v16, %s16675_s3 }
 0x80d   :  { %4760 = vrot.lane.b32.xlu1 %v15315_v31, %s16675_s3 }
 0x811   :  { %4836 = vrot.lane.b32.xlu1 %v15323_v37, %s16675_s3 }
 0x812   :  { %4684 = vrot.lane.b32.xlu0 %v15301_v20, %s16675_s3 }
 0x815   :  { %4988 = vrot.lane.b32.xlu1 %v15345_v48, %s16675_s3 }
 0x816   :  { %4912 = vrot.lane.b32.xlu0 %v15337_v43, %s16675_s3 }
 0x863   :  { %v4522_v45 = vpop.xlane.xlu1 %4521 }
 0x864   :  { %v4544_v39 = vsub.f32 %v4512_v58, %v4522_v45 }
 0x866   :  { %v4552_v40 = vmul.f32 1.442695, %v4544_v39 }
 0x868   :  { %14380 = vpow2.f32 %v4552_v40  ;;  %v4525_v16 = vpop.xlane.xlu0 %4524 }
 0x869   :  { %v4545_v41 = vsub.f32 %v4513_v63, %v4525_v16 }
 0x86b   :  { %v4554_v44 = vmul.f32 1.442695, %v4545_v41 }
 0x86d   :  { %14382 = vpow2.f32 %v4554_v44  ;;  %v4528_v31 = vpop.xlane.xlu1 %4527 }
 0x86e   :  { %v4546_v46 = vsub.f32 %v4514_v2, %v4528_v31 }
 0x870   :  { %v4556_v37 = vmul.f32 1.442695, %v4546_v46 }
 0x872   :  { %14384 = vpow2.f32 %v4556_v37  ;;  %v4531_v47 = vpop.xlane.xlu0 %4530 }
 0x873   :  { %v4547_v20 = vsub.f32 %v4515_v6, %v4531_v47 }
 0x875   :  { %v14381_v21 = vpop.eup %14380  ;;  %v4558_v49 = vmul.f32 1.442695, %v4547_v20 }
 0x876   :  { %v4568_v48 = vsel %vm706_vm2, %v14381_v21, 0.0 }
 0x877   :  { %14386 = vpow2.f32 %v4558_v49  ;;  %v4534_v43 = vpop.xlane.xlu1 %4533  ;;  %4569 = vadd.xlane.f32.xlu1 %v4568_v48 }
 0x878   :  { %v4548_v50 = vsub.f32 %v4516_v12, %v4534_v43 }
 0x87a   :  { %v15401_v26 = vpop.eup %14382  ;;  %v4560_v51 = vmul.f32 1.442695, %v4548_v50  ;;  %v3899_v50 = vld [vmem:[%s16651_s10] sm:$0xff] }
 0x87b   :  { %v4571_v52 = vsel %vm706_vm2, %v15401_v26, 0.0 }
 0x87c   :  { %14388 = vpow2.f32 %v4560_v51  ;;  %v4537_v38 = vpop.xlane.xlu0 %4536  ;;  %4572 = vadd.xlane.f32.xlu0 %v4571_v52 }
 0x87d   :  { %v4549_v33 = vsub.f32 %v4517_v18, %v4537_v38 }
 0x87f   :  { %v15405_v53 = vpop.eup %14384  ;;  %v4562_v54 = vmul.f32 1.442695, %v4549_v33 }
 0x880   :  { %v4574_v55 = vsel %vm706_vm2, %v15405_v53, 0.0 }
 0x881   :  { %14390 = vpow2.f32 %v4562_v54  ;;  %v4540_v58 = vpop.xlane.xlu1 %4539  ;;  %4575 = vadd.xlane.f32.xlu1 %v4574_v55 }
 0x882   :  { %v4550_v60 = vsub.f32 %v4518_v25, %v4540_v58 }
 0x884   :  { %v15409_v61 = vpop.eup %14386  ;;  %v4564_v62 = vmul.f32 1.442695, %v4550_v60 }
 0x885   :  { %v4543_v63 = vpop.xlane.xlu0 %4542  ;;  %v4609_v0 = vpop.permute.xlu1 %4608  ;;  %v4577_v11 = vsel %vm706_vm2, %v15409_v61, 0.0 }
 0x886   :  { %14392 = vpow2.f32 %v4564_v62  ;;  %v4551_v8 = vsub.f32 %v4519_v34, %v4543_v63  ;;  %13635 = vmatpush3.msra.mxu0 %v4609_v0  ;;  %4578 = vadd.xlane.f32.xlu0 %v4577_v11 }
 0x887   :  { %13644 = vmatprep.subr.mxu0 %v14532_v1 }
 0x888   :  { %v4566_v2 = vmul.f32 1.442695, %v4551_v8 }
 0x889   :  { %v15414_v3 = vpop.eup %14388  ;;  %v4685_v4 = vpop.permute.xlu0 %4684 }
 0x88a   :  { %14394 = vpow2.f32 %v4566_v2  ;;  %13640 = vmatpush3.msra.mxu1 %v4685_v4  ;;  %v4580_v5 = vsel %vm706_vm2, %v15414_v3, 0.0  ;;  %v4761_v15 = vpop.permute.xlu1 %4760 }
 0x88b   :  { %4581 = vadd.xlane.f32.xlu1 %v4580_v5  ;;  %13649 = vmatprep.subr.mxu1 %v14532_v1 }
 0x88d   :  { %v4913_v22 = vpop.permute.xlu0 %4912 }
 0x88e   :  { %v14391_v6 = vpop.eup %14390  ;;  %v4837_v17 = vpop.permute.xlu1 %4836 }
 0x88f   :  { %v4583_v7 = vsel %vm706_vm2, %v14391_v6, 0.0 }
 0x890   :  { %4584 = vadd.xlane.f32.xlu0 %v4583_v7 }
 0x892   :  { %v4989_v18 = vpop.permute.xlu1 %4988 }
 0x893   :  { %v15420_v9 = vpop.eup %14392 }
 0x894   :  { %v4586_v10 = vsel %vm706_vm2, %v15420_v9, 0.0 }
 0x895   :  { %4587 = vadd.xlane.f32.xlu1 %v4586_v10 }
 0x897   :  { %v15424_v12 = vpop.eup %14394 }
 0x898   :  { %v4589_v14 = vsel %vm706_vm2, %v15424_v12, 0.0 }
 0x899   :  { %4590 = vadd.xlane.f32.xlu0 %v4589_v14 }
 0x8a6   :  { %5140 = vrot.lane.b32.xlu1 %v15368_v36, %s16675_s3 }
 0x8af   :  { %5064 = vrot.lane.b32.xlu0 %v15359_v30, %s16675_s3 }
 0x900   :  { %v4570_v19 = vpop.xlane.xlu1 %4569 }
 0x901   :  { %14396 = vrcp.f32 %v4570_v19 }
 0x905   :  { %v4573_v24 = vpop.xlane.xlu0 %4572 }
 0x906   :  { %14398 = vrcp.f32 %v4573_v24 }
 0x90a   :  { %v4576_v25 = vpop.xlane.xlu1 %4575 }
 0x90b   :  { %14400 = vrcp.f32 %v4576_v25 }
 0x90e   :  { %v14397_v27 = vpop.eup %14396 }
 0x90f   :  { %v4579_v28 = vpop.xlane.xlu0 %4578  ;;  %v4600_v32 = vmul.f32 %v14397_v27, %v14381_v21 }
 0x910   :  { %14402 = vrcp.f32 %v4579_v28 }
 0x911   :  { %13637 = vmatmul.mubr.msk.f32.vlgmr.msra.gmra.mxu0 %vm706_vm2, %v4600_v32 }
 0x912   :  { %13645 = vmatpush3.msra.mxu0 %v4761_v15  ;;  %13646 = vmatprep.mubr.msk.f32.mxu0 %vm14533_vm0, %v14532_v1 }
 0x913   :  { %v14399_v30 = vpop.eup %14398  ;;  %13654 = vmatprep.subr.mxu0 %v14532_v1 }
 0x914   :  { %v4582_v36 = vpop.xlane.xlu1 %4581  ;;  %v4601_v34 = vmul.f32 %v14399_v30, %v15401_v26  ;;  %v3900_v26 = vld [vmem:[%s16651_s10 + $0x8] sm:$0xff] }
 0x915   :  { %14404 = vrcp.f32 %v4582_v36 }
 0x916   :  { %13642 = vmatmul.mubr.msk.f32.vlgmr.msra.gmra.mxu1 %vm706_vm2, %v4601_v34 }
 0x917   :  { %13650 = vmatpush3.msra.mxu1 %v4837_v17  ;;  %13651 = vmatprep.mubr.msk.f32.mxu1 %vm14533_vm0, %v14532_v1 }
 0x918   :  { %v14401_v35 = vpop.eup %14400  ;;  %13659 = vmatprep.subr.mxu1 %v14532_v1 }
 0x919   :  { %v4585_v42 = vpop.xlane.xlu0 %4584  ;;  %v4602_v45 = vmul.f32 %v14401_v35, %v15405_v53  ;;  %v3901_v53 = vld [vmem:[%s16651_s10 + $0x10] sm:$0xff] }
 0x91a   :  { %14406 = vrcp.f32 %v4585_v42  ;;  %v12514_v42 = vld [vmem:[%s16652_s11] ss:$0 sm:$0xff] }
 0x91b   :  { %13647 = vmatmul.mubr.msk.f32.vlgmr.msra.gmra.mxu0 %vm706_vm2, %v4602_v45 }
 0x91c   :  { %13655 = vmatpush3.msra.mxu0 %v4913_v22  ;;  %13656 = vmatprep.mubr.msk.f32.mxu0 %vm14533_vm0, %v14532_v1 }
 0x91d   :  { %v14403_v39 = vpop.eup %14402  ;;  %13664 = vmatprep.subr.mxu0 %v14532_v1 }
 0x91e   :  { %v4588_v40 = vpop.xlane.xlu1 %4587  ;;  %v4603_v16 = vmul.f32 %v14403_v39, %v15409_v61  ;;  %v3902_v61 = vld [vmem:[%s16651_s10 + $0x18] sm:$0xff] }
 0x91f   :  { %14408 = vrcp.f32 %v4588_v40 }
 0x920   :  { %13652 = vmatmul.mubr.msk.f32.vlgmr.msra.gmra.mxu1 %vm706_vm2, %v4603_v16 }
 0x921   :  { %13660 = vmatpush3.msra.mxu1 %v4989_v18  ;;  %13661 = vmatprep.mubr.msk.f32.mxu1 %vm14533_vm0, %v14532_v1 }
 0x922   :  { %v14405_v41 = vpop.eup %14404  ;;  %v4591_v44 = vpop.xlane.xlu0 %4590  ;;  %13669 = vmatprep.subr.mxu1 %v14532_v1 }
 0x923   :  { %14410 = vrcp.f32 %v4591_v44  ;;  %v4604_v31 = vmul.f32 %v14405_v41, %v15414_v3  ;;  %v5141_v20 = vpop.permute.xlu1 %5140 }
 0x925   :  { %13657 = vmatmul.mubr.msk.f32.vlgmr.msra.gmra.mxu0 %vm706_vm2, %v4604_v31 }
 0x926   :  { %v5065_v46 = vpop.permute.xlu0 %5064  ;;  %13666 = vmatprep.mubr.msk.f32.mxu0 %vm14533_vm0, %v14532_v1 }
 0x927   :  { %v14407_v37 = vpop.eup %14406  ;;  %13665 = vmatpush3.msra.mxu0 %v5065_v46 }
 0x928   :  { %v4605_v47 = vmul.f32 %v14407_v37, %v14391_v6  ;;  %13674 = vmatprep.subr.mxu0 %v14532_v1 }
 0x92a   :  { %13662 = vmatmul.mubr.msk.f32.vlgmr.msra.gmra.mxu1 %vm706_vm2, %v4605_v47 }
 0x92b   :  { %13670 = vmatpush3.msra.mxu1 %v5141_v20  ;;  %13671 = vmatprep.mubr.msk.f32.mxu1 %vm14533_vm0, %v14532_v1 }
 0x92c   :  { %v14409_v21 = vpop.eup %14408  ;;  %13679 = vmatprep.subr.mxu1 %v14532_v1 }
 0x92d   :  { %v4606_v49 = vmul.f32 %v14409_v21, %v15420_v9 }
 0x92f   :  { %13667 = vmatmul.mubr.msk.f32.vlgmr.msra.gmra.mxu0 %vm706_vm2, %v4606_v49 }
 0x930   :  { %v14411_v48 = vpop.eup %14410  ;;  %13676 = vmatprep.mubr.msk.f32.mxu0 %vm14533_vm0, %v14532_v1  ;;  %13675 = vmatpush3.msra.mxu0 %v3899_v50 }
 0x931   :  { %v4607_v43 = vmul.f32 %v14411_v48, %v15424_v12  ;;  %13684 = vmatprep.subr.mxu0 %v14532_v1 }
 0x933   :  { %13672 = vmatmul.mubr.msk.f32.vlgmr.msra.gmra.mxu1 %vm706_vm2, %v4607_v43 }
 0x934   :  { %13681 = vmatprep.mubr.msk.f32.mxu1 %vm14533_vm0, %v14532_v1  ;;  %13680 = vmatpush3.msra.mxu1 %v3899_v50 }
 0x935   :  { %13689 = vmatprep.subr.mxu1 %v14532_v1 }
 0x9d1   :  { %v4680_v51 = vpop.f32.mrf.mxu0 }
 0x9d2   :  { %13677 = vmatmul.mubr.msk.f32.vlgmr.msra.gmra.mxu0 %vm706_vm2, %v4680_v51 }
 0x9d3   :  { %v13638_v52 = vpop.f32.mrf.mxu0  ;;  %13685 = vmatpush3.msra.mxu0 %v3900_v26  ;;  %13686 = vmatprep.mubr.msk.f32.mxu0 %vm14533_vm0, %v14532_v1 }
 0x9d4   :  { %13694 = vmatprep.subr.mxu0 %v14532_v1 }
 0x9d6   :  { %v4756_v38 = vpop.f32.mrf.mxu1 }
 0x9d7   :  { %13682 = vmatmul.mubr.msk.f32.vlgmr.msra.gmra.mxu1 %vm706_vm2, %v4756_v38 }
 0x9d8   :  { %v13643_v33 = vpop.f32.mrf.mxu1  ;;  %13690 = vmatpush3.msra.mxu1 %v3900_v26  ;;  %13691 = vmatprep.mubr.msk.f32.mxu1 %vm14533_vm0, %v14532_v1 }
 0x9d9   :  { %13699 = vmatprep.subr.mxu1 %v14532_v1 }
 0x9db   :  { %v4832_v54 = vpop.f32.mrf.mxu0 }
 0x9dc   :  { %13687 = vmatmul.mubr.msk.f32.vlgmr.msra.gmra.mxu0 %vm706_vm2, %v4832_v54 }
 0x9dd   :  { %v13648_v55 = vpop.f32.mrf.mxu0  ;;  %13695 = vmatpush3.msra.mxu0 %v3901_v53  ;;  %13696 = vmatprep.mubr.msk.f32.mxu0 %vm14533_vm0, %v14532_v1 }
 0x9de   :  { %13704 = vmatprep.subr.mxu0 %v14532_v1  ;;  %v5865_v55 = vld [vmem:[%s16653_s12 + $0x18] sm:$0xff] }
 0x9e0   :  { %v4908_v58 = vpop.f32.mrf.mxu1 }
 0x9e1   :  { %13692 = vmatmul.mubr.msk.f32.vlgmr.msra.gmra.mxu1 %vm706_vm2, %v4908_v58  ;;  %v5864_v58 = vld [vmem:[%s16653_s12 + $0x10] sm:$0xff] }
 0x9e2   :  { %v13653_v60 = vpop.f32.mrf.mxu1  ;;  %13700 = vmatpush3.msra.mxu1 %v3901_v53  ;;  %13701 = vmatprep.mubr.msk.f32.mxu1 %vm14533_vm0, %v14532_v1 }
 0x9e3   :  { %13709 = vmatprep.subr.mxu1 %v14532_v1  ;;  %v5863_v60 = vld [vmem:[%s16653_s12 + $0x8] sm:$0xff] }
 0x9e5   :  { %v4984_v62 = vpop.f32.mrf.mxu0 }
 0x9e6   :  { %13697 = vmatmul.mubr.msk.f32.vlgmr.msra.gmra.mxu0 %vm706_vm2, %v4984_v62  ;;  %v5971_v62 = vld [vmem:[%s16655_s14 + $0x78] sm:$0xff] }
 0x9e7   :  { %v13658_v63 = vpop.f32.mrf.mxu0  ;;  %13705 = vmatpush3.msra.mxu0 %v3902_v61  ;;  %13706 = vmatprep.mubr.msk.f32.mxu0 %vm14533_vm0, %v14532_v1 }
 0x9e8   :  { %13714 = vmatprep.subr.mxu0 %v5865_v55  ;;  %v5970_v63 = vld [vmem:[%s16655_s14 + $0x70] sm:$0xff] }
 0x9ea   :  { %v5060_v0 = vpop.f32.mrf.mxu1 }
 0x9eb   :  { %13702 = vmatmul.mubr.msk.f32.vlgmr.msra.gmra.mxu1 %vm706_vm2, %v5060_v0  ;;  %v5969_v0 = vld [vmem:[%s16655_s14 + $0x68] sm:$0xff] }
 0x9ec   :  { %v13663_v11 = vpop.f32.mrf.mxu1  ;;  %13710 = vmatpush3.msra.mxu1 %v3902_v61  ;;  %13711 = vmatprep.mubr.msk.f32.mxu1 %vm14533_vm0, %v14532_v1  ;;  %v5862_v61 = vld [vmem:[%s16653_s12] sm:$0xff] }
 0x9ed   :  { %13725 = vmatprep.subr.mxu1 %v5971_v62  ;;  %v5968_v11 = vld [vmem:[%s16655_s14 + $0x60] sm:$0xff] }
 0x9ef   :  { %v5136_v8 = vpop.f32.mrf.mxu0 }
 0x9f0   :  { %13707 = vmatmul.mubr.msk.f32.vlgmr.msra.gmra.mxu0 %vm706_vm2, %v5136_v8  ;;  %v5967_v8 = vld [vmem:[%s16655_s14 + $0x58] sm:$0xff] }
 0x9f1   :  { %v13668_v2 = vpop.f32.mrf.mxu0  ;;  %13715 = vmatpush3.msra.mxu0 %v5865_v55 }
 0x9f2   :  { %13716 = vmatprep.subr.mxu0 %v5864_v58  ;;  %v5966_v2 = vld [vmem:[%s16655_s14 + $0x50] sm:$0xff] }
 0x9f3   :  { %v5212_v3 = vpop.f32.mrf.mxu1  ;;  %13717 = vmatpush3.msra.mxu0 %v5864_v58 }
 0x9f4   :  { %13712 = vmatmul.mubr.msk.f32.vlgmr.msra.gmra.mxu1 %vm706_vm2, %v5212_v3  ;;  %13718 = vmatprep.subr.mxu0 %v5863_v60  ;;  %v5965_v3 = vld [vmem:[%s16655_s14 + $0x48] sm:$0xff] }
 0x9f5   :  { %v13673_v4 = vpop.f32.mrf.mxu1  ;;  %13719 = vmatpush3.msra.mxu0 %v5863_v60  ;;  %13726 = vmatpush3.msra.mxu1 %v5971_v62 }
 0x9f6   :  { %13720 = vmatprep.subr.mxu0 %v5862_v61  ;;  %13727 = vmatprep.subr.mxu1 %v5970_v63  ;;  %v5964_v4 = vld [vmem:[%s16655_s14 + $0x40] sm:$0xff] }
 0x9f7   :  { %13721 = vmatpush3.msra.mxu0 %v5862_v61  ;;  %13728 = vmatpush3.msra.mxu1 %v5970_v63 }
 0x9f8   :  { %13760 = vmatprep.subr.mxu0 %v14532_v1  ;;  %13729 = vmatprep.subr.mxu1 %v5969_v0 }
 0x9f9   :  { %13730 = vmatpush3.msra.mxu1 %v5969_v0  ;;  %v12524_v0 = vld [vmem:[%s16685_s24 + $0x98] sm:$0xff] }
 0x9fa   :  { %13731 = vmatprep.subr.mxu1 %v5968_v11 }
 0x9fb   :  { %13732 = vmatpush3.msra.mxu1 %v5968_v11  ;;  %v15634_v11 = vld [vmem:[%s16685_s24 + $0xd8] sm:$0xff] }
 0x9fc   :  { %13733 = vmatprep.subr.mxu1 %v5967_v8 }
 0x9fd   :  { %13734 = vmatpush3.msra.mxu1 %v5967_v8  ;;  %v12523_v8 = vld [vmem:[%s16685_s24 + $0x90] sm:$0xff] }
 0x9fe   :  { %13735 = vmatprep.subr.mxu1 %v5966_v2 }
 0x9ff   :  { %13736 = vmatpush3.msra.mxu1 %v5966_v2  ;;  %v15643_v2 = vld [vmem:[%s16685_s24 + $0xd0] sm:$0xff] }
 0xa00   :  { %13737 = vmatprep.subr.mxu1 %v5965_v3 }
 0xa01   :  { %13738 = vmatpush3.msra.mxu1 %v5965_v3  ;;  %v12522_v3 = vld [vmem:[%s16685_s24 + $0x88] sm:$0xff] }
 0xa02   :  { %13739 = vmatprep.subr.mxu1 %v5964_v4 }
 0xa03   :  { %13740 = vmatpush3.msra.mxu1 %v5964_v4  ;;  %v15653_v4 = vld [vmem:[%s16685_s24 + $0xc8] sm:$0xff] }
 0xa92   :  { %v5285_v5 = vpop.f32.mrf.mxu0 }
 0xa93   :  { %v5800_v24 = vsel %vm131_vm1, %v5285_v5, 0.0  ;;  %v5963_v5 = vld [vmem:[%s16655_s14 + $0x38] sm:$0xff] }
 0xa94   :  { %v13678_v6 = vpop.f32.mrf.mxu0  ;;  %13741 = vmatprep.subr.mxu1 %v5963_v5 }
 0xa95   :  { %v5962_v6 = vld [vmem:[%s16655_s14 + $0x30] sm:$0xff]  ;;  %13742 = vmatpush3.msra.mxu1 %v5963_v5  ;;  %v12521_v5 = vld [vmem:[%s16685_s24 + $0x80] sm:$0xff] }
 0xa96   :  { %13743 = vmatprep.subr.mxu1 %v5962_v6 }
 0xa97   :  { %v5358_v7 = vpop.f32.mrf.mxu1  ;;  %13744 = vmatpush3.msra.mxu1 %v5962_v6  ;;  %v15664_v6 = vld [vmem:[%s16685_s24 + $0xc0] sm:$0xff] }
 0xa98   :  { %v5807_v34 = vsel %vm131_vm1, %v5358_v7, 0.0  ;;  %v5961_v7 = vld [vmem:[%s16655_s14 + $0x28] sm:$0xff] }
 0xa99   :  { %v13683_v9 = vpop.f32.mrf.mxu1  ;;  %13745 = vmatprep.subr.mxu1 %v5961_v7 }
 0xa9a   :  { %v5960_v9 = vld [vmem:[%s16655_s14 + $0x20] sm:$0xff]  ;;  %13746 = vmatpush3.msra.mxu1 %v5961_v7 }
 0xa9b   :  { %13747 = vmatprep.subr.mxu1 %v5960_v9 }
 0xa9c   :  { %v5431_v10 = vpop.f32.mrf.mxu0  ;;  %13748 = vmatpush3.msra.mxu1 %v5960_v9 }
 0xa9d   :  { %v5801_v19 = vsel %vm131_vm1, %v5431_v10, 0.0 }
 0xa9e   :  { %v13688_v12 = vpop.f32.mrf.mxu0  ;;  %v5802_v28 = vadd.f32 %v5801_v19, %v5800_v24  ;;  %v15581_v19 = vsub.s32 1, %v14883_v56 }
 0xaa1   :  { %v5504_v14 = vpop.f32.mrf.mxu1 }
 0xaa2   :  { %v5808_v32 = vsel %vm131_vm1, %v5504_v14, 0.0 }
 0xaa3   :  { %v13693_v15 = vpop.f32.mrf.mxu1  ;;  %v5809_v39 = vadd.f32 %v5808_v32, %v5807_v34 }
 0xaa6   :  { %v5577_v17 = vpop.f32.mrf.mxu0 }
 0xaa7   :  { %v5803_v25 = vsel %vm131_vm1, %v5577_v17, 0.0 }
 0xaa8   :  { %v13698_v18 = vpop.f32.mrf.mxu0  ;;  %v5804_v30 = vadd.f32 %v5803_v25, %v5802_v28  ;;  %v15594_v28 = vld [vmem:[%s16658_s17] sm:$0x7] }
 0xaa9   :  { %v5859_v32 = vrot.slane %v15594_v28, %v15581_v19 }
 0xaab   :  { %v5650_v22 = vpop.f32.mrf.mxu1 }
 0xaac   :  { %v5810_v35 = vsel %vm131_vm1, %v5650_v22, 0.0  ;;  %v15586_v22 = vld [vmem:[%s16657_s16] sm:$0x7] }
 0xaad   :  { %v13703_v27 = vpop.f32.mrf.mxu1  ;;  %v5811_v41 = vadd.f32 %v5810_v35, %v5809_v39  ;;  %v5853_v24 = vrot.slane %v15586_v22, %v15581_v19  ;;  %v5959_v39 = vld [vmem:[%s16655_s14 + $0x18] sm:$0xff] }
 0xaae   :  { %13749 = vmatprep.subr.mxu1 %v5959_v39 }
 0xaaf   :  { %13750 = vmatpush3.msra.mxu1 %v5959_v39  ;;  %v12528_v39 = vld [vmem:[%s16685_s24 + $0xb8] sm:$0xff] }
 0xab0   :  { %v5723_v36 = vpop.f32.mrf.mxu0 }
 0xab1   :  { %v5805_v45 = vsel %vm131_vm1, %v5723_v36, 0.0 }
 0xab2   :  { %v5806_v40 = vadd.f32 %v5805_v45, %v5804_v30  ;;  %v13708_v16 = vpop.f32.mrf.mxu0 }
 0xab3   :  { %v5957_v16 = vld [vmem:[%s16655_s14 + $0x8] sm:$0xff] }
 0xab4   :  { %v5820_v44 = vadd.f32 %v12514_v42, %v5806_v40  ;;  %v5796_v31 = vpop.f32.mrf.mxu1  ;;  %v5958_v40 = vld [vmem:[%s16655_s14 + $0x10] sm:$0xff] }
 0xab5   :  { %v5812_v46 = vsel %vm131_vm1, %v5796_v31, 0.0  ;;  %13751 = vmatprep.subr.mxu1 %v5958_v40 }
 0xab6   :  { %v5813_v37 = vadd.f32 %v5812_v46, %v5811_v41  ;;  %v13713_v47 = vpop.f32.mrf.mxu1  ;;  %v5822_v20 = vadd.f32 %v5820_v44, %v15068_v23  ;;  %13752 = vmatpush3.msra.mxu1 %v5958_v40  ;;  %v5956_v41 = vld [vmem:[%s16655_s14] sm:$0xff]  ;;  %v12527_v40 = vld [vmem:[%s16685_s24 + $0xb0] sm:$0xff] }
 0xab7   :  { %13753 = vmatprep.subr.mxu1 %v5957_v16  ;;  %v12515_v44 = vld [vmem:[%s16654_s13] ss:$0 sm:$0xff] }
 0xab8   :  { %v5821_v21 = vadd.f32 %v12514_v42, %v5813_v37  ;;  %v5824_v49 = vsel %vm131_vm1, %v5822_v20, 0.0  ;;  %13754 = vmatpush3.msra.mxu1 %v5957_v16  ;;  %v12526_v16 = vld [vmem:[%s16685_s24 + $0xa8] sm:$0xff] }
 0xab9   :  { %5825 = vadd.xlane.f32.xlu0 %v5824_v49  ;;  %13755 = vmatprep.subr.mxu1 %v5956_v41  ;;  %v12518_v49 = vld [vmem:[%s16656_s15] ss:$0 sm:$0xff] }
 0xaba   :  { %v5823_v48 = vadd.f32 %v5821_v21, %v15081_v29  ;;  %13756 = vmatpush3.msra.mxu1 %v5956_v41  ;;  %v12525_v41 = vld [vmem:[%s16685_s24 + $0xa0] sm:$0xff] }
 0xabb   :  { %13804 = vmatprep.subr.mxu1 %v14532_v1 }
 0xabc   :  { %v5827_v43 = vsel %vm131_vm1, %v5823_v48, 0.0 }
 0xabd   :  { %5828 = vadd.xlane.f32.xlu1 %v5827_v43 }
 0xb42   :  { %v5826_v50 = vpop.xlane.xlu0 %5825 }
 0xb43   :  { %v5830_v26 = vmul.f32 0.03125, %v5826_v50 }
 0xb45   :  { %v15521_v51 = vsub.f32 %v5822_v20, %v5830_v26 }
 0xb46   :  { %v5829_v52 = vpop.xlane.xlu1 %5828 }
 0xb47   :  { %v5831_v38 = vmul.f32 0.03125, %v5829_v52  ;;  %v5834_v33 = vmul.f32 %v15521_v51, %v15521_v51 }
 0xb49   :  { %v15525_v53 = vsub.f32 %v5823_v48, %v5831_v38  ;;  %v5836_v23 = vsel %vm131_vm1, %v5834_v33, 0.0 }
 0xb4a   :  { %5837 = vadd.xlane.f32.xlu0 %v5836_v23 }
 0xb4b   :  { %v5835_v29 = vmul.f32 %v15525_v53, %v15525_v53 }
 0xb4d   :  { %v5839_v54 = vsel %vm131_vm1, %v5835_v29, 0.0 }
 0xb4e   :  { %5840 = vadd.xlane.f32.xlu0 %v5839_v54 }
 0xbd3   :  { %v5838_v10 = vpop.xlane.xlu0 %5837 }
 0xbd4   :  { %v5842_v12 = vmul.f32 0.03125, %v5838_v10 }
 0xbd6   :  { %v5844_v14 = vadd.f32 1e-05, %v5842_v12 }
 0xbd7   :  { %v5841_v15 = vpop.xlane.xlu0 %5840 }
 0xbd8   :  { %14412 = vrsqrt.f32 %v5844_v14  ;;  %v5843_v17 = vmul.f32 0.03125, %v5841_v15 }
 0xbda   :  { %v5845_v18 = vadd.f32 1e-05, %v5843_v17  ;;  %v15673_v17 = vsub.s32 2, %v14883_v56  ;;  %v12535_v56 = vld [vmem:[%s16685_s24 + $0xf0] sm:$0xff] }
 0xbdc   :  { %14414 = vrsqrt.f32 %v5845_v18 }
 0xbe5   :  { %v14413_v25 = vpop.eup %14412 }
 0xbe6   :  { %v5848_v27 = vmul.f32 %v14413_v25, %v15521_v51  ;;  %v6085_v25 = vrot.slane %v15586_v22, %v15673_v17  ;;  %v12534_v22 = vld [vmem:[%s16685_s24 + $0xe8] sm:$0xff] }
 0xbe8   :  { %v5854_v30 = vmul.f32 %v5853_v24, %v5848_v27 }
 0xbe9   :  { %v14415_v36 = vpop.eup %14414 }
 0xbea   :  { %v5849_v34 = vmul.f32 %v14415_v36, %v15525_v53  ;;  %v5860_v35 = vadd.f32 %v5859_v32, %v5854_v30  ;;  %v6091_v30 = vrot.slane %v15594_v28, %v15673_v17 }
 0xbec   :  { %v5855_v42 = vmul.f32 %v5853_v24, %v5849_v34  ;;  %13722 = vmatprep.mubr.msk.f32.mxu0 %vm131_vm1, %v5860_v35  ;;  %v15684_v34 = vld [vmem:[%s16685_s24 + $0xf8] sm:$0xff] }
 0xbee   :  { %v5861_v45 = vadd.f32 %v5859_v32, %v5855_v42  ;;  %v12533_v42 = vld [vmem:[%s16685_s24 + $0xe0] sm:$0xff]  ;;  %s12404_s24 = sshll.u32 %s16664_s23, 4  ;;  %s12405_s24 = int_to_ptr.vmem [resolvable:$true] %s12404_s24 }
 0xbef   :  { %s14518_s30 = scalar_lea.vmem %s12405_s24, 16  ;;  %p14523_p1 = scmp.lt.s32.totalorder %s12405_s24, %s12405_s24 }
 0xbf0   :  { %13723 = vmatmul.mubr.msk.f32.vlgmr.msra.gmra.mxu0 %vm131_vm1, %v5861_v45  ;;  %p14519_p0 = scmp.ne.s32.totalorder %s12405_s24, %s14518_s30  ;;  %p14524_p2 = scmp.lt.s32.totalorder %s14518_s30, %s14518_s30 }
 0xbf1   :  { %13768 = vmatprep.mubr.msk.f32.mxu0 %vm14533_vm0, %v14532_v1  ;;  %13761 = vmatpush3.msra.mxu0 %v12524_v0 }
 0xbf2   :  { %13762 = vmatprep.subr.mxu0 %v14532_v1  ;;  %p14525_p3 = por %p14524_p2, %p14523_p1 }
 0xbf3   :  { %13763 = vmatpush3.msra.mxu0 %v12523_v8 }
 0xbf4   :  { %13764 = vmatprep.subr.mxu0 %v14532_v1  ;;  %p14526_p4 = pnand %p14525_p3, %p14519_p0 }
 0xbf5   :  { %13765 = vmatpush3.msra.mxu0 %v12522_v3 }
 0xbf6   :  { %13766 = vmatprep.subr.mxu0 %v14532_v1 }
 0xbf7   :  { %13767 = vmatpush3.msra.mxu0 %v12521_v5 }
 0xbf8   :  { %13771 = vmatprep.subr.mxu0 %v14532_v1 }
 0xcb0   :  { %v13724_v31 = vpop.f32.mrf.mxu0 }
 0xcb1   :  { %v5951_v46 = vadd.f32 %v13724_v31, %v12515_v44 }
 0xcb2   :  { %v5945_v37 = vpop.f32.mrf.mxu0 }
 0xcb3   :  { %v5946_v47 = vadd.f32 %v12515_v44, %v5945_v37  ;;  %v5955_v21 = vmax.f32 %v5951_v46, 0.0  ;;  %v12541_v44 = vld [vmem:[%s16687_s29 + $0x4] ss:$0 sm:$0xff] }
 0xcb5   :  { %v5954_v20 = vmax.f32 %v5946_v47, 0.0 }
 0xcb7   :  { %13757 = vmatprep.mubr.f32.mxu1 %v5954_v20 }
 0xcb8   :  { %13758 = vmatmul.mubr.f32.vlgmr.msra.gmra.mxu1 %v5955_v21 }
 0xcb9   :  { %13812 = vmatprep.mubr.msk.f32.mxu1 %vm14533_vm0, %v14532_v1  ;;  %13805 = vmatpush3.msra.mxu1 %v15634_v11 }
 0xcba   :  { %13806 = vmatprep.subr.mxu1 %v14532_v1 }
 0xcbb   :  { %13807 = vmatpush3.msra.mxu1 %v15643_v2 }
 0xcbc   :  { %13808 = vmatprep.subr.mxu1 %v14532_v1 }
 0xcbd   :  { %13809 = vmatpush3.msra.mxu1 %v15653_v4 }
 0xcbe   :  { %13810 = vmatprep.subr.mxu1 %v14532_v1 }
 0xcbf   :  { %13811 = vmatpush3.msra.mxu1 %v15664_v6 }
 0xcc0   :  { %13826 = vmatprep.subr.mxu1 %v14532_v1 }
 0xd78   :  { %v13759_v48 = vpop.f32.mrf.mxu1 }
 0xd79   :  { %v6051_v43 = vadd.f32 %v13759_v48, %v12518_v49 }
 0xd7a   :  { %v6045_v50 = vpop.f32.mrf.mxu1 }
 0xd7b   :  { %v6046_v26 = vadd.f32 %v12518_v49, %v6045_v50  ;;  %v6055_v51 = vadd.f32 %v6051_v43, %v5861_v45  ;;  %v12543_v43 = vld [vmem:[%s16687_s29 + $0x6] ss:$0 sm:$0xff] }
 0xd7d   :  { %v6059_v52 = vsel %vm131_vm1, %v6055_v51, 0.0  ;;  %v6054_v38 = vadd.f32 %v6046_v26, %v5860_v35 }
 0xd7e   :  { %6060 = vadd.xlane.f32.xlu0 %v6059_v52  ;;  %v12544_v52 = vld [vmem:[%s16687_s29 + $0x7] ss:$0 sm:$0xff] }
 0xd7f   :  { %v6056_v33 = vsel %vm131_vm1, %v6054_v38, 0.0 }
 0xd80   :  { %6057 = vadd.xlane.f32.xlu1 %v6056_v33 }
 0xe07   :  { %v6061_v53 = vpop.xlane.xlu0 %6060 }
 0xe08   :  { %v6063_v23 = vmul.f32 0.03125, %v6061_v53 }
 0xe09   :  { %v6058_v29 = vpop.xlane.xlu1 %6057 }
 0xe0a   :  { %v6065_v54 = vsub.f32 %v6055_v51, %v6063_v23  ;;  %v6062_v55 = vmul.f32 0.03125, %v6058_v29 }
 0xe0c   :  { %v6064_v58 = vsub.f32 %v6054_v38, %v6062_v55  ;;  %v6067_v60 = vmul.f32 %v6065_v54, %v6065_v54  ;;  %v12542_v38 = vld [vmem:[%s16687_s29 + $0x5] ss:$0 sm:$0xff]  ;;  %s16694_s29 = smov 112  }
 0xe0e   :  { %v6071_v61 = vsel %vm131_vm1, %v6067_v60, 0.0  ;;  %v6066_v62 = vmul.f32 %v6064_v58, %v6064_v58 }
 0xe0f   :  { %6072 = vadd.xlane.f32.xlu0 %v6071_v61 }
 0xe10   :  { %v6068_v63 = vsel %vm131_vm1, %v6066_v62, 0.0 }
 0xe11   :  { %6069 = vadd.xlane.f32.xlu1 %v6068_v63 }
 0xe98   :  { %v6073_v7 = vpop.xlane.xlu0 %6072 }
 0xe99   :  { %v6075_v9 = vmul.f32 0.03125, %v6073_v7 }
 0xe9a   :  { %v6070_v10 = vpop.xlane.xlu1 %6069 }
 0xe9b   :  { %v6074_v12 = vmul.f32 0.03125, %v6070_v10  ;;  %v6077_v15 = vadd.f32 1e-05, %v6075_v9 }
 0xe9d   :  { %v6076_v14 = vadd.f32 1e-05, %v6074_v12 }
 0xe9f   :  { %14416 = vrsqrt.f32 %v6076_v14 }
 0xea0   :  { %14418 = vrsqrt.f32 %v6077_v15 }
 0xeac   :  { %v14417_v18 = vpop.eup %14416 }
 0xead   :  { %v6080_v24 = vmul.f32 %v14417_v18, %v6064_v58  ;;  %v14419_v27 = vpop.eup %14418 }
 0xeae   :  { %v6081_v35 = vmul.f32 %v14419_v27, %v6065_v54 }
 0xeaf   :  { %v6086_v32 = vmul.f32 %v6085_v25, %v6080_v24 }
 0xeb0   :  { %v6087_v28 = vmul.f32 %v6085_v25, %v6081_v35 }
 0xeb1   :  { %v15679_v36 = vadd.f32 %v6091_v30, %v6086_v32 }
 0xeb2   :  { %v15708_v45 = vadd.f32 %v6091_v30, %v6087_v28 }
 0xeb3   :  { %13769 = vmatmul.mubr.msk.f32.vlgmr.msra.gmra.mxu0 %vm131_vm1, %v15679_v36  ;;  %13813 = vmatmul.mubr.msk.f32.vlgmr.msra.gmra.mxu1 %vm131_vm1, %v15679_v36 }
 0xeb4   :  { %13772 = vmatpush3.msra.mxu0 %v12524_v0  ;;  %13827 = vmatpush3.msra.mxu1 %v15684_v34 }
 0xeb5   :  { %13773 = vmatprep.subr.mxu0 %v14532_v1  ;;  %13828 = vmatprep.subr.mxu1 %v14532_v1 }
 0xeb6   :  { %13774 = vmatpush3.msra.mxu0 %v12523_v8  ;;  %13829 = vmatpush3.msra.mxu1 %v12535_v56 }
 0xeb7   :  { %13775 = vmatprep.subr.mxu0 %v14532_v1  ;;  %13830 = vmatprep.subr.mxu1 %v14532_v1 }
 0xeb8   :  { %13776 = vmatpush3.msra.mxu0 %v12522_v3  ;;  %13831 = vmatpush3.msra.mxu1 %v12534_v22 }
 0xeb9   :  { %13777 = vmatprep.subr.mxu0 %v14532_v1  ;;  %13832 = vmatprep.subr.mxu1 %v14532_v1 }
 0xeba   :  { %13778 = vmatpush3.msra.mxu0 %v12521_v5  ;;  %13779 = vmatprep.mubr.msk.f32.mxu0 %vm14533_vm0, %v14532_v1 }
 0xebb   :  { %13833 = vmatpush3.msra.mxu1 %v12533_v42  ;;  %13834 = vmatprep.mubr.msk.f32.mxu1 %vm14533_vm0, %v14532_v1 }
 0xebc   :  { %13780 = vmatmul.mubr.msk.f32.vlgmr.msra.gmra.mxu0 %vm131_vm1, %v15708_v45  ;;  %13782 = vmatprep.subr.mxu0 %v14532_v1 }
 0xebd   :  { %13835 = vmatmul.mubr.msk.f32.vlgmr.msra.gmra.mxu1 %vm131_vm1, %v15679_v36  ;;  %13783 = vmatpush3.msra.mxu0 %v12528_v39 }
 0xebe   :  { %13784 = vmatprep.subr.mxu0 %v14532_v1  ;;  %13790 = vmatprep.mubr.msk.f32.mxu0 %vm14533_vm0, %v14532_v1 }
 0xebf   :  { %13785 = vmatpush3.msra.mxu0 %v12527_v40  ;;  %13848 = vmatprep.subr.mxu1 %v14532_v1 }
 0xec0   :  { %13786 = vmatprep.subr.mxu0 %v14532_v1  ;;  %13850 = vmatprep.mubr.msk.f32.mxu1 %vm14533_vm0, %v14532_v1 }
 0xec1   :  { %13787 = vmatpush3.msra.mxu0 %v12526_v16 }
 0xec2   :  { %13788 = vmatprep.subr.mxu0 %v14532_v1 }
 0xec3   :  { %13789 = vmatpush3.msra.mxu0 %v12525_v41 }
 0xec4   :  { %13791 = vmatmul.mubr.msk.f32.vlgmr.msra.gmra.mxu0 %vm131_vm1, %v15679_v36  ;;  %13793 = vmatprep.subr.mxu0 %v14532_v1 }
 0xec5   :  { %13794 = vmatpush3.msra.mxu0 %v12528_v39  ;;  %13801 = vmatprep.mubr.msk.f32.mxu0 %vm14533_vm0, %v14532_v1 }
 0xec6   :  { %13795 = vmatprep.subr.mxu0 %v14532_v1 }
 0xec7   :  { %13796 = vmatpush3.msra.mxu0 %v12527_v40 }
 0xec8   :  { %13797 = vmatprep.subr.mxu0 %v14532_v1 }
 0xec9   :  { %13798 = vmatpush3.msra.mxu0 %v12526_v16 }
 0xeca   :  { %13799 = vmatprep.subr.mxu0 %v14532_v1 }
 0xecb   :  { %13800 = vmatpush3.msra.mxu0 %v12525_v41 }
 0xecc   :  { %13802 = vmatmul.mubr.msk.f32.vlgmr.msra.gmra.mxu0 %vm131_vm1, %v15708_v45  ;;  %13815 = vmatprep.subr.mxu0 %v14532_v1 }
 0xecd   :  { %13816 = vmatpush3.msra.mxu0 %v15634_v11  ;;  %13823 = vmatprep.mubr.msk.f32.mxu0 %vm14533_vm0, %v14532_v1 }
 0xece   :  { %13817 = vmatprep.subr.mxu0 %v14532_v1 }
 0xecf   :  { %13818 = vmatpush3.msra.mxu0 %v15643_v2 }
 0xed0   :  { %13819 = vmatprep.subr.mxu0 %v14532_v1 }
 0xed1   :  { %13820 = vmatpush3.msra.mxu0 %v15653_v4 }
 0xed2   :  { %13821 = vmatprep.subr.mxu0 %v14532_v1 }
 0xed3   :  { %13822 = vmatpush3.msra.mxu0 %v15664_v6 }
 0xed4   :  { %13824 = vmatmul.mubr.msk.f32.vlgmr.msra.gmra.mxu0 %vm131_vm1, %v15708_v45  ;;  %13837 = vmatprep.subr.mxu0 %v14532_v1 }
 0xed5   :  { %13838 = vmatpush3.msra.mxu0 %v15684_v34  ;;  %13845 = vmatprep.mubr.msk.f32.mxu0 %vm14533_vm0, %v14532_v1 }
 0xed6   :  { %13839 = vmatprep.subr.mxu0 %v14532_v1 }
 0xed7   :  { %13840 = vmatpush3.msra.mxu0 %v12535_v56 }
 0xed8   :  { %13841 = vmatprep.subr.mxu0 %v14532_v1 }
 0xed9   :  { %13842 = vmatpush3.msra.mxu0 %v12534_v22 }
 0xeda   :  { %13843 = vmatprep.subr.mxu0 %v14532_v1 }
 0xedb   :  { %13844 = vmatpush3.msra.mxu0 %v12533_v42 }
 0xedc   :  { %13846 = vmatmul.mubr.msk.f32.vlgmr.msra.gmra.mxu0 %vm131_vm1, %v15708_v45  ;;  %13858 = vmatprep.subr.mxu0 %v14532_v1 }
 0xedd   :  { %13860 = vmatprep.mubr.msk.f32.mxu0 %vm14533_vm0, %v14532_v1 }
 0xf73   :  { %v6213_v31 = vpop.f32.mrf.mxu0  ;;  %v6496_v46 = vpop.f32.mrf.mxu1 }
 0xf74   :  { %v15774_v37 = vadd.f32 %v12541_v44, %v6213_v31  ;;  %v15785_v51 = vadd.f32 %v12543_v43, %v6496_v46 }
 0xf75   :  { %v13770_v47 = vpop.f32.mrf.mxu0  ;;  %v13814_v20 = vpop.f32.mrf.mxu1 }
 0xf76   :  { %6718 = vrot.lane.b32.xlu1 %v15774_v37, %s16693_s6 }
 0xf7c   :  { %v6286_v21 = vpop.f32.mrf.mxu0 }
 0xf7d   :  { %v15778_v49 = vadd.f32 %v12541_v44, %v6286_v21  ;;  %v6636_v48 = vpop.f32.mrf.mxu1 }
 0xf7e   :  { %v13781_v50 = vpop.f32.mrf.mxu0  ;;  %v15795_v53 = vadd.f32 %v12544_v52, %v6636_v48 }
 0xf7f   :  { %v13836_v26 = vpop.f32.mrf.mxu1  ;;  %6795 = vrot.lane.b32.xlu0 %v15778_v49, %s16693_s6 }
 0xf83   :  { %7026 = vrot.lane.b32.xlu0 %v15785_v51, %s16693_s6 }
 0xf84   :  { %v6356_v33 = vpop.f32.mrf.mxu0 }
 0xf85   :  { %v15797_v23 = vadd.f32 %v12542_v38, %v6356_v33 }
 0xf86   :  { %v13792_v29 = vpop.f32.mrf.mxu0 }
 0xf87   :  { %7180 = vrot.lane.b32.xlu0 %v15795_v53, %s16693_s6  ;;  %6872 = vrot.lane.b32.xlu1 %v15797_v23, %s16693_s6 }
 0xf8c   :  { %v6426_v54 = vpop.f32.mrf.mxu0 }
 0xf8d   :  { %v15803_v55 = vadd.f32 %v12542_v38, %v6426_v54 }
 0xf8e   :  { %v13803_v58 = vpop.f32.mrf.mxu0 }
 0xf8f   :  { %6949 = vrot.lane.b32.xlu1 %v15803_v55, %s16693_s6 }
 0xf94   :  { %v6566_v60 = vpop.f32.mrf.mxu0 }
 0xf95   :  { %v15807_v61 = vadd.f32 %v12543_v43, %v6566_v60 }
 0xf96   :  { %v13825_v62 = vpop.f32.mrf.mxu0 }
 0xf97   :  { %7103 = vrot.lane.b32.xlu1 %v15807_v61, %s16693_s6 }
 0xf9c   :  { %v6706_v63 = vpop.f32.mrf.mxu0 }
 0xf9d   :  { %v15811_v0 = vadd.f32 %v12544_v52, %v6706_v63 }
 0xf9e   :  { %v13847_v11 = vpop.f32.mrf.mxu0 }
 0xf9f   :  { %7257 = vrot.lane.b32.xlu1 %v15811_v0, %s16693_s6 }
 0xfe8   :  { %v6719_v8 = vpop.permute.xlu1 %6718 }
 0xfe9   :  { %13849 = vmatpush3.xpose.msk.msra.mxu1 %vm706_vm2, %v6719_v8 }
 0xfea   :  { %13853 = vmatprep.subr.mxu1 %v14532_v1 }
 0xfec   :  { %13851 = vmatmul.mubr.msk.f32.vlgmr.msra.gmra.mxu1 %vm706_vm2, %v15774_v37 }
 0xfed   :  { %13855 = vmatprep.mubr.msk.f32.mxu1 %vm14533_vm0, %v14532_v1 }
 0xff1   :  { %v6796_v2 = vpop.permute.xlu0 %6795 }
 0xff2   :  { %13854 = vmatpush3.xpose.msk.msra.mxu1 %vm706_vm2, %v6796_v2 }
 0xff3   :  { %13863 = vmatprep.subr.mxu1 %v14532_v1 }
 0xff5   :  { %13856 = vmatmul.mubr.msk.f32.vlgmr.msra.gmra.mxu1 %vm706_vm2, %v15778_v49  ;;  %v7027_v4 = vpop.permute.xlu0 %7026 }
 0xff6   :  { %13865 = vmatprep.mubr.msk.f32.mxu1 %vm14533_vm0, %v14532_v1 }
 0xff9   :  { %v6873_v3 = vpop.permute.xlu1 %6872  ;;  %v7181_v5 = vpop.permute.xlu0 %7180 }
 0xffa   :  { %13859 = vmatpush3.xpose.msk.msra.mxu0 %vm706_vm2, %v6873_v3 }
 0xffb   :  { %13868 = vmatprep.subr.mxu0 %v14532_v1 }
 0xffd   :  { %13861 = vmatmul.mubr.msk.f32.vlgmr.msra.gmra.mxu0 %vm706_vm2, %v15797_v23 }
 0xffe   :  { %13869 = vmatpush3.xpose.msk.msra.mxu0 %vm706_vm2, %v7027_v4  ;;  %13870 = vmatprep.mubr.msk.f32.mxu0 %vm14533_vm0, %v14532_v1 }
 0xfff   :  { %13878 = vmatprep.subr.mxu0 %v14532_v1 }
0x1001   :  { %13871 = vmatmul.mubr.msk.f32.vlgmr.msra.gmra.mxu0 %vm706_vm2, %v15785_v51  ;;  %v6950_v6 = vpop.permute.xlu1 %6949 }
0x1002   :  { %13864 = vmatpush3.xpose.msk.msra.mxu1 %vm706_vm2, %v6950_v6  ;;  %13879 = vmatpush3.xpose.msk.msra.mxu0 %vm706_vm2, %v7181_v5 }
0x1003   :  { %13880 = vmatprep.mubr.msk.f32.mxu0 %vm14533_vm0, %v14532_v1  ;;  %13873 = vmatprep.subr.mxu1 %v14532_v1 }
0x1004   :  { %13888 = vmatprep.subr.mxu0 %v14532_v1 }
0x1005   :  { %13866 = vmatmul.mubr.msk.f32.vlgmr.msra.gmra.mxu1 %vm706_vm2, %v15803_v55  ;;  %13881 = vmatmul.mubr.msk.f32.vlgmr.msra.gmra.mxu0 %vm706_vm2, %v15795_v53 }
0x1006   :  { %13875 = vmatprep.mubr.msk.f32.mxu1 %vm14533_vm0, %v14532_v1  ;;  %13890 = vmatprep.mubr.msk.f32.mxu0 %vm14533_vm0, %v14532_v1 }
0x1009   :  { %v7104_v7 = vpop.permute.xlu1 %7103 }
0x100a   :  { %13874 = vmatpush3.xpose.msk.msra.mxu1 %vm706_vm2, %v7104_v7 }
0x100b   :  { %13883 = vmatprep.subr.mxu1 %v14532_v1 }
0x100d   :  { %13876 = vmatmul.mubr.msk.f32.vlgmr.msra.gmra.mxu1 %vm706_vm2, %v15807_v61 }
0x100e   :  { %13885 = vmatprep.mubr.msk.f32.mxu1 %vm14533_vm0, %v14532_v1 }
0x1011   :  { %v7258_v9 = vpop.permute.xlu1 %7257 }
0x1012   :  { %13884 = vmatpush3.xpose.msk.msra.mxu1 %vm706_vm2, %v7258_v9 }
0x1013   :  { %13893 = vmatprep.subr.mxu1 %v14532_v1 }
0x1015   :  { %13886 = vmatmul.mubr.msk.f32.vlgmr.msra.gmra.mxu1 %vm706_vm2, %v15811_v0 }
0x1016   :  { %13895 = vmatprep.mubr.msk.f32.mxu1 %vm14533_vm0, %v14532_v1 }
0x10ac   :  { %v6790_v10 = vpop.f32.mrf.mxu1 }
0x10ad   :  { %v7333_v12 = vmul.f32 0.35355338, %v6790_v10 }
0x10ae   :  { %v13852_v14 = vpop.f32.mrf.mxu1 }
0x10af   :  { %v7341_v15 = vadd.f32 %v7333_v12, %v14890_v59 }
0x10b1   :  { %v7349_v18 = vsel %vm706_vm2, %v7341_v15, -inf }
0x10b2   :  { %7350 = vmax.xlane.f32.xlu0 %v7349_v18 }
0x10b5   :  { %v6867_v24 = vpop.f32.mrf.mxu1 }
0x10b6   :  { %v7334_v25 = vmul.f32 0.35355338, %v6867_v24 }
0x10b7   :  { %v13857_v27 = vpop.f32.mrf.mxu1 }
0x10b8   :  { %v7342_v32 = vadd.f32 %v7334_v25, %v14890_v59 }
0x10ba   :  { %v7352_v30 = vsel %vm706_vm2, %v7342_v32, -inf }
0x10bb   :  { %7353 = vmax.xlane.f32.xlu1 %v7352_v30 }
0x10bd   :  { %v6944_v34 = vpop.f32.mrf.mxu0 }
0x10be   :  { %v7335_v35 = vmul.f32 0.35355338, %v6944_v34 }
0x10bf   :  { %v13862_v56 = vpop.f32.mrf.mxu0 }
0x10c0   :  { %v7343_v22 = vadd.f32 %v7335_v35, %v14890_v59 }
0x10c1   :  { %v7098_v28 = vpop.f32.mrf.mxu0 }
0x10c2   :  { %v7337_v42 = vmul.f32 0.35355338, %v7098_v28  ;;  %v7355_v39 = vsel %vm706_vm2, %v7343_v22, -inf }
0x10c3   :  { %7356 = vmax.xlane.f32.xlu0 %v7355_v39  ;;  %v13872_v40 = vpop.f32.mrf.mxu0 }
0x10c4   :  { %v7345_v16 = vadd.f32 %v7337_v42, %v14890_v59 }
0x10c5   :  { %v7021_v41 = vpop.f32.mrf.mxu1  ;;  %v7252_v44 = vpop.f32.mrf.mxu0 }
0x10c6   :  { %v7336_v31 = vmul.f32 0.35355338, %v7021_v41  ;;  %v7339_v46 = vmul.f32 0.35355338, %v7252_v44  ;;  %v7361_v47 = vsel %vm706_vm2, %v7345_v16, -inf }
0x10c7   :  { %v13867_v20 = vpop.f32.mrf.mxu1  ;;  %7362 = vmax.xlane.f32.xlu1 %v7361_v47  ;;  %v13882_v21 = vpop.f32.mrf.mxu0 }
0x10c8   :  { %v7344_v48 = vadd.f32 %v7336_v31, %v14890_v59  ;;  %v7347_v43 = vadd.f32 %v7339_v46, %v14890_v59 }
0x10ca   :  { %v7358_v50 = vsel %vm706_vm2, %v7344_v48, -inf  ;;  %v7367_v26 = vsel %vm706_vm2, %v7347_v43, -inf }
0x10cb   :  { %7359 = vmax.xlane.f32.xlu0 %v7358_v50  ;;  %7368 = vmax.xlane.f32.xlu1 %v7367_v26 }
0x10cd   :  { %v7175_v52 = vpop.f32.mrf.mxu1 }
0x10ce   :  { %v7338_v38 = vmul.f32 0.35355338, %v7175_v52 }
0x10cf   :  { %v13877_v33 = vpop.f32.mrf.mxu1 }
0x10d0   :  { %v7346_v29 = vadd.f32 %v7338_v38, %v14890_v59 }
0x10d2   :  { %v7364_v54 = vsel %vm706_vm2, %v7346_v29, -inf }
0x10d3   :  { %7365 = vmax.xlane.f32.xlu0 %v7364_v54 }
0x10d5   :  { %v7329_v58 = vpop.f32.mrf.mxu1 }
0x10d6   :  { %v7340_v60 = vmul.f32 0.35355338, %v7329_v58 }
0x10d7   :  { %v13887_v62 = vpop.f32.mrf.mxu1 }
0x10d8   :  { %v7348_v63 = vadd.f32 %v7340_v60, %v14890_v59 }
0x10da   :  { %v7370_v11 = vsel %vm706_vm2, %v7348_v63, -inf }
0x10db   :  { %7371 = vmax.xlane.f32.xlu0 %v7370_v11 }
0x10dc   :  { %7437 = vrot.lane.b32.xlu1 %v15774_v37, %s16694_s29 }
0x10e0   :  { %7589 = vrot.lane.b32.xlu1 %v15797_v23, %s16694_s29 }
0x10e4   :  { %7665 = vrot.lane.b32.xlu1 %v15803_v55, %s16694_s29 }
0x10e8   :  { %7817 = vrot.lane.b32.xlu1 %v15807_v61, %s16694_s29 }
0x10f1   :  { %7513 = vrot.lane.b32.xlu0 %v15778_v49, %s16694_s29 }
0x10f5   :  { %7741 = vrot.lane.b32.xlu0 %v15785_v51, %s16694_s29 }
0x113b   :  { %v7351_v59 = vpop.xlane.xlu0 %7350 }
0x113c   :  { %v7373_v8 = vsub.f32 %v7341_v15, %v7351_v59 }
0x113e   :  { %v7381_v2 = vmul.f32 1.442695, %v7373_v8 }
0x1140   :  { %14420 = vpow2.f32 %v7381_v2 }
0x1144   :  { %v7354_v37 = vpop.xlane.xlu1 %7353 }
0x1145   :  { %v7374_v3 = vsub.f32 %v7342_v32, %v7354_v37 }
0x1147   :  { %v7383_v4 = vmul.f32 1.442695, %v7374_v3 }
0x1149   :  { %14422 = vpow2.f32 %v7383_v4 }
0x114c   :  { %v7357_v23 = vpop.xlane.xlu0 %7356 }
0x114d   :  { %v15891_v5 = vpop.eup %14420  ;;  %v7375_v55 = vsub.f32 %v7343_v22, %v7357_v23 }
0x114e   :  { %v7397_v61 = vsel %vm706_vm2, %v15891_v5, 0.0 }
0x114f   :  { %v7385_v6 = vmul.f32 1.442695, %v7375_v55  ;;  %7398 = vadd.xlane.f32.xlu1 %v7397_v61 }
0x1150   :  { %v7363_v49 = vpop.xlane.xlu1 %7362 }
0x1151   :  { %14424 = vpow2.f32 %v7385_v6  ;;  %v7377_v51 = vsub.f32 %v7345_v16, %v7363_v49 }
0x1153   :  { %v7389_v7 = vmul.f32 1.442695, %v7377_v51 }
0x1154   :  { %v7360_v9 = vpop.xlane.xlu0 %7359  ;;  %v7369_v10 = vpop.xlane.xlu1 %7368 }
0x1155   :  { %14426 = vpow2.f32 %v7389_v7  ;;  %v7376_v12 = vsub.f32 %v7344_v48, %v7360_v9  ;;  %v7379_v14 = vsub.f32 %v7347_v43, %v7369_v10  ;;  %v12553_v10 = vld [vmem:[%s16688_s27 + $0x20] sm:$0xff] }
0x1156   :  { %v14423_v15 = vpop.eup %14422 }
0x1157   :  { %v7387_v18 = vmul.f32 1.442695, %v7376_v12  ;;  %v7393_v24 = vmul.f32 1.442695, %v7379_v14  ;;  %v7400_v25 = vsel %vm706_vm2, %v14423_v15, 0.0  ;;  %v12554_v12 = vld [vmem:[%s16688_s27 + $0x28] sm:$0xff] }
0x1158   :  { %7401 = vadd.xlane.f32.xlu0 %v7400_v25  ;;  %v7438_v27 = vpop.permute.xlu1 %7437  ;;  %v12555_v25 = vld [vmem:[%s16688_s27 + $0x30] sm:$0xff] }
0x1159   :  { %14428 = vpow2.f32 %v7387_v18  ;;  %13889 = vmatpush3.msra.mxu0 %v7438_v27 }
0x115a   :  { %14430 = vpow2.f32 %v7393_v24  ;;  %13898 = vmatprep.subr.mxu0 %v14532_v1 }
0x115c   :  { %v7366_v32 = vpop.xlane.xlu0 %7365  ;;  %v7590_v43 = vpop.permute.xlu1 %7589 }
0x115d   :  { %v7378_v30 = vsub.f32 %v7346_v29, %v7366_v32 }
0x115e   :  { %v14425_v34 = vpop.eup %14424 }
0x115f   :  { %v7391_v35 = vmul.f32 1.442695, %v7378_v30  ;;  %v7403_v56 = vsel %vm706_vm2, %v14425_v34, 0.0  ;;  %v12556_v30 = vld [vmem:[%s16688_s27 + $0x38] sm:$0xff] }
0x1160   :  { %7404 = vadd.xlane.f32.xlu1 %v7403_v56  ;;  %v7666_v50 = vpop.permute.xlu1 %7665 }
0x1161   :  { %14432 = vpow2.f32 %v7391_v35 }
0x1162   :  { %v14427_v22 = vpop.eup %14426 }
0x1163   :  { %v7409_v28 = vsel %vm706_vm2, %v14427_v22, 0.0 }
0x1164   :  { %v7372_v42 = vpop.xlane.xlu0 %7371  ;;  %7410 = vadd.xlane.f32.xlu1 %v7409_v28  ;;  %v7818_v26 = vpop.permute.xlu1 %7817 }
0x1165   :  { %v7380_v39 = vsub.f32 %v7348_v63, %v7372_v42 }
0x1166   :  { %v14429_v40 = vpop.eup %14428 }
0x1167   :  { %v15899_v16 = vpop.eup %14430  ;;  %v7395_v41 = vmul.f32 1.442695, %v7380_v39  ;;  %v7406_v44 = vsel %vm706_vm2, %v14429_v40, 0.0 }
0x1168   :  { %7407 = vadd.xlane.f32.xlu0 %v7406_v44  ;;  %v7514_v31 = vpop.permute.xlu0 %7513  ;;  %v7415_v46 = vsel %vm706_vm2, %v15899_v16, 0.0 }
0x1169   :  { %14434 = vpow2.f32 %v7395_v41  ;;  %7416 = vadd.xlane.f32.xlu1 %v7415_v46  ;;  %13894 = vmatpush3.msra.mxu1 %v7514_v31 }
0x116a   :  { %13903 = vmatprep.subr.mxu1 %v14532_v1 }
0x116c   :  { %v7742_v38 = vpop.permute.xlu0 %7741 }
0x116e   :  { %v15905_v47 = vpop.eup %14432 }
0x116f   :  { %v7412_v20 = vsel %vm706_vm2, %v15905_v47, 0.0 }
0x1170   :  { %7413 = vadd.xlane.f32.xlu0 %v7412_v20 }
0x1176   :  { %v15909_v21 = vpop.eup %14434 }
0x1177   :  { %v7418_v48 = vsel %vm706_vm2, %v15909_v21, 0.0 }
0x1178   :  { %7419 = vadd.xlane.f32.xlu0 %v7418_v48 }
0x117a   :  { %7969 = vrot.lane.b32.xlu1 %v15811_v0, %s16694_s29 }
0x118e   :  { %7893 = vrot.lane.b32.xlu0 %v15795_v53, %s16694_s29 }
0x11d8   :  { %v7399_v52 = vpop.xlane.xlu1 %7398 }
0x11d9   :  { %14436 = vrcp.f32 %v7399_v52 }
0x11e1   :  { %v7402_v33 = vpop.xlane.xlu0 %7401 }
0x11e2   :  { %14438 = vrcp.f32 %v7402_v33 }
0x11e6   :  { %v14437_v29 = vpop.eup %14436 }
0x11e7   :  { %v7429_v54 = vmul.f32 %v14437_v29, %v15891_v5 }
0x11e9   :  { %v7405_v58 = vpop.xlane.xlu1 %7404  ;;  %13891 = vmatmul.mubr.msk.f32.vlgmr.msra.gmra.mxu0 %vm706_vm2, %v7429_v54 }
0x11ea   :  { %14440 = vrcp.f32 %v7405_v58  ;;  %13899 = vmatpush3.msra.mxu0 %v7590_v43  ;;  %13900 = vmatprep.mubr.msk.f32.mxu0 %vm14533_vm0, %v14532_v1 }
0x11eb   :  { %13908 = vmatprep.subr.mxu0 %v14532_v1 }
0x11ed   :  { %v7411_v53 = vpop.xlane.xlu1 %7410 }
0x11ee   :  { %14442 = vrcp.f32 %v7411_v53  ;;  %v12590_v53 = vld [vmem:[%s16689_s2 + $0x1] ss:$0 sm:$0xff] }
0x11ef   :  { %v14439_v0 = vpop.eup %14438 }
0x11f0   :  { %v7430_v60 = vmul.f32 %v14439_v0, %v14423_v15 }
0x11f1   :  { %v7408_v62 = vpop.xlane.xlu0 %7407 }
0x11f2   :  { %14444 = vrcp.f32 %v7408_v62  ;;  %v7417_v63 = vpop.xlane.xlu1 %7416  ;;  %13896 = vmatmul.mubr.msk.f32.vlgmr.msra.gmra.mxu1 %vm706_vm2, %v7430_v60 }
0x11f3   :  { %13904 = vmatpush3.msra.mxu1 %v7666_v50  ;;  %13905 = vmatprep.mubr.msk.f32.mxu1 %vm14533_vm0, %v14532_v1  ;;  %14446 = vrcp.f32 %v7417_v63 }
0x11f4   :  { %13913 = vmatprep.subr.mxu1 %v14532_v1 }
0x11f6   :  { %v7970_v51 = vpop.permute.xlu1 %7969 }
0x11f7   :  { %v14441_v11 = vpop.eup %14440 }
0x11f8   :  { %v7431_v59 = vmul.f32 %v14441_v11, %v14425_v34 }
0x11f9   :  { %v7414_v8 = vpop.xlane.xlu0 %7413 }
0x11fa   :  { %14448 = vrcp.f32 %v7414_v8  ;;  %13901 = vmatmul.mubr.msk.f32.vlgmr.msra.gmra.mxu0 %vm706_vm2, %v7431_v59 }
0x11fb   :  { %v14443_v2 = vpop.eup %14442  ;;  %13909 = vmatpush3.msra.mxu0 %v7742_v38  ;;  %13910 = vmatprep.mubr.msk.f32.mxu0 %vm14533_vm0, %v14532_v1 }
0x11fc   :  { %v7433_v37 = vmul.f32 %v14443_v2, %v14427_v22  ;;  %13918 = vmatprep.subr.mxu0 %v14532_v1 }
0x11fe   :  { %13911 = vmatmul.mubr.msk.f32.vlgmr.msra.gmra.mxu0 %vm706_vm2, %v7433_v37 }
0x11ff   :  { %v14445_v3 = vpop.eup %14444  ;;  %13920 = vmatprep.mubr.msk.f32.mxu0 %vm14533_vm0, %v14532_v1 }
0x1200   :  { %v7432_v4 = vmul.f32 %v14445_v3, %v14429_v40  ;;  %v14447_v5 = vpop.eup %14446 }
0x1201   :  { %v7420_v23 = vpop.xlane.xlu0 %7419  ;;  %v7435_v61 = vmul.f32 %v14447_v5, %v15899_v16 }
0x1202   :  { %14450 = vrcp.f32 %v7420_v23  ;;  %13906 = vmatmul.mubr.msk.f32.vlgmr.msra.gmra.mxu1 %vm706_vm2, %v7432_v4 }
0x1203   :  { %13914 = vmatpush3.msra.mxu1 %v7818_v26  ;;  %13915 = vmatprep.mubr.msk.f32.mxu1 %vm14533_vm0, %v14532_v1 }
0x1204   :  { %13923 = vmatprep.subr.mxu1 %v14532_v1 }
0x1205   :  { %v7894_v55 = vpop.permute.xlu0 %7893 }
0x1206   :  { %13919 = vmatpush3.msra.mxu0 %v7894_v55 }
0x1207   :  { %v14449_v6 = vpop.eup %14448  ;;  %13921 = vmatmul.mubr.msk.f32.vlgmr.msra.gmra.mxu0 %vm706_vm2, %v7435_v61  ;;  %13928 = vmatprep.subr.mxu0 %v14532_v1 }
0x1208   :  { %v7434_v49 = vmul.f32 %v14449_v6, %v15905_v47  ;;  %13930 = vmatprep.mubr.msk.f32.mxu0 %vm14533_vm0, %v14532_v1  ;;  %13929 = vmatpush3.msra.mxu0 %v12553_v10 }
0x1209   :  { %13938 = vmatprep.subr.mxu0 %v14532_v1 }
0x120a   :  { %13916 = vmatmul.mubr.msk.f32.vlgmr.msra.gmra.mxu1 %vm706_vm2, %v7434_v49 }
0x120b   :  { %13924 = vmatpush3.msra.mxu1 %v7970_v51  ;;  %13925 = vmatprep.mubr.msk.f32.mxu1 %vm14533_vm0, %v14532_v1 }
0x120c   :  { %13933 = vmatprep.subr.mxu1 %v14532_v1 }
0x120f   :  { %v14451_v7 = vpop.eup %14450 }
0x1210   :  { %v7436_v9 = vmul.f32 %v14451_v7, %v15909_v21 }
0x1212   :  { %13926 = vmatmul.mubr.msk.f32.vlgmr.msra.gmra.mxu1 %vm706_vm2, %v7436_v9 }
0x1213   :  { %13935 = vmatprep.mubr.msk.f32.mxu1 %vm14533_vm0, %v14532_v1  ;;  %13934 = vmatpush3.msra.mxu1 %v12553_v10 }
0x1214   :  { %13943 = vmatprep.subr.mxu1 %v14532_v1 }
0x12a9   :  { %v7509_v14 = vpop.f32.mrf.mxu0 }
0x12aa   :  { %13931 = vmatmul.mubr.msk.f32.vlgmr.msra.gmra.mxu0 %vm706_vm2, %v7509_v14 }
0x12ab   :  { %v13892_v15 = vpop.f32.mrf.mxu0  ;;  %13939 = vmatpush3.msra.mxu0 %v12554_v12  ;;  %13940 = vmatprep.mubr.msk.f32.mxu0 %vm14533_vm0, %v14532_v1 }
0x12ac   :  { %13948 = vmatprep.subr.mxu0 %v14532_v1 }
0x12b2   :  { %v7585_v18 = vpop.f32.mrf.mxu1 }
0x12b3   :  { %13936 = vmatmul.mubr.msk.f32.vlgmr.msra.gmra.mxu1 %vm706_vm2, %v7585_v18 }
0x12b4   :  { %v13897_v24 = vpop.f32.mrf.mxu1  ;;  %13944 = vmatpush3.msra.mxu1 %v12554_v12  ;;  %13945 = vmatprep.mubr.msk.f32.mxu1 %vm14533_vm0, %v14532_v1 }
0x12b5   :  { %13953 = vmatprep.subr.mxu1 %v14532_v1 }
0x12ba   :  { %v7661_v27 = vpop.f32.mrf.mxu0 }
0x12bb   :  { %13941 = vmatmul.mubr.msk.f32.vlgmr.msra.gmra.mxu0 %vm706_vm2, %v7661_v27 }
0x12bc   :  { %v13902_v32 = vpop.f32.mrf.mxu0  ;;  %13949 = vmatpush3.msra.mxu0 %v12555_v25  ;;  %13950 = vmatprep.mubr.msk.f32.mxu0 %vm14533_vm0, %v14532_v1 }
0x12bd   :  { %13958 = vmatprep.subr.mxu0 %v14532_v1 }
0x12be   :  { %v7813_v34 = vpop.f32.mrf.mxu0 }
0x12bf   :  { %13951 = vmatmul.mubr.msk.f32.vlgmr.msra.gmra.mxu0 %vm706_vm2, %v7813_v34  ;;  %v12592_v34 = vld [vmem:[%s16690_s28 + $0x88] sm:$0xff] }
0x12c0   :  { %v13912_v35 = vpop.f32.mrf.mxu0  ;;  %13959 = vmatpush3.msra.mxu0 %v12556_v30  ;;  %13960 = vmatprep.mubr.msk.f32.mxu0 %vm14533_vm0, %v14532_v1 }
0x12c1   :  { %13968 = vmatprep.subr.mxu0 %v14532_v1  ;;  %v12591_v35 = vld [vmem:[%s16690_s28 + $0x80] sm:$0xff] }
0x12c2   :  { %v7737_v56 = vpop.f32.mrf.mxu1 }
0x12c3   :  { %13946 = vmatmul.mubr.msk.f32.vlgmr.msra.gmra.mxu1 %vm706_vm2, %v7737_v56 }
0x12c4   :  { %v13907_v22 = vpop.f32.mrf.mxu1  ;;  %13954 = vmatpush3.msra.mxu1 %v12555_v25  ;;  %13955 = vmatprep.mubr.msk.f32.mxu1 %vm14533_vm0, %v14532_v1 }
0x12c5   :  { %13963 = vmatprep.subr.mxu1 %v14532_v1 }
0x12c7   :  { %v7965_v28 = vpop.f32.mrf.mxu0 }
0x12c8   :  { %13961 = vmatmul.mubr.msk.f32.vlgmr.msra.gmra.mxu0 %vm706_vm2, %v7965_v28 }
0x12c9   :  { %v13922_v42 = vpop.f32.mrf.mxu0  ;;  %13976 = vmatprep.mubr.msk.f32.mxu0 %vm14533_vm0, %v14532_v1 }
0x12ca   :  { %v7889_v39 = vpop.f32.mrf.mxu1 }
0x12cb   :  { %13956 = vmatmul.mubr.msk.f32.vlgmr.msra.gmra.mxu1 %vm706_vm2, %v7889_v39 }
0x12cc   :  { %v13917_v40 = vpop.f32.mrf.mxu1  ;;  %13964 = vmatpush3.msra.mxu1 %v12556_v30  ;;  %13965 = vmatprep.mubr.msk.f32.mxu1 %vm14533_vm0, %v14532_v1  ;;  %v12593_v30 = vld [vmem:[%s16690_s28 + $0x90] sm:$0xff] }
0x12cd   :  { %13979 = vmatprep.subr.mxu1 %v14532_v1 }
0x12d2   :  { %v8041_v16 = vpop.f32.mrf.mxu1 }
0x12d3   :  { %13966 = vmatmul.mubr.msk.f32.vlgmr.msra.gmra.mxu1 %vm706_vm2, %v8041_v16  ;;  %v12519_v16 = vld [vmem:[%s16657_s16 + $0x4] sm:$0x7] }
0x12d4   :  { %v13927_v41 = vpop.f32.mrf.mxu1  ;;  %13987 = vmatprep.mubr.msk.f32.mxu1 %vm14533_vm0, %v14532_v1 }
0x12d5   :  { %v12520_v41 = vld [vmem:[%s16658_s17 + $0x4] sm:$0x7] }
0x136a   :  { %v8114_v44 = vpop.f32.mrf.mxu0 }
0x136b   :  { %v8629_v52 = vsel %vm131_vm1, %v8114_v44, 0.0  ;;  %v8682_v44 = vrot.slane %v12519_v16, %v15058_v13 }
0x136c   :  { %v13932_v31 = vpop.f32.mrf.mxu0 }
0x1373   :  { %v8187_v46 = vpop.f32.mrf.mxu1 }
0x1374   :  { %v8636_v37 = vsel %vm131_vm1, %v8187_v46, 0.0 }
0x1375   :  { %v13937_v47 = vpop.f32.mrf.mxu1 }
0x1376   :  { %v8688_v47 = vrot.slane %v12520_v41, %v15058_v13  ;;  %v12596_v13 = vld [vmem:[%s16690_s28 + $0xa8] sm:$0xff] }
0x137b   :  { %v8260_v20 = vpop.f32.mrf.mxu0 }
0x137c   :  { %v8630_v50 = vsel %vm131_vm1, %v8260_v20, 0.0 }
0x137d   :  { %v13942_v21 = vpop.f32.mrf.mxu0  ;;  %v8631_v29 = vadd.f32 %v8630_v50, %v8629_v52 }
0x137f   :  { %v8406_v48 = vpop.f32.mrf.mxu0 }
0x1380   :  { %v8632_v38 = vsel %vm131_vm1, %v8406_v48, 0.0  ;;  %v12598_v48 = vld [vmem:[%s16690_s28 + $0xb8] sm:$0xff] }
0x1381   :  { %v13952_v43 = vpop.f32.mrf.mxu0  ;;  %v8633_v54 = vadd.f32 %v8632_v38, %v8631_v29  ;;  %v12602_v38 = vld [vmem:[%s16690_s28 + $0xd8] sm:$0xff]  ;;  %v12601_v29 = vld [vmem:[%s16690_s28 + $0xd0] sm:$0xff] }
0x1382   :  { %v12597_v43 = vld [vmem:[%s16690_s28 + $0xb0] sm:$0xff] }
0x1383   :  { %v8333_v26 = vpop.f32.mrf.mxu1 }
0x1384   :  { %v8637_v8 = vsel %vm131_vm1, %v8333_v26, 0.0  ;;  %v12595_v26 = vld [vmem:[%s16690_s28 + $0xa0] sm:$0xff] }
0x1385   :  { %v13947_v33 = vpop.f32.mrf.mxu1  ;;  %v8638_v23 = vadd.f32 %v8637_v8, %v8636_v37  ;;  %v12624_v8 = vld [vmem:[%s16649_s8 + $0x88] sm:$0xff]  ;;  %v12630_v37 = vld [vmem:[%s16649_s8 + $0xb8] sm:$0xff] }
0x1388   :  { %v8552_v58 = vpop.f32.mrf.mxu0 }
0x1389   :  { %v8634_v0 = vsel %vm131_vm1, %v8552_v58, 0.0  ;;  %v12600_v58 = vld [vmem:[%s16690_s28 + $0xc8] sm:$0xff] }
0x138a   :  { %v8635_v60 = vadd.f32 %v8634_v0, %v8633_v54  ;;  %v13962_v62 = vpop.f32.mrf.mxu0  ;;  %v12606_v0 = vld [vmem:[%s16690_s28 + $0xf8] sm:$0xff] }
0x138b   :  { %v8479_v63 = vpop.f32.mrf.mxu1  ;;  %v12604_v62 = vld [vmem:[%s16690_s28 + $0xe8] sm:$0xff] }
0x138c   :  { %v8649_v11 = vadd.f32 %v12590_v53, %v8635_v60  ;;  %v8639_v3 = vsel %vm131_vm1, %v8479_v63, 0.0  ;;  %v12605_v60 = vld [vmem:[%s16690_s28 + $0xf0] sm:$0xff]  ;;  %v12603_v63 = vld [vmem:[%s16690_s28 + $0xe0] sm:$0xff] }
0x138d   :  { %v13957_v59 = vpop.f32.mrf.mxu1  ;;  %v8640_v5 = vadd.f32 %v8639_v3, %v8638_v23  ;;  %v16149_v3 = vld [vmem:[%s16691_s5] sm:$0xff]  ;;  %v12628_v23 = vld [vmem:[%s16649_s8 + $0xa8] sm:$0xff] }
0x138e   :  { %v8651_v2 = vadd.f32 %v8649_v11, %v15679_v36  ;;  %v12626_v11 = vld [vmem:[%s16649_s8 + $0x98] sm:$0xff]  ;;  %v12625_v59 = vld [vmem:[%s16649_s8 + $0x90] sm:$0xff] }
0x1390   :  { %v8653_v4 = vsel %vm131_vm1, %v8651_v2, 0.0 }
0x1391   :  { %8654 = vadd.xlane.f32.xlu0 %v8653_v4  ;;  %v12629_v4 = vld [vmem:[%s16649_s8 + $0xb0] sm:$0xff] }
0x1393   :  { %v8625_v55 = vpop.f32.mrf.mxu1 }
0x1394   :  { %v8641_v61 = vsel %vm131_vm1, %v8625_v55, 0.0  ;;  %v12634_v55 = vld [vmem:[%s16649_s8 + $0xd8] sm:$0xff] }
0x1395   :  { %v8642_v6 = vadd.f32 %v8641_v61, %v8640_v5  ;;  %v13967_v49 = vpop.f32.mrf.mxu1  ;;  %v12627_v5 = vld [vmem:[%s16649_s8 + $0xa0] sm:$0xff]  ;;  %v12633_v61 = vld [vmem:[%s16649_s8 + $0xd0] sm:$0xff] }
0x1396   :  { %v12632_v49 = vld [vmem:[%s16649_s8 + $0xc8] sm:$0xff] }
0x1397   :  { %v8650_v51 = vadd.f32 %v12590_v53, %v8642_v6  ;;  %v12599_v53 = vld [vmem:[%s16690_s28 + $0xc0] sm:$0xff]  ;;  %v14515_v6 = vld [vmem:[%s16691_s5 + $0x8] sm:$0xff] }
0x1399   :  { %v8652_v7 = vadd.f32 %v8650_v51, %v15708_v45  ;;  %v12594_v45 = vld [vmem:[%s16690_s28 + $0x98] sm:$0xff]  ;;  %v12631_v51 = vld [vmem:[%s16649_s8 + $0xc0] sm:$0xff] }
0x139a   :  { %13969 = vmatpush3.msra.mxu0 %v12594_v45  ;;  %13980 = vmatpush3.msra.mxu1 %v12594_v45 }
0x139b   :  { %v8656_v9 = vsel %vm131_vm1, %v8652_v7, 0.0  ;;  %13970 = vmatprep.subr.mxu0 %v14532_v1  ;;  %13981 = vmatprep.subr.mxu1 %v14532_v1 }
0x139c   :  { %8657 = vadd.xlane.f32.xlu1 %v8656_v9  ;;  %13971 = vmatpush3.msra.mxu0 %v12593_v30  ;;  %v12637_v9 = vld [vmem:[%s16649_s8 + $0xf0] sm:$0xff] }
0x139d   :  { %13982 = vmatpush3.msra.mxu1 %v12593_v30  ;;  %13972 = vmatprep.subr.mxu0 %v14532_v1 }
0x139e   :  { %13983 = vmatprep.subr.mxu1 %v14532_v1  ;;  %13973 = vmatpush3.msra.mxu0 %v12592_v34 }
0x139f   :  { %13984 = vmatpush3.msra.mxu1 %v12592_v34  ;;  %13974 = vmatprep.subr.mxu0 %v14532_v1 }
0x13a0   :  { %13985 = vmatprep.subr.mxu1 %v14532_v1  ;;  %13975 = vmatpush3.msra.mxu0 %v12591_v35 }
0x13a1   :  { %13986 = vmatpush3.msra.mxu1 %v12591_v35  ;;  %13990 = vmatprep.subr.mxu0 %v14532_v1 }
0x13a2   :  { %14001 = vmatprep.subr.mxu1 %v14532_v1 }
0x141a   :  { %v8655_v36 = vpop.xlane.xlu0 %8654 }
0x141b   :  { %v8659_v10 = vmul.f32 0.03125, %v8655_v36  ;;  %v12636_v36 = vld [vmem:[%s16649_s8 + $0xe8] sm:$0xff] }
0x141d   :  { %v8661_v12 = vsub.f32 %v8651_v2, %v8659_v10  ;;  %v12623_v2 = vld [vmem:[%s16649_s8 + $0x80] sm:$0xff] }
0x141e   :  { %v12635_v10 = vld [vmem:[%s16649_s8 + $0xe0] sm:$0xff] }
0x141f   :  { %v8663_v14 = vmul.f32 %v8661_v12, %v8661_v12 }
0x1421   :  { %v8665_v15 = vsel %vm131_vm1, %v8663_v14, 0.0 }
0x1422   :  { %8666 = vadd.xlane.f32.xlu0 %v8665_v15 }
0x1425   :  { %v8658_v18 = vpop.xlane.xlu1 %8657 }
0x1426   :  { %v8660_v24 = vmul.f32 0.03125, %v8658_v18 }
0x1428   :  { %v8662_v25 = vsub.f32 %v8652_v7, %v8660_v24  ;;  %v12638_v7 = vld [vmem:[%s16649_s8 + $0xf8] sm:$0xff] }
0x142a   :  { %v8664_v27 = vmul.f32 %v8662_v25, %v8662_v25 }
0x142c   :  { %v8668_v32 = vsel %vm131_vm1, %v8664_v27, 0.0 }
0x142d   :  { %8669 = vadd.xlane.f32.xlu0 %v8668_v32 }
0x14ab   :  { %v8667_v56 = vpop.xlane.xlu0 %8666 }
0x14ac   :  { %v8671_v22 = vmul.f32 0.03125, %v8667_v56 }
0x14ae   :  { %v8673_v28 = vadd.f32 1e-05, %v8671_v22 }
0x14b0   :  { %14452 = vrsqrt.f32 %v8673_v28  ;;  %v12643_v28 = vld [vmem:[%s16650_s9 + $0x4] ss:$0 sm:$0xff] }
0x14b6   :  { %v8670_v42 = vpop.xlane.xlu0 %8669 }
0x14b7   :  { %v8672_v39 = vmul.f32 0.03125, %v8670_v42 }
0x14b9   :  { %v8674_v40 = vadd.f32 1e-05, %v8672_v39  ;;  %v12611_v39 = vld [vmem:[%s16692_s7 + $0x4] ss:$0 sm:$0xff] }
0x14bb   :  { %14454 = vrsqrt.f32 %v8674_v40 }
0x14bd   :  { %v14453_v31 = vpop.eup %14452 }
0x14be   :  { %v8677_v46 = vmul.f32 %v14453_v31, %v8661_v12 }
0x14c0   :  { %v8683_v20 = vmul.f32 %v8682_v44, %v8677_v46  ;;  %v12644_v46 = vld [vmem:[%s16650_s9 + $0x5] ss:$0 sm:$0xff] }
0x14c2   :  { %v16040_v21 = vadd.f32 %v8688_v47, %v8683_v20  ;;  %v12612_v20 = vld [vmem:[%s16692_s7 + $0x5] ss:$0 sm:$0xff] }
0x14c4   :  { %13977 = vmatmul.mubr.msk.f32.vlgmr.msra.gmra.mxu0 %vm131_vm1, %v16040_v21 }
0x14c5   :  { %13991 = vmatpush3.msra.mxu0 %v12598_v48  ;;  %13998 = vmatprep.mubr.msk.f32.mxu0 %vm14533_vm0, %v14532_v1 }
0x14c6   :  { %13992 = vmatprep.subr.mxu0 %v14532_v1 }
0x14c7   :  { %13993 = vmatpush3.msra.mxu0 %v12597_v43 }
0x14c8   :  { %v14455_v50 = vpop.eup %14454  ;;  %13994 = vmatprep.subr.mxu0 %v14532_v1 }
0x14c9   :  { %v8678_v52 = vmul.f32 %v14455_v50, %v8662_v25  ;;  %13995 = vmatpush3.msra.mxu0 %v12596_v13 }
0x14ca   :  { %13996 = vmatprep.subr.mxu0 %v14532_v1 }
0x14cb   :  { %13997 = vmatpush3.msra.mxu0 %v12595_v26  ;;  %v8684_v33 = vmul.f32 %v8682_v44, %v8678_v52 }
0x14cc   :  { %13999 = vmatmul.mubr.msk.f32.vlgmr.msra.gmra.mxu0 %vm131_vm1, %v16040_v21  ;;  %14012 = vmatprep.subr.mxu0 %v14532_v1 }
0x14cd   :  { %14013 = vmatpush3.msra.mxu0 %v12602_v38  ;;  %v16070_v54 = vadd.f32 %v8688_v47, %v8684_v33  ;;  %14020 = vmatprep.mubr.msk.f32.mxu0 %vm14533_vm0, %v14532_v1  ;;  %v12645_v33 = vld [vmem:[%s16650_s9 + $0x6] ss:$0 sm:$0xff] }
0x14ce   :  { %14014 = vmatprep.subr.mxu0 %v14532_v1 }
0x14cf   :  { %14015 = vmatpush3.msra.mxu0 %v12601_v29  ;;  %13988 = vmatmul.mubr.msk.f32.vlgmr.msra.gmra.mxu1 %vm131_vm1, %v16070_v54 }
0x14d0   :  { %14002 = vmatpush3.msra.mxu1 %v12598_v48  ;;  %14016 = vmatprep.subr.mxu0 %v14532_v1 }
0x14d1   :  { %14003 = vmatprep.subr.mxu1 %v14532_v1  ;;  %14017 = vmatpush3.msra.mxu0 %v12600_v58 }
0x14d2   :  { %14004 = vmatpush3.msra.mxu1 %v12597_v43  ;;  %14018 = vmatprep.subr.mxu0 %v14532_v1 }
0x14d3   :  { %14005 = vmatprep.subr.mxu1 %v14532_v1  ;;  %14019 = vmatpush3.msra.mxu0 %v12599_v53 }
0x14d4   :  { %14006 = vmatpush3.msra.mxu1 %v12596_v13  ;;  %14021 = vmatmul.mubr.msk.f32.vlgmr.msra.gmra.mxu0 %vm131_vm1, %v16040_v21 }
0x14d5   :  { %14034 = vmatprep.subr.mxu0 %v14532_v1  ;;  %14007 = vmatprep.subr.mxu1 %v14532_v1 }
0x14d6   :  { %14035 = vmatpush3.msra.mxu0 %v12606_v0  ;;  %14008 = vmatpush3.msra.mxu1 %v12595_v26 }
0x14d7   :  { %14009 = vmatprep.mubr.msk.f32.mxu1 %vm14533_vm0, %v14532_v1  ;;  %14036 = vmatprep.subr.mxu0 %v14532_v1 }
0x14d8   :  { %14010 = vmatmul.mubr.msk.f32.vlgmr.msra.gmra.mxu1 %vm131_vm1, %v16070_v54  ;;  %14023 = vmatprep.subr.mxu1 %v14532_v1 }
0x14d9   :  { %14037 = vmatpush3.msra.mxu0 %v12605_v60  ;;  %14024 = vmatpush3.msra.mxu1 %v12602_v38 }
0x14da   :  { %14038 = vmatprep.subr.mxu0 %v14532_v1  ;;  %14025 = vmatprep.subr.mxu1 %v14532_v1 }
0x14db   :  { %14039 = vmatpush3.msra.mxu0 %v12604_v62  ;;  %14026 = vmatpush3.msra.mxu1 %v12601_v29 }
0x14dc   :  { %14040 = vmatprep.subr.mxu0 %v14532_v1  ;;  %14027 = vmatprep.subr.mxu1 %v14532_v1 }
0x14dd   :  { %14041 = vmatpush3.msra.mxu0 %v12603_v63  ;;  %14042 = vmatprep.mubr.msk.f32.mxu0 %vm14533_vm0, %v14532_v1 }
0x14de   :  { %14028 = vmatpush3.msra.mxu1 %v12600_v58  ;;  %14043 = vmatmul.mubr.msk.f32.vlgmr.msra.gmra.mxu0 %vm131_vm1, %v16040_v21  ;;  %v12613_v58 = vld [vmem:[%s16692_s7 + $0x6] ss:$0 sm:$0xff] }
0x14df   :  { %14056 = vmatprep.subr.mxu0 %v14532_v1  ;;  %14029 = vmatprep.subr.mxu1 %v14532_v1 }
0x14e0   :  { %14057 = vmatpush3.msra.mxu0 %v12626_v11  ;;  %14030 = vmatpush3.msra.mxu1 %v12599_v53 }
0x14e1   :  { %14031 = vmatprep.mubr.msk.f32.mxu1 %vm14533_vm0, %v14532_v1  ;;  %14058 = vmatprep.subr.mxu0 %v14532_v1 }
0x14e2   :  { %14032 = vmatmul.mubr.msk.f32.vlgmr.msra.gmra.mxu1 %vm131_vm1, %v16070_v54  ;;  %14045 = vmatprep.subr.mxu1 %v14532_v1 }
0x14e3   :  { %14059 = vmatpush3.msra.mxu0 %v12625_v59  ;;  %14046 = vmatpush3.msra.mxu1 %v12606_v0 }
0x14e4   :  { %14060 = vmatprep.subr.mxu0 %v14532_v1  ;;  %14047 = vmatprep.subr.mxu1 %v14532_v1 }
0x14e5   :  { %14061 = vmatpush3.msra.mxu0 %v12624_v8  ;;  %14048 = vmatpush3.msra.mxu1 %v12605_v60 }
0x14e6   :  { %14062 = vmatprep.subr.mxu0 %v14532_v1  ;;  %14049 = vmatprep.subr.mxu1 %v14532_v1 }
0x14e7   :  { %14063 = vmatpush3.msra.mxu0 %v12623_v2  ;;  %14064 = vmatprep.mubr.msk.f32.mxu0 %vm14533_vm0, %v14532_v1 }
0x14e8   :  { %14050 = vmatpush3.msra.mxu1 %v12604_v62  ;;  %14065 = vmatmul.mubr.msk.f32.vlgmr.msra.gmra.mxu0 %vm131_vm1, %v16149_v3 }
0x14e9   :  { %14078 = vmatprep.subr.mxu0 %v14532_v1  ;;  %14051 = vmatprep.subr.mxu1 %v14532_v1 }
0x14ea   :  { %14079 = vmatpush3.msra.mxu0 %v12630_v37  ;;  %14052 = vmatpush3.msra.mxu1 %v12603_v63 }
0x14eb   :  { %14053 = vmatprep.mubr.msk.f32.mxu1 %vm14533_vm0, %v14532_v1  ;;  %14080 = vmatprep.subr.mxu0 %v14532_v1 }
0x14ec   :  { %14054 = vmatmul.mubr.msk.f32.vlgmr.msra.gmra.mxu1 %vm131_vm1, %v16070_v54  ;;  %14067 = vmatprep.subr.mxu1 %v14532_v1 }
0x14ed   :  { %14081 = vmatpush3.msra.mxu0 %v12629_v4  ;;  %14068 = vmatpush3.msra.mxu1 %v12626_v11 }
0x14ee   :  { %14082 = vmatprep.subr.mxu0 %v14532_v1  ;;  %14069 = vmatprep.subr.mxu1 %v14532_v1 }
0x14ef   :  { %14083 = vmatpush3.msra.mxu0 %v12628_v23  ;;  %14070 = vmatpush3.msra.mxu1 %v12625_v59 }
0x14f0   :  { %14084 = vmatprep.subr.mxu0 %v14532_v1  ;;  %14071 = vmatprep.subr.mxu1 %v14532_v1 }
0x14f1   :  { %14085 = vmatpush3.msra.mxu0 %v12627_v5  ;;  %14086 = vmatprep.mubr.msk.f32.mxu0 %vm14533_vm0, %v14532_v1 }
0x14f2   :  { %14072 = vmatpush3.msra.mxu1 %v12624_v8  ;;  %14087 = vmatmul.mubr.msk.f32.vlgmr.msra.gmra.mxu0 %vm131_vm1, %v16149_v3  ;;  %v12646_v8 = vld [vmem:[%s16650_s9 + $0x7] ss:$0 sm:$0xff] }
0x14f3   :  { %14100 = vmatprep.subr.mxu0 %v14532_v1  ;;  %14073 = vmatprep.subr.mxu1 %v14532_v1 }
0x14f4   :  { %14101 = vmatpush3.msra.mxu0 %v12634_v55  ;;  %14074 = vmatpush3.msra.mxu1 %v12623_v2 }
0x14f5   :  { %14075 = vmatprep.mubr.msk.f32.mxu1 %vm14533_vm0, %v14532_v1  ;;  %14102 = vmatprep.subr.mxu0 %v14532_v1 }
0x14f6   :  { %14076 = vmatmul.mubr.msk.f32.vlgmr.msra.gmra.mxu1 %vm131_vm1, %v14515_v6  ;;  %14089 = vmatprep.subr.mxu1 %v14532_v1 }
0x14f7   :  { %14103 = vmatpush3.msra.mxu0 %v12633_v61  ;;  %14090 = vmatpush3.msra.mxu1 %v12630_v37  ;;  %v12614_v37 = vld [vmem:[%s16692_s7 + $0x7] ss:$0 sm:$0xff] }
0x14f8   :  { %14104 = vmatprep.subr.mxu0 %v14532_v1  ;;  %14091 = vmatprep.subr.mxu1 %v14532_v1 }
0x14f9   :  { %14105 = vmatpush3.msra.mxu0 %v12632_v49  ;;  %14092 = vmatpush3.msra.mxu1 %v12629_v4 }
0x14fa   :  { %14106 = vmatprep.subr.mxu0 %v14532_v1  ;;  %14093 = vmatprep.subr.mxu1 %v14532_v1 }
0x14fb   :  { %14107 = vmatpush3.msra.mxu0 %v12631_v51  ;;  %14108 = vmatprep.mubr.msk.f32.mxu0 %vm14533_vm0, %v14532_v1 }
0x14fc   :  { %14094 = vmatpush3.msra.mxu1 %v12628_v23  ;;  %14109 = vmatmul.mubr.msk.f32.vlgmr.msra.gmra.mxu0 %vm131_vm1, %v16149_v3 }
0x14fd   :  { %14122 = vmatprep.subr.mxu0 %v14532_v1  ;;  %14095 = vmatprep.subr.mxu1 %v14532_v1 }
0x14fe   :  { %14123 = vmatpush3.msra.mxu0 %v12638_v7  ;;  %14096 = vmatpush3.msra.mxu1 %v12627_v5 }
0x14ff   :  { %14097 = vmatprep.mubr.msk.f32.mxu1 %vm14533_vm0, %v14532_v1  ;;  %14124 = vmatprep.subr.mxu0 %v14532_v1 }
0x1500   :  { %14098 = vmatmul.mubr.msk.f32.vlgmr.msra.gmra.mxu1 %vm131_vm1, %v14515_v6  ;;  %14111 = vmatprep.subr.mxu1 %v14532_v1 }
0x1501   :  { %14125 = vmatpush3.msra.mxu0 %v12637_v9  ;;  %14112 = vmatpush3.msra.mxu1 %v12634_v55 }
0x1502   :  { %14126 = vmatprep.subr.mxu0 %v14532_v1  ;;  %14113 = vmatprep.subr.mxu1 %v14532_v1 }
0x1503   :  { %14127 = vmatpush3.msra.mxu0 %v12636_v36  ;;  %14114 = vmatpush3.msra.mxu1 %v12633_v61 }
0x1504   :  { %14128 = vmatprep.subr.mxu0 %v14532_v1  ;;  %14115 = vmatprep.subr.mxu1 %v14532_v1 }
0x1505   :  { %14129 = vmatpush3.msra.mxu0 %v12635_v10  ;;  %14130 = vmatprep.mubr.msk.f32.mxu0 %vm14533_vm0, %v14532_v1 }
0x1506   :  { %14116 = vmatpush3.msra.mxu1 %v12632_v49  ;;  %14131 = vmatmul.mubr.msk.f32.vlgmr.msra.gmra.mxu0 %vm131_vm1, %v16149_v3 }
0x1507   :  { %14117 = vmatprep.subr.mxu1 %v14532_v1  ;;  %14119 = vmatprep.mubr.msk.f32.mxu1 %vm14533_vm0, %v14532_v1 }
0x1508   :  { %14118 = vmatpush3.msra.mxu1 %v12631_v51  ;;  %14144 = vmatprep.subr.mxu0 %v14532_v1 }
0x1509   :  { %14120 = vmatmul.mubr.msk.f32.vlgmr.msra.gmra.mxu1 %vm131_vm1, %v14515_v6  ;;  %14133 = vmatprep.subr.mxu1 %v14532_v1 }
0x150a   :  { %14134 = vmatpush3.msra.mxu1 %v12638_v7  ;;  %14141 = vmatprep.mubr.msk.f32.mxu1 %vm14533_vm0, %v14532_v1 }
0x150b   :  { %14135 = vmatprep.subr.mxu1 %v14532_v1  ;;  %14146 = vmatprep.mubr.msk.f32.mxu0 %vm14533_vm0, %v14532_v1 }
0x150c   :  { %14136 = vmatpush3.msra.mxu1 %v12637_v9 }
0x150d   :  { %14137 = vmatprep.subr.mxu1 %v14532_v1 }
0x150e   :  { %14138 = vmatpush3.msra.mxu1 %v12636_v36 }
0x150f   :  { %14139 = vmatprep.subr.mxu1 %v14532_v1 }
0x1510   :  { %14140 = vmatpush3.msra.mxu1 %v12635_v10 }
0x1511   :  { %14142 = vmatmul.mubr.msk.f32.vlgmr.msra.gmra.mxu1 %vm131_vm1, %v14515_v6  ;;  %14149 = vmatprep.subr.mxu1 %v14532_v1 }
0x1512   :  { %14151 = vmatprep.mubr.msk.f32.mxu1 %vm14533_vm0, %v14532_v1 }
0x1584   :  { %v8806_v12 = vpop.f32.mrf.mxu0 }
0x1585   :  { %v8807_v41 = vadd.f32 %v12611_v39, %v8806_v12 }
0x1586   :  { %v13978_v14 = vpop.f32.mrf.mxu0 }
0x158c   :  { %v8949_v15 = vpop.f32.mrf.mxu0 }
0x158d   :  { %v8950_v13 = vadd.f32 %v12612_v20, %v8949_v15 }
0x158e   :  { %v14000_v18 = vpop.f32.mrf.mxu0 }
0x158f   :  { %v8879_v24 = vpop.f32.mrf.mxu1 }
0x1590   :  { %v8880_v38 = vadd.f32 %v12611_v39, %v8879_v24 }
0x1591   :  { %v13989_v25 = vpop.f32.mrf.mxu1 }
0x1594   :  { %v9089_v27 = vpop.f32.mrf.mxu0 }
0x1595   :  { %v9090_v60 = vadd.f32 %v12613_v58, %v9089_v27 }
0x1596   :  { %v14022_v32 = vpop.f32.mrf.mxu0 }
0x1598   :  { %v9019_v45 = vpop.f32.mrf.mxu1 }
0x1599   :  { %v9020_v59 = vadd.f32 %v12612_v20, %v9019_v45 }
0x159a   :  { %v14011_v30 = vpop.f32.mrf.mxu1 }
0x159e   :  { %v9229_v34 = vpop.f32.mrf.mxu0 }
0x159f   :  { %v9230_v5 = vadd.f32 %v12614_v37, %v9229_v34 }
0x15a0   :  { %v14044_v35 = vpop.f32.mrf.mxu0 }
0x15a2   :  { %v16252_v56 = vpop.f32.mrf.mxu1 }
0x15a3   :  { %v9160_v6 = vadd.f32 %v12613_v58, %v16252_v56 }
0x15a4   :  { %v14033_v22 = vpop.f32.mrf.mxu1 }
0x15a8   :  { %v9415_v42 = vpop.f32.mrf.mxu0 }
0x15a9   :  { %v16260_v40 = vadd.f32 %v12643_v28, %v9415_v42 }
0x15aa   :  { %v14066_v16 = vpop.f32.mrf.mxu0 }
0x15ab   :  { %14145 = vmatpush3.xpose.msk.msra.mxu0 %vm706_vm2, %v16260_v40 }
0x15ac   :  { %v16264_v44 = vpop.f32.mrf.mxu1  ;;  %14154 = vmatprep.subr.mxu0 %v14532_v1 }
0x15ad   :  { %v9300_v9 = vadd.f32 %v12614_v37, %v16264_v44 }
0x15ae   :  { %v14055_v31 = vpop.f32.mrf.mxu1  ;;  %14147 = vmatmul.mubr.msk.f32.vlgmr.msra.gmra.mxu0 %vm706_vm2, %v8807_v41 }
0x15af   :  { %14156 = vmatprep.mubr.msk.f32.mxu0 %vm14533_vm0, %v14532_v1 }
0x15b2   :  { %v9555_v47 = vpop.f32.mrf.mxu0 }
0x15b3   :  { %v16276_v48 = vadd.f32 %v12644_v46, %v9555_v47 }
0x15b4   :  { %v14088_v43 = vpop.f32.mrf.mxu0 }
0x15b5   :  { %14155 = vmatpush3.xpose.msk.msra.mxu0 %vm706_vm2, %v16276_v48 }
0x15b6   :  { %v9485_v50 = vpop.f32.mrf.mxu1  ;;  %14164 = vmatprep.subr.mxu0 %v14532_v1 }
0x15b7   :  { %v16281_v26 = vadd.f32 %v12643_v28, %v9485_v50 }
0x15b8   :  { %v14077_v52 = vpop.f32.mrf.mxu1  ;;  %14157 = vmatmul.mubr.msk.f32.vlgmr.msra.gmra.mxu0 %vm706_vm2, %v8950_v13 }
0x15b9   :  { %14150 = vmatpush3.xpose.msk.msra.mxu1 %vm706_vm2, %v16281_v26  ;;  %14166 = vmatprep.mubr.msk.f32.mxu0 %vm14533_vm0, %v14532_v1 }
0x15ba   :  { %14159 = vmatprep.subr.mxu1 %v14532_v1 }
0x15bc   :  { %v9695_v29 = vpop.f32.mrf.mxu0  ;;  %14152 = vmatmul.mubr.msk.f32.vlgmr.msra.gmra.mxu1 %vm706_vm2, %v8880_v38 }
0x15bd   :  { %v16296_v53 = vadd.f32 %v12645_v33, %v9695_v29  ;;  %14161 = vmatprep.mubr.msk.f32.mxu1 %vm14533_vm0, %v14532_v1 }
0x15be   :  { %v14110_v0 = vpop.f32.mrf.mxu0 }
0x15bf   :  { %14165 = vmatpush3.xpose.msk.msra.mxu0 %vm706_vm2, %v16296_v53 }
0x15c0   :  { %v9625_v62 = vpop.f32.mrf.mxu1  ;;  %14174 = vmatprep.subr.mxu0 %v14532_v1 }
0x15c1   :  { %v16303_v63 = vadd.f32 %v12644_v46, %v9625_v62 }
0x15c2   :  { %v14099_v11 = vpop.f32.mrf.mxu1  ;;  %14167 = vmatmul.mubr.msk.f32.vlgmr.msra.gmra.mxu0 %vm706_vm2, %v9090_v60 }
0x15c3   :  { %14160 = vmatpush3.xpose.msk.msra.mxu1 %vm706_vm2, %v16303_v63  ;;  %14176 = vmatprep.mubr.msk.f32.mxu0 %vm14533_vm0, %v14532_v1 }
0x15c4   :  { %14169 = vmatprep.subr.mxu1 %v14532_v1 }
0x15c6   :  { %v9835_v2 = vpop.f32.mrf.mxu0  ;;  %14162 = vmatmul.mubr.msk.f32.vlgmr.msra.gmra.mxu1 %vm706_vm2, %v9020_v59 }
0x15c7   :  { %v16318_v3 = vadd.f32 %v12646_v8, %v9835_v2  ;;  %14171 = vmatprep.mubr.msk.f32.mxu1 %vm14533_vm0, %v14532_v1 }
0x15c8   :  { %v14132_v4 = vpop.f32.mrf.mxu0 }
0x15c9   :  { %v9765_v23 = vpop.f32.mrf.mxu1  ;;  %14175 = vmatpush3.xpose.msk.msra.mxu0 %vm706_vm2, %v16318_v3 }
0x15ca   :  { %v9766_v55 = vadd.f32 %v12645_v33, %v9765_v23  ;;  %14184 = vmatprep.subr.mxu0 %v14532_v1 }
0x15cb   :  { %v14121_v61 = vpop.f32.mrf.mxu1 }
0x15cc   :  { %14170 = vmatpush3.xpose.msk.msra.mxu1 %vm706_vm2, %v9766_v55  ;;  %14177 = vmatmul.mubr.msk.f32.vlgmr.msra.gmra.mxu0 %vm706_vm2, %v9230_v5 }
0x15cd   :  { %14179 = vmatprep.subr.mxu1 %v14532_v1  ;;  %14186 = vmatprep.mubr.msk.f32.mxu0 %vm14533_vm0, %v14532_v1 }
0x15cf   :  { %14172 = vmatmul.mubr.msk.f32.vlgmr.msra.gmra.mxu1 %vm706_vm2, %v9160_v6 }
0x15d0   :  { %14181 = vmatprep.mubr.msk.f32.mxu1 %vm14533_vm0, %v14532_v1 }
0x15d1   :  { %v9905_v49 = vpop.f32.mrf.mxu1 }
0x15d2   :  { %v16334_v51 = vadd.f32 %v12646_v8, %v9905_v49 }
0x15d3   :  { %v14143_v7 = vpop.f32.mrf.mxu1 }
0x15d4   :  { %14180 = vmatpush3.xpose.msk.msra.mxu1 %vm706_vm2, %v16334_v51 }
0x15d5   :  { %14189 = vmatprep.subr.mxu1 %v14532_v1 }
0x15d7   :  { %14182 = vmatmul.mubr.msk.f32.vlgmr.msra.gmra.mxu1 %vm706_vm2, %v9300_v9 }
0x15d8   :  { %14191 = vmatprep.mubr.msk.f32.mxu1 %vm14533_vm0, %v14532_v1 }
0x166e   :  { %v9988_v36 = vpop.f32.mrf.mxu0 }
0x166f   :  { %v10524_v10 = vmul.f32 0.35355338, %v9988_v36 }
0x1670   :  { %v14148_v12 = vpop.f32.mrf.mxu0 }
0x1671   :  { %v10532_v14 = vsel %vm706_vm2, %v10524_v10, -inf }
0x1672   :  { %10533 = vmax.xlane.f32.xlu1 %v10532_v14 }
0x1678   :  { %v10140_v15 = vpop.f32.mrf.mxu0 }
0x1679   :  { %v10526_v18 = vmul.f32 0.35355338, %v10140_v15 }
0x167a   :  { %v14158_v24 = vpop.f32.mrf.mxu0 }
0x167b   :  { %v10538_v25 = vsel %vm706_vm2, %v10526_v18, -inf }
0x167c   :  { %v10064_v27 = vpop.f32.mrf.mxu1  ;;  %10539 = vmax.xlane.f32.xlu1 %v10538_v25 }
0x167d   :  { %v10525_v32 = vmul.f32 0.35355338, %v10064_v27 }
0x167e   :  { %v14153_v45 = vpop.f32.mrf.mxu1 }
0x167f   :  { %v10535_v30 = vsel %vm706_vm2, %v10525_v32, -inf }
0x1680   :  { %10536 = vmax.xlane.f32.xlu0 %v10535_v30 }
0x1682   :  { %v10292_v34 = vpop.f32.mrf.mxu0 }
0x1683   :  { %v10528_v35 = vmul.f32 0.35355338, %v10292_v34 }
0x1684   :  { %v14168_v56 = vpop.f32.mrf.mxu0 }
0x1685   :  { %v10544_v22 = vsel %vm706_vm2, %v10528_v35, -inf }
0x1686   :  { %v10216_v28 = vpop.f32.mrf.mxu1  ;;  %10545 = vmax.xlane.f32.xlu1 %v10544_v22 }
0x1687   :  { %v10527_v42 = vmul.f32 0.35355338, %v10216_v28 }
0x1688   :  { %v14163_v39 = vpop.f32.mrf.mxu1 }
0x1689   :  { %v10541_v16 = vsel %vm706_vm2, %v10527_v42, -inf }
0x168a   :  { %10542 = vmax.xlane.f32.xlu0 %v10541_v16 }
0x168c   :  { %v10444_v41 = vpop.f32.mrf.mxu0 }
0x168d   :  { %v10530_v44 = vmul.f32 0.35355338, %v10444_v41 }
0x168e   :  { %v14178_v31 = vpop.f32.mrf.mxu0 }
0x168f   :  { %v10368_v46 = vpop.f32.mrf.mxu1  ;;  %v10550_v47 = vsel %vm706_vm2, %v10530_v44, -inf }
0x1690   :  { %v10529_v20 = vmul.f32 0.35355338, %v10368_v46  ;;  %10551 = vmax.xlane.f32.xlu1 %v10550_v47 }
0x1691   :  { %v14173_v43 = vpop.f32.mrf.mxu1 }
0x1692   :  { %v10547_v13 = vsel %vm706_vm2, %v10529_v20, -inf }
0x1693   :  { %10548 = vmax.xlane.f32.xlu0 %v10547_v13 }
0x1697   :  { %v10520_v50 = vpop.f32.mrf.mxu1 }
0x1698   :  { %v10531_v52 = vmul.f32 0.35355338, %v10520_v50 }
0x1699   :  { %v14183_v38 = vpop.f32.mrf.mxu1 }
0x169a   :  { %v10553_v33 = vsel %vm706_vm2, %v10531_v52, -inf }
0x169b   :  { %10554 = vmax.xlane.f32.xlu0 %v10553_v33 }
0x16a1   :  { %10620 = vrot.lane.b32.xlu1 %v16260_v40, %s16693_s6 }
0x16a5   :  { %10772 = vrot.lane.b32.xlu1 %v16276_v48, %s16693_s6 }
0x16a9   :  { %10848 = vrot.lane.b32.xlu1 %v16303_v63, %s16693_s6 }
0x16ad   :  { %11000 = vrot.lane.b32.xlu1 %v9766_v55, %s16693_s6 }
0x16b1   :  { %10696 = vrot.lane.b32.xlu0 %v16281_v26, %s16693_s6 }
0x16b5   :  { %10924 = vrot.lane.b32.xlu0 %v16296_v53, %s16693_s6 }
0x16fb   :  { %v10534_v29 = vpop.xlane.xlu1 %10533 }
0x16fc   :  { %v10556_v58 = vsub.f32 %v10524_v10, %v10534_v29 }
0x16fe   :  { %v10564_v0 = vmul.f32 1.442695, %v10556_v58 }
0x1700   :  { %14456 = vpow2.f32 %v10564_v0 }
0x1705   :  { %v10540_v60 = vpop.xlane.xlu1 %10539 }
0x1706   :  { %v10558_v40 = vsub.f32 %v10526_v18, %v10540_v60 }
0x1708   :  { %v10568_v62 = vmul.f32 1.442695, %v10558_v40 }
0x1709   :  { %v10537_v11 = vpop.xlane.xlu0 %10536 }
0x170a   :  { %14458 = vpow2.f32 %v10568_v62  ;;  %v10557_v48 = vsub.f32 %v10525_v32, %v10537_v11 }
0x170c   :  { %v10566_v59 = vmul.f32 1.442695, %v10557_v48 }
0x170d   :  { %v16362_v63 = vpop.eup %14456 }
0x170e   :  { %14460 = vpow2.f32 %v10566_v59  ;;  %v10580_v26 = vsel %vm706_vm2, %v16362_v63, 0.0 }
0x170f   :  { %v10546_v8 = vpop.xlane.xlu1 %10545  ;;  %10581 = vadd.xlane.f32.xlu1 %v10580_v26 }
0x1710   :  { %v10560_v53 = vsub.f32 %v10528_v35, %v10546_v8 }
0x1712   :  { %v10572_v2 = vmul.f32 1.442695, %v10560_v53 }
0x1713   :  { %v10543_v37 = vpop.xlane.xlu0 %10542 }
0x1714   :  { %14462 = vpow2.f32 %v10572_v2  ;;  %v10559_v4 = vsub.f32 %v10527_v42, %v10543_v37  ;;  %v12655_v37 = vld [vmem:[%s16651_s10 + $0x20] sm:$0xff] }
0x1716   :  { %v10570_v23 = vmul.f32 1.442695, %v10559_v4  ;;  %v12656_v4 = vld [vmem:[%s16651_s10 + $0x28] sm:$0xff] }
0x1717   :  { %v14459_v5 = vpop.eup %14458 }
0x1718   :  { %14464 = vpow2.f32 %v10570_v23  ;;  %v10586_v55 = vsel %vm706_vm2, %v14459_v5, 0.0 }
0x1719   :  { %v10552_v61 = vpop.xlane.xlu1 %10551  ;;  %10587 = vadd.xlane.f32.xlu1 %v10586_v55  ;;  %v12657_v55 = vld [vmem:[%s16651_s10 + $0x30] sm:$0xff] }
0x171a   :  { %v10562_v6 = vsub.f32 %v10530_v44, %v10552_v61 }
0x171b   :  { %v14461_v49 = vpop.eup %14460 }
0x171c   :  { %v10576_v7 = vmul.f32 1.442695, %v10562_v6  ;;  %v10549_v9 = vpop.xlane.xlu0 %10548  ;;  %v10583_v36 = vsel %vm706_vm2, %v14461_v49, 0.0 }
0x171d   :  { %v10561_v10 = vsub.f32 %v10529_v20, %v10549_v9  ;;  %v10621_v12 = vpop.permute.xlu1 %10620  ;;  %10584 = vadd.xlane.f32.xlu0 %v10583_v36  ;;  %v12658_v9 = vld [vmem:[%s16651_s10 + $0x38] sm:$0xff] }
0x171e   :  { %14466 = vpow2.f32 %v10576_v7  ;;  %14185 = vmatpush3.msra.mxu0 %v10621_v12 }
0x171f   :  { %v10574_v14 = vmul.f32 1.442695, %v10561_v10  ;;  %14194 = vmatprep.subr.mxu0 %v14532_v1 }
0x1721   :  { %v14463_v15 = vpop.eup %14462  ;;  %14468 = vpow2.f32 %v10574_v14  ;;  %v10773_v39 = vpop.permute.xlu1 %10772 }
0x1722   :  { %v10592_v18 = vsel %vm706_vm2, %v14463_v15, 0.0 }
0x1723   :  { %10593 = vadd.xlane.f32.xlu1 %v10592_v18 }
0x1724   :  { %v10555_v24 = vpop.xlane.xlu0 %10554 }
0x1725   :  { %v14465_v25 = vpop.eup %14464  ;;  %v10563_v27 = vsub.f32 %v10531_v52, %v10555_v24  ;;  %v10849_v16 = vpop.permute.xlu1 %10848 }
0x1726   :  { %v10589_v32 = vsel %vm706_vm2, %v14465_v25, 0.0 }
0x1727   :  { %v10578_v45 = vmul.f32 1.442695, %v10563_v27  ;;  %10590 = vadd.xlane.f32.xlu0 %v10589_v32 }
0x1728   :  { %v10697_v30 = vpop.permute.xlu0 %10696 }
0x1729   :  { %14470 = vpow2.f32 %v10578_v45  ;;  %14190 = vmatpush3.msra.mxu1 %v10697_v30  ;;  %v11001_v41 = vpop.permute.xlu1 %11000 }
0x172a   :  { %14199 = vmatprep.subr.mxu1 %v14532_v1 }
0x172b   :  { %v14467_v34 = vpop.eup %14466 }
0x172c   :  { %v10598_v35 = vsel %vm706_vm2, %v14467_v34, 0.0  ;;  %v10925_v31 = vpop.permute.xlu0 %10924 }
0x172d   :  { %10599 = vadd.xlane.f32.xlu1 %v10598_v35 }
0x172e   :  { %v16373_v56 = vpop.eup %14468 }
0x172f   :  { %v10595_v22 = vsel %vm706_vm2, %v16373_v56, 0.0 }
0x1730   :  { %10596 = vadd.xlane.f32.xlu0 %v10595_v22 }
0x1736   :  { %v16377_v28 = vpop.eup %14470 }
0x1737   :  { %v10601_v42 = vsel %vm706_vm2, %v16377_v28, 0.0 }
0x1738   :  { %10602 = vadd.xlane.f32.xlu0 %v10601_v42 }
0x173e   :  { %11152 = vrot.lane.b32.xlu1 %v16334_v51, %s16693_s6 }
0x174e   :  { %11076 = vrot.lane.b32.xlu0 %v16318_v3, %s16693_s6 }
0x1798   :  { %v10582_v44 = vpop.xlane.xlu1 %10581 }
0x1799   :  { %14472 = vrcp.f32 %v10582_v44 }
0x17a2   :  { %v10588_v46 = vpop.xlane.xlu1 %10587 }
0x17a3   :  { %14474 = vrcp.f32 %v10588_v46 }
0x17a6   :  { %v14473_v47 = vpop.eup %14472  ;;  %v10585_v20 = vpop.xlane.xlu0 %10584 }
0x17a7   :  { %v10612_v43 = vmul.f32 %v14473_v47, %v16362_v63  ;;  %14476 = vrcp.f32 %v10585_v20 }
0x17a9   :  { %14187 = vmatmul.mubr.msk.f32.vlgmr.msra.gmra.mxu0 %vm706_vm2, %v10612_v43  ;;  %v12692_v43 = vld [vmem:[%s16652_s11 + $0x1] ss:$0 sm:$0xff]  ;;  %s14537_s11 = smov 16  }
0x17aa   :  { %14195 = vmatpush3.msra.mxu0 %v10773_v39  ;;  %14196 = vmatprep.mubr.msk.f32.mxu0 %vm14533_vm0, %v14532_v1 }
0x17ab   :  { %14204 = vmatprep.subr.mxu0 %v14532_v1 }
0x17ac   :  { %v10594_v3 = vpop.xlane.xlu1 %10593 }
0x17ad   :  { %14478 = vrcp.f32 %v10594_v3 }
0x17b0   :  { %v14475_v51 = vpop.eup %14474  ;;  %v10591_v13 = vpop.xlane.xlu0 %10590 }
0x17b1   :  { %v10614_v50 = vmul.f32 %v14475_v51, %v14459_v5  ;;  %14480 = vrcp.f32 %v10591_v13 }
0x17b3   :  { %14197 = vmatmul.mubr.msk.f32.vlgmr.msra.gmra.mxu0 %vm706_vm2, %v10614_v50 }
0x17b4   :  { %v14477_v52 = vpop.eup %14476  ;;  %14205 = vmatpush3.msra.mxu0 %v10925_v31  ;;  %14206 = vmatprep.mubr.msk.f32.mxu0 %vm14533_vm0, %v14532_v1 }
0x17b5   :  { %v10613_v38 = vmul.f32 %v14477_v52, %v14461_v49  ;;  %14214 = vmatprep.subr.mxu0 %v14532_v1 }
0x17b6   :  { %v10600_v33 = vpop.xlane.xlu1 %10599 }
0x17b7   :  { %14482 = vrcp.f32 %v10600_v33  ;;  %14192 = vmatmul.mubr.msk.f32.vlgmr.msra.gmra.mxu1 %vm706_vm2, %v10613_v38 }
0x17b8   :  { %14200 = vmatpush3.msra.mxu1 %v10849_v16  ;;  %14201 = vmatprep.mubr.msk.f32.mxu1 %vm14533_vm0, %v14532_v1 }
0x17b9   :  { %v10597_v29 = vpop.xlane.xlu0 %10596  ;;  %14209 = vmatprep.subr.mxu1 %v14532_v1 }
0x17ba   :  { %v14479_v58 = vpop.eup %14478  ;;  %14484 = vrcp.f32 %v10597_v29  ;;  %v11153_v8 = vpop.permute.xlu1 %11152 }
0x17bb   :  { %v10616_v0 = vmul.f32 %v14479_v58, %v14463_v15 }
0x17bd   :  { %14207 = vmatmul.mubr.msk.f32.vlgmr.msra.gmra.mxu0 %vm706_vm2, %v10616_v0 }
0x17be   :  { %v14481_v60 = vpop.eup %14480  ;;  %14216 = vmatprep.mubr.msk.f32.mxu0 %vm14533_vm0, %v14532_v1 }
0x17bf   :  { %v10615_v40 = vmul.f32 %v14481_v60, %v14465_v25 }
0x17c1   :  { %v10603_v62 = vpop.xlane.xlu0 %10602  ;;  %14202 = vmatmul.mubr.msk.f32.vlgmr.msra.gmra.mxu1 %vm706_vm2, %v10615_v40 }
0x17c2   :  { %14486 = vrcp.f32 %v10603_v62  ;;  %14210 = vmatpush3.msra.mxu1 %v11001_v41  ;;  %14211 = vmatprep.mubr.msk.f32.mxu1 %vm14533_vm0, %v14532_v1 }
0x17c3   :  { %14219 = vmatprep.subr.mxu1 %v14532_v1 }
0x17c4   :  { %v14483_v11 = vpop.eup %14482 }
0x17c5   :  { %v10618_v48 = vmul.f32 %v14483_v11, %v14467_v34  ;;  %v11077_v59 = vpop.permute.xlu0 %11076 }
0x17c6   :  { %14215 = vmatpush3.msra.mxu0 %v11077_v59 }
0x17c7   :  { %v14485_v63 = vpop.eup %14484  ;;  %14217 = vmatmul.mubr.msk.f32.vlgmr.msra.gmra.mxu0 %vm706_vm2, %v10618_v48  ;;  %14224 = vmatprep.subr.mxu0 %v14532_v1 }
0x17c8   :  { %v10617_v26 = vmul.f32 %v14485_v63, %v16373_v56  ;;  %14226 = vmatprep.mubr.msk.f32.mxu0 %vm14533_vm0, %v14532_v1  ;;  %14225 = vmatpush3.msra.mxu0 %v12655_v37 }
0x17c9   :  { %14234 = vmatprep.subr.mxu0 %v14532_v1 }
0x17ca   :  { %14212 = vmatmul.mubr.msk.f32.vlgmr.msra.gmra.mxu1 %vm706_vm2, %v10617_v26 }
0x17cb   :  { %14220 = vmatpush3.msra.mxu1 %v11153_v8  ;;  %14221 = vmatprep.mubr.msk.f32.mxu1 %vm14533_vm0, %v14532_v1 }
0x17cc   :  { %14229 = vmatprep.subr.mxu1 %v14532_v1 }
0x17cf   :  { %v14487_v53 = vpop.eup %14486 }
0x17d0   :  { %v10619_v2 = vmul.f32 %v14487_v53, %v16377_v28 }
0x17d2   :  { %14222 = vmatmul.mubr.msk.f32.vlgmr.msra.gmra.mxu1 %vm706_vm2, %v10619_v2 }
0x17d3   :  { %14231 = vmatprep.mubr.msk.f32.mxu1 %vm14533_vm0, %v14532_v1  ;;  %14230 = vmatpush3.msra.mxu1 %v12655_v37 }
0x17d4   :  { %14239 = vmatprep.subr.mxu1 %v14532_v1 }
0x1869   :  { %v10692_v23 = vpop.f32.mrf.mxu0 }
0x186a   :  { %14227 = vmatmul.mubr.msk.f32.vlgmr.msra.gmra.mxu0 %vm706_vm2, %v10692_v23 }
0x186b   :  { %v14188_v5 = vpop.f32.mrf.mxu0  ;;  %14235 = vmatpush3.msra.mxu0 %v12656_v4  ;;  %14236 = vmatprep.mubr.msk.f32.mxu0 %vm14533_vm0, %v14532_v1 }
0x186c   :  { %14244 = vmatprep.subr.mxu0 %v14532_v1 }
0x1873   :  { %v10844_v61 = vpop.f32.mrf.mxu0 }
0x1874   :  { %14237 = vmatmul.mubr.msk.f32.vlgmr.msra.gmra.mxu0 %vm706_vm2, %v10844_v61 }
0x1875   :  { %v14198_v6 = vpop.f32.mrf.mxu0  ;;  %14245 = vmatpush3.msra.mxu0 %v12657_v55  ;;  %14246 = vmatprep.mubr.msk.f32.mxu0 %vm14533_vm0, %v14532_v1 }
0x1876   :  { %14254 = vmatprep.subr.mxu0 %v14532_v1 }
0x1877   :  { %v10768_v49 = vpop.f32.mrf.mxu1 }
0x1878   :  { %14232 = vmatmul.mubr.msk.f32.vlgmr.msra.gmra.mxu1 %vm706_vm2, %v10768_v49  ;;  %v12696_v49 = vld [vmem:[%s16653_s12 + $0x38] sm:$0xff] }
0x1879   :  { %v14193_v7 = vpop.f32.mrf.mxu1  ;;  %14240 = vmatpush3.msra.mxu1 %v12656_v4  ;;  %14241 = vmatprep.mubr.msk.f32.mxu1 %vm14533_vm0, %v14532_v1 }
0x187a   :  { %14249 = vmatprep.subr.mxu1 %v14532_v1  ;;  %v12695_v7 = vld [vmem:[%s16653_s12 + $0x30] sm:$0xff] }
0x187d   :  { %v10996_v36 = vpop.f32.mrf.mxu0 }
0x187e   :  { %14247 = vmatmul.mubr.msk.f32.vlgmr.msra.gmra.mxu0 %vm706_vm2, %v10996_v36  ;;  %v12693_v36 = vld [vmem:[%s16653_s12 + $0x20] sm:$0xff] }
0x187f   :  { %v14208_v10 = vpop.f32.mrf.mxu0  ;;  %14255 = vmatpush3.msra.mxu0 %v12658_v9  ;;  %14256 = vmatprep.mubr.msk.f32.mxu0 %vm14533_vm0, %v14532_v1 }
0x1880   :  { %14264 = vmatprep.subr.mxu0 %v12696_v49  ;;  %v12716_v10 = vld [vmem:[%s16655_s14 + $0xf8] sm:$0xff] }
0x1881   :  { %v10920_v12 = vpop.f32.mrf.mxu1 }
0x1882   :  { %14242 = vmatmul.mubr.msk.f32.vlgmr.msra.gmra.mxu1 %vm706_vm2, %v10920_v12  ;;  %v12715_v12 = vld [vmem:[%s16655_s14 + $0xf0] sm:$0xff] }
0x1883   :  { %v14203_v14 = vpop.f32.mrf.mxu1  ;;  %14250 = vmatpush3.msra.mxu1 %v12657_v55  ;;  %14251 = vmatprep.mubr.msk.f32.mxu1 %vm14533_vm0, %v14532_v1 }
0x1884   :  { %14259 = vmatprep.subr.mxu1 %v14532_v1  ;;  %v12714_v14 = vld [vmem:[%s16655_s14 + $0xe8] sm:$0xff] }
0x1887   :  { %v11148_v15 = vpop.f32.mrf.mxu0 }
0x1888   :  { %14257 = vmatmul.mubr.msk.f32.vlgmr.msra.gmra.mxu0 %vm706_vm2, %v11148_v15  ;;  %v12713_v15 = vld [vmem:[%s16655_s14 + $0xe0] sm:$0xff] }
0x1889   :  { %v14218_v18 = vpop.f32.mrf.mxu0  ;;  %14265 = vmatpush3.msra.mxu0 %v12696_v49 }
0x188a   :  { %v11072_v24 = vpop.f32.mrf.mxu1  ;;  %14266 = vmatprep.subr.mxu0 %v12695_v7  ;;  %v12712_v18 = vld [vmem:[%s16655_s14 + $0xd8] sm:$0xff] }
0x188b   :  { %14252 = vmatmul.mubr.msk.f32.vlgmr.msra.gmra.mxu1 %vm706_vm2, %v11072_v24  ;;  %14267 = vmatpush3.msra.mxu0 %v12695_v7  ;;  %v12711_v24 = vld [vmem:[%s16655_s14 + $0xd0] sm:$0xff] }
0x188c   :  { %v14213_v25 = vpop.f32.mrf.mxu1  ;;  %14260 = vmatpush3.msra.mxu1 %v12658_v9  ;;  %14261 = vmatprep.mubr.msk.f32.mxu1 %vm14533_vm0, %v14532_v1  ;;  %v12694_v9 = vld [vmem:[%s16653_s12 + $0x28] sm:$0xff] }
0x188d   :  { %14268 = vmatprep.subr.mxu0 %v12694_v9  ;;  %14275 = vmatprep.subr.mxu1 %v12716_v10  ;;  %v12710_v25 = vld [vmem:[%s16655_s14 + $0xc8] sm:$0xff] }
0x188e   :  { %14269 = vmatpush3.msra.mxu0 %v12694_v9 }
0x188f   :  { %14270 = vmatprep.subr.mxu0 %v12693_v36 }
0x1890   :  { %14271 = vmatpush3.msra.mxu0 %v12693_v36  ;;  %v12113_v36 = vld [vmem:[%s16659_s18 + $0x18] sm:$0xff] }
0x1891   :  { %14310 = vmatprep.subr.mxu0 %v12113_v36 }
0x1892   :  { %v11224_v27 = vpop.f32.mrf.mxu1 }
0x1893   :  { %14262 = vmatmul.mubr.msk.f32.vlgmr.msra.gmra.mxu1 %vm706_vm2, %v11224_v27  ;;  %v12709_v27 = vld [vmem:[%s16655_s14 + $0xc0] sm:$0xff] }
0x1894   :  { %v14223_v32 = vpop.f32.mrf.mxu1  ;;  %14276 = vmatpush3.msra.mxu1 %v12716_v10  ;;  %v12112_v10 = vld [vmem:[%s16659_s18 + $0x10] sm:$0xff] }
0x1895   :  { %14277 = vmatprep.subr.mxu1 %v12715_v12  ;;  %v12708_v32 = vld [vmem:[%s16655_s14 + $0xb8] sm:$0xff] }
0x1896   :  { %14278 = vmatpush3.msra.mxu1 %v12715_v12  ;;  %v12111_v12 = vld [vmem:[%s16659_s18 + $0x8] sm:$0xff] }
0x1897   :  { %14279 = vmatprep.subr.mxu1 %v12714_v14 }
0x1898   :  { %14280 = vmatpush3.msra.mxu1 %v12714_v14  ;;  %v12110_v14 = vld [vmem:[%s16659_s18] sm:$0xff] }
0x1899   :  { %14281 = vmatprep.subr.mxu1 %v12713_v15 }
0x189a   :  { %14282 = vmatpush3.msra.mxu1 %v12713_v15  ;;  %v12226_v15 = vld [vmem:[%s16661_s20] sm:$0xff] }
0x189b   :  { %14283 = vmatprep.subr.mxu1 %v12712_v18 }
0x189c   :  { %14284 = vmatpush3.msra.mxu1 %v12712_v18  ;;  %v14536_v18 = vmov 0  }
0x189d   :  { %14285 = vmatprep.subr.mxu1 %v12711_v24  ;;  %14342 = vset.pattern.permute.xlu1 %v14536_v18 }
0x189e   :  { %14286 = vmatpush3.msra.mxu1 %v12711_v24  ;;  %14343 = vset.pattern.permute.xlu0 %v14536_v18  ;;  %v12276_v24 = vld [vmem:[%s16662_s21] sm:$0xff] }
0x189f   :  { %14287 = vmatprep.subr.mxu1 %v12710_v25 }
0x18a0   :  { %14288 = vmatpush3.msra.mxu1 %v12710_v25  ;;  %v12277_v25 = vld [vmem:[%s16662_s21 + $0x8] sm:$0xff] }
0x18a1   :  { %14289 = vmatprep.subr.mxu1 %v12709_v27 }
0x18a2   :  { %14290 = vmatpush3.msra.mxu1 %v12709_v27  ;;  %v12355_v27 = vld [vmem:[%s16663_s22] sm:$0xff] }
0x18a3   :  { %14291 = vmatprep.subr.mxu1 %v12708_v32 }
0x18a4   :  { %14292 = vmatpush3.msra.mxu1 %v12708_v32 }
0x192a   :  { %v11297_v45 = vpop.f32.mrf.mxu0 }
0x192b   :  { %v11812_v44 = vsel %vm131_vm1, %v11297_v45, 0.0  ;;  %v12707_v45 = vld [vmem:[%s16655_s14 + $0xb0] sm:$0xff] }
0x192c   :  { %v14228_v30 = vpop.f32.mrf.mxu0  ;;  %14293 = vmatprep.subr.mxu1 %v12707_v45 }
0x192d   :  { %v12706_v30 = vld [vmem:[%s16655_s14 + $0xa8] sm:$0xff]  ;;  %14294 = vmatpush3.msra.mxu1 %v12707_v45 }
0x192e   :  { %14295 = vmatprep.subr.mxu1 %v12706_v30 }
0x192f   :  { %14296 = vmatpush3.msra.mxu1 %v12706_v30 }
0x1934   :  { %v11443_v34 = vpop.f32.mrf.mxu0 }
0x1935   :  { %v11813_v16 = vsel %vm131_vm1, %v11443_v34, 0.0  ;;  %v12705_v34 = vld [vmem:[%s16655_s14 + $0xa0] sm:$0xff] }
0x1936   :  { %v14238_v35 = vpop.f32.mrf.mxu0  ;;  %v11814_v46 = vadd.f32 %v11813_v16, %v11812_v44  ;;  %14297 = vmatprep.subr.mxu1 %v12705_v34  ;;  %v16532_v16 = vld [vmem:[%s16657_s16 + $0x4] sm:$0x7] }
0x1937   :  { %14298 = vmatpush3.msra.mxu1 %v12705_v34 }
0x1938   :  { %v11370_v56 = vpop.f32.mrf.mxu1 }
0x1939   :  { %v11819_v58 = vsel %vm131_vm1, %v11370_v56, 0.0 }
0x193a   :  { %v14233_v22 = vpop.f32.mrf.mxu1 }
0x193e   :  { %v11589_v28 = vpop.f32.mrf.mxu0 }
0x193f   :  { %v11815_v31 = vsel %vm131_vm1, %v11589_v28, 0.0 }
0x1940   :  { %v14248_v42 = vpop.f32.mrf.mxu0  ;;  %v11816_v47 = vadd.f32 %v11815_v31, %v11814_v46  ;;  %v16540_v46 = vld [vmem:[%s16658_s17 + $0x4] sm:$0x7] }
0x1942   :  { %v11516_v39 = vpop.f32.mrf.mxu1 }
0x1943   :  { %v11820_v33 = vsel %vm131_vm1, %v11516_v39, 0.0 }
0x1944   :  { %v14243_v41 = vpop.f32.mrf.mxu1  ;;  %v11821_v40 = vadd.f32 %v11820_v33, %v11819_v58  ;;  %v12701_v33 = vld [vmem:[%s16655_s14 + $0x80] sm:$0xff] }
0x1945   :  { %v11865_v41 = vrot.slane %v16532_v16, %v15581_v19 }
0x1948   :  { %v11735_v20 = vpop.f32.mrf.mxu0 }
0x1949   :  { %v11817_v3 = vsel %vm131_vm1, %v11735_v20, 0.0 }
0x194a   :  { %v11818_v51 = vadd.f32 %v11817_v3, %v11816_v47  ;;  %v14258_v13 = vpop.f32.mrf.mxu0  ;;  %v11871_v47 = vrot.slane %v16540_v46, %v15581_v19  ;;  %v12703_v19 = vld [vmem:[%s16655_s14 + $0x90] sm:$0xff] }
0x194b   :  { %v11662_v50 = vpop.f32.mrf.mxu1 }
0x194c   :  { %v11832_v52 = vadd.f32 %v12692_v43, %v11818_v51  ;;  %v11822_v0 = vsel %vm131_vm1, %v11662_v50, 0.0 }
0x194d   :  { %v14253_v38 = vpop.f32.mrf.mxu1  ;;  %v11823_v62 = vadd.f32 %v11822_v0, %v11821_v40 }
0x194e   :  { %v11834_v29 = vadd.f32 %v11832_v52, %v16040_v21  ;;  %v12704_v52 = vld [vmem:[%s16655_s14 + $0x98] sm:$0xff]  ;;  %v12702_v38 = vld [vmem:[%s16655_s14 + $0x88] sm:$0xff] }
0x194f   :  { %14299 = vmatprep.subr.mxu1 %v12704_v52 }
0x1950   :  { %v11836_v60 = vsel %vm131_vm1, %v11834_v29, 0.0  ;;  %14300 = vmatpush3.msra.mxu1 %v12704_v52 }
0x1951   :  { %11837 = vadd.xlane.f32.xlu0 %v11836_v60  ;;  %14301 = vmatprep.subr.mxu1 %v12703_v19 }
0x1952   :  { %14302 = vmatpush3.msra.mxu1 %v12703_v19 }
0x1953   :  { %v11808_v11 = vpop.f32.mrf.mxu1  ;;  %14303 = vmatprep.subr.mxu1 %v12702_v38 }
0x1954   :  { %v11824_v48 = vsel %vm131_vm1, %v11808_v11, 0.0  ;;  %14304 = vmatpush3.msra.mxu1 %v12702_v38 }
0x1955   :  { %v11825_v59 = vadd.f32 %v11824_v48, %v11823_v62  ;;  %v14263_v63 = vpop.f32.mrf.mxu1  ;;  %14305 = vmatprep.subr.mxu1 %v12701_v33  ;;  %v12718_v48 = vld [vmem:[%s16656_s15 + $0x1] ss:$0 sm:$0xff] }
0x1956   :  { %14306 = vmatpush3.msra.mxu1 %v12701_v33  ;;  %v12356_v33 = vld [vmem:[%s16663_s22 + $0x8] sm:$0xff]  ;;  %s14540_s22 = smov 110  }
0x1957   :  { %v11833_v26 = vadd.f32 %v12692_v43, %v11825_v59 }
0x1959   :  { %v11835_v8 = vadd.f32 %v11833_v26, %v16070_v54 }
0x195b   :  { %v11839_v53 = vsel %vm131_vm1, %v11835_v8, 0.0 }
0x195c   :  { %11840 = vadd.xlane.f32.xlu1 %v11839_v53 }
0x19da   :  { %v11838_v21 = vpop.xlane.xlu0 %11837 }
0x19db   :  { %v11842_v2 = vmul.f32 0.03125, %v11838_v21 }
0x19dd   :  { %v16471_v37 = vsub.f32 %v11834_v29, %v11842_v2  ;;  %v12698_v29 = vld [vmem:[%s16654_s13 + $0x1] ss:$0 sm:$0xff] }
0x19df   :  { %v11846_v4 = vmul.f32 %v16471_v37, %v16471_v37 }
0x19e1   :  { %v11848_v23 = vsel %vm131_vm1, %v11846_v4, 0.0 }
0x19e2   :  { %11849 = vadd.xlane.f32.xlu0 %v11848_v23 }
0x19e5   :  { %v11841_v5 = vpop.xlane.xlu1 %11840 }
0x19e6   :  { %v11843_v55 = vmul.f32 0.03125, %v11841_v5 }
0x19e8   :  { %v16476_v61 = vsub.f32 %v11835_v8, %v11843_v55 }
0x19ea   :  { %v11847_v54 = vmul.f32 %v16476_v61, %v16476_v61 }
0x19ec   :  { %v11851_v6 = vsel %vm131_vm1, %v11847_v54, 0.0 }
0x19ed   :  { %11852 = vadd.xlane.f32.xlu0 %v11851_v6 }
0x1a6b   :  { %v11850_v35 = vpop.xlane.xlu0 %11849 }
0x1a6c   :  { %v11854_v56 = vmul.f32 0.03125, %v11850_v35 }
0x1a6e   :  { %v11856_v22 = vadd.f32 1e-05, %v11854_v56 }
0x1a70   :  { %14488 = vrsqrt.f32 %v11856_v22 }
0x1a76   :  { %v11853_v28 = vpop.xlane.xlu0 %11852 }
0x1a77   :  { %v11855_v42 = vmul.f32 0.03125, %v11853_v28  ;;  %v12101_v28 = vrot.slane %v16532_v16, %v15673_v17 }
0x1a79   :  { %v11857_v39 = vadd.f32 1e-05, %v11855_v42 }
0x1a7b   :  { %14490 = vrsqrt.f32 %v11857_v39 }
0x1a7d   :  { %v14489_v44 = vpop.eup %14488 }
0x1a7e   :  { %v11860_v31 = vmul.f32 %v14489_v44, %v16471_v37 }
0x1a80   :  { %v11866_v20 = vmul.f32 %v11865_v41, %v11860_v31  ;;  %v12107_v31 = vrot.slane %v16540_v46, %v15673_v17 }
0x1a82   :  { %v11872_v43 = vadd.f32 %v11871_v47, %v11866_v20 }
0x1a84   :  { %14272 = vmatprep.mubr.msk.f32.mxu0 %vm131_vm1, %v11872_v43 }
0x1a88   :  { %v14491_v3 = vpop.eup %14490 }
0x1a89   :  { %v11861_v51 = vmul.f32 %v14491_v3, %v16476_v61  ;;  %v12719_v3 = vld [vmem:[%s16660_s19] ss:$0 sm:$0xff] }
0x1a8b   :  { %v11867_v13 = vmul.f32 %v11865_v41, %v11861_v51 }
0x1a8d   :  { %v11873_v50 = vadd.f32 %v11871_v47, %v11867_v13 }
0x1a8f   :  { %14273 = vmatmul.mubr.msk.f32.vlgmr.msra.gmra.mxu0 %vm131_vm1, %v11873_v50 }
0x1a90   :  { %14311 = vmatpush3.msra.mxu0 %v12113_v36 }
0x1a91   :  { %14312 = vmatprep.subr.mxu0 %v12112_v10 }
0x1a92   :  { %14313 = vmatpush3.msra.mxu0 %v12112_v10 }
0x1a93   :  { %14314 = vmatprep.subr.mxu0 %v12111_v12 }
0x1a94   :  { %14315 = vmatpush3.msra.mxu0 %v12111_v12 }
0x1a95   :  { %14316 = vmatprep.subr.mxu0 %v12110_v14 }
0x1a96   :  { %14317 = vmatpush3.msra.mxu0 %v12110_v14 }
0x1b4f   :  { %v14274_v58 = vpop.f32.mrf.mxu0 }
0x1b50   :  { %v11965_v0 = vadd.f32 %v14274_v58, %v12698_v29  ;;  %v12227_v58 = vld [vmem:[%s16661_s20 + $0x8] sm:$0xff]  ;;  %s14539_s20 = smov 111  }
0x1b51   :  { %v11959_v60 = vpop.f32.mrf.mxu0 }
0x1b52   :  { %v11960_v40 = vadd.f32 %v12698_v29, %v11959_v60  ;;  %v11969_v11 = vmax.f32 %v11965_v0, 0.0 }
0x1b54   :  { %v11968_v62 = vmax.f32 %v11960_v40, 0.0 }
0x1b56   :  { %14307 = vmatprep.mubr.f32.mxu1 %v11968_v62 }
0x1b57   :  { %14308 = vmatmul.mubr.f32.vlgmr.msra.gmra.mxu1 %v11969_v11 }
0x1c17   :  { %v14309_v59 = vpop.f32.mrf.mxu1 }
0x1c18   :  { %v12067_v63 = vadd.f32 %v14309_v59, %v12718_v48 }
0x1c19   :  { %v12061_v26 = vpop.f32.mrf.mxu1 }
0x1c1a   :  { %v12071_v8 = vadd.f32 %v12067_v63, %v11873_v50  ;;  %v12062_v53 = vadd.f32 %v12718_v48, %v12061_v26 }
0x1c1c   :  { %v12070_v21 = vadd.f32 %v12062_v53, %v11872_v43  ;;  %v12075_v2 = vsel %vm131_vm1, %v12071_v8, 0.0 }
0x1c1d   :  { %12076 = vadd.xlane.f32.xlu0 %v12075_v2 }
0x1c1e   :  { %v12072_v37 = vsel %vm131_vm1, %v12070_v21, 0.0 }
0x1c1f   :  { %12073 = vadd.xlane.f32.xlu1 %v12072_v37 }
0x1ca6   :  { %v12077_v4 = vpop.xlane.xlu0 %12076 }
0x1ca7   :  { %v12079_v23 = vmul.f32 0.03125, %v12077_v4 }
0x1ca8   :  { %v12074_v5 = vpop.xlane.xlu1 %12073 }
0x1ca9   :  { %v12081_v55 = vsub.f32 %v12071_v8, %v12079_v23  ;;  %v12078_v61 = vmul.f32 0.03125, %v12074_v5 }
0x1cab   :  { %v12080_v54 = vsub.f32 %v12070_v21, %v12078_v61  ;;  %v12083_v6 = vmul.f32 %v12081_v55, %v12081_v55 }
0x1cad   :  { %v12087_v49 = vsel %vm131_vm1, %v12083_v6, 0.0  ;;  %v12082_v7 = vmul.f32 %v12080_v54, %v12080_v54 }
0x1cae   :  { %12088 = vadd.xlane.f32.xlu0 %v12087_v49 }
0x1caf   :  { %v12084_v9 = vsel %vm131_vm1, %v12082_v7, 0.0 }
0x1cb0   :  { %12085 = vadd.xlane.f32.xlu1 %v12084_v9 }
0x1cc1   :  { %12229 = vperm.xlu1 %14342, %v12226_v15  }
0x1cc5   :  { %12280 = vrot.lane.b32.xlu1 %v12276_v24, %s14537_s11 }
0x1cc9   :  { %12282 = vrot.lane.b32.xlu1 %v12277_v25, %s14537_s11 }
0x1ccd   :  { %12359 = vrot.lane.b32.xlu1 %v12355_v27, %s14538_s26 }
0x1d37   :  { %v12089_v32 = vpop.xlane.xlu0 %12088 }
0x1d38   :  { %v12091_v45 = vmul.f32 0.03125, %v12089_v32 }
0x1d39   :  { %v12086_v30 = vpop.xlane.xlu1 %12085 }
0x1d3a   :  { %v12093_v34 = vadd.f32 1e-05, %v12091_v45  ;;  %v12090_v35 = vmul.f32 0.03125, %v12086_v30 }
0x1d3c   :  { %14492 = vrsqrt.f32 %v12093_v34  ;;  %v12092_v56 = vadd.f32 1e-05, %v12090_v35 }
0x1d3d   :  { %v12230_v0 = vpop.permute.xlu1 %12229 }
0x1d3e   :  { %14494 = vrsqrt.f32 %v12092_v56  ;;  %vm12234_vm4 = vcmp.eq.s32.totalorder %v14885_v57, %v12230_v0 }
0x1d3f   :  { %v12722_v37 = vsel %vm12234_vm4, 1.0, %v14532_v1 }
0x1d41   :  { %v12281_v60 = vpop.permute.xlu1 %12280 }
0x1d45   :  { %v12283_v62 = vpop.permute.xlu1 %12282 }
0x1d49   :  { %v14493_v22 = vpop.eup %14492 }
0x1d4a   :  { %v12097_v42 = vmul.f32 %v14493_v22, %v12081_v55 }
0x1d4b   :  { %v14495_v39 = vpop.eup %14494 }
0x1d4c   :  { %v12096_v41 = vmul.f32 %v14495_v39, %v12080_v54  ;;  %v12103_v44 = vmul.f32 %v12101_v28, %v12097_v42 }
0x1d4e   :  { %v12102_v47 = vmul.f32 %v12101_v28, %v12096_v41  ;;  %v12109_v43 = vadd.f32 %v12107_v31, %v12103_v44 }
0x1d50   :  { %v12108_v20 = vadd.f32 %v12107_v31, %v12102_v47 }
0x1d52   :  { %14318 = vmatprep.mubr.msk.f32.mxu0 %vm131_vm1, %v12108_v20 }
0x1d53   :  { %14319 = vmatmul.mubr.msk.f32.vlgmr.msra.gmra.mxu0 %vm131_vm1, %v12109_v43 }
0x1e13   :  { %v14320_v51 = vpop.f32.mrf.mxu0 }
0x1e14   :  { %v12199_v16 = vadd.f32 %v14320_v51, %v12719_v3 }
0x1e15   :  { %v12193_v13 = vpop.f32.mrf.mxu0 }
0x1e16   :  { %v12267_v50 = vsub.f32 0.0, %v12199_v16  ;;  %v12194_v52 = vadd.f32 %v12719_v3, %v12193_v13  ;;  %v12205_v19 = vsel %vm706_vm2, %v12199_v16, -inf }
0x1e17   :  { %12206 = vmax.xlane.f32.xlu0 %v12205_v19 }
0x1e18   :  { %v12270_v17 = vmul.f32 1.442695, %v12267_v50  ;;  %v12202_v46 = vsel %vm706_vm2, %v12194_v52, -inf  ;;  %v12266_v59 = vsub.f32 0.0, %v12194_v52  ;;  %v12240_v55 = vmul.f32 %v12722_v37, %v12194_v52 }
0x1e19   :  { %12203 = vmax.xlane.f32.xlu1 %v12202_v46 }
0x1e1a   :  { %14496 = vpow2.f32 %v12270_v17  ;;  %v12268_v63 = vmul.f32 1.442695, %v12266_v59  ;;  %v12242_v54 = vsel %vm706_vm2, %v12240_v55, 0.0 }
0x1e27   :  { %v14497_v38 = vpop.eup %14496 }
0x1e28   :  { %v12273_v29 = vadd.f32 1.0, %v14497_v38 }
0x1e2a   :  { %14498 = vrcp.f32 %v12273_v29  ;;  %12361 = vrot.lane.b32.xlu1 %v12356_v33, %s14538_s26 }
0x1e2b   :  { %14500 = vpow2.f32 %v12268_v63 }
0x1e2d   :  { %12232 = vperm.xlu0 %14343, %v12227_v58  }
0x1e37   :  { %v14499_v40 = vpop.eup %14498 }
0x1e38   :  { %v12287_v11 = vsub.f32 %v14499_v40, %v12283_v62  ;;  %v14501_v2 = vpop.eup %14500 }
0x1e39   :  { %v12272_v5 = vadd.f32 1.0, %v14501_v2 }
0x1e3a   :  { %v12289_v48 = vand.u32 2147483647, %v12287_v11 }
0x1e3c   :  { %12294 = vrot.lane.b32.xlu0 %v12289_v48, %s16694_s29 }
0x1ea0   :  { %v16613_v26 = vpop.xlane.xlu0 %12206 }
0x1ea1   :  { %v12209_v8 = vsub.f32 %v12199_v16, %v16613_v26 }
0x1ea3   :  { %v12212_v53 = vmul.f32 1.442695, %v12209_v8 }
0x1ea5   :  { %14502 = vpow2.f32 %v12212_v53 }
0x1ea6   :  { %14504 = vrcp.f32 %v12272_v5 }
0x1ea8   :  { %v12233_v21 = vpop.permute.xlu0 %12232 }
0x1ea9   :  { %vm12235_vm5 = vcmp.eq.s32.totalorder %v14885_v57, %v12233_v21 }
0x1eaa   :  { %v12723_v4 = vsel %vm12235_vm5, 1.0, %v14532_v1  ;;  %v12360_v1 = vpop.permute.xlu1 %12359 }
0x1eab   :  { %v12241_v23 = vmul.f32 %v12723_v4, %v12199_v16 }
0x1ead   :  { %v12245_v61 = vsel %vm706_vm2, %v12241_v23, 0.0 }
0x1eae   :  { %12246 = vadd.xlane.f32.xlu1 %v12245_v61  ;;  %v12204_v12 = vpop.xlane.xlu1 %12203  ;;  %v12295_v35 = vpop.permute.xlu0 %12294 }
0x1eaf   :  { %v12208_v14 = vsub.f32 %v12194_v52, %v12204_v12  ;;  %v12299_v22 = vsel %vm12250_vm6, %v12295_v35, 0.0 }
0x1eb1   :  { %v12210_v15 = vmul.f32 1.442695, %v12208_v14 }
0x1eb2   :  { %v14503_v6 = vpop.eup %14502  ;;  %12243 = vadd.xlane.f32.xlu1 %v12242_v54  ;;  %v12362_v25 = vpop.permute.xlu1 %12361 }
0x1eb3   :  { %v12217_v49 = vsel %vm706_vm2, %v14503_v6, 0.0  ;;  %v14505_v57 = vpop.eup %14504  ;;  %14506 = vpow2.f32 %v12210_v15  ;;  %v12366_v27 = vsub.f32 %v14499_v40, %v12362_v25 }
0x1eb4   :  { %12218 = vadd.xlane.f32.xlu0 %v12217_v49  ;;  %v12286_v7 = vsub.f32 %v14505_v57, %v12281_v60  ;;  %v12365_v36 = vsub.f32 %v14505_v57, %v12360_v1 }
0x1eb5   :  { %v12368_v32 = vmul.f32 %v12366_v27, %v12366_v27 }
0x1eb6   :  { %v12288_v9 = vand.u32 2147483647, %v12286_v7  ;;  %v12367_v10 = vmul.f32 %v12365_v36, %v12365_v36 }
0x1ec0   :  { %v14507_v18 = vpop.eup %14506 }
0x1ec1   :  { %v12214_v24 = vsel %vm706_vm2, %v14507_v18, 0.0 }
0x1ec3   :  { %12315 = vrot.lane.b32.xlu1 %v12289_v48, %s14539_s20 }
0x1ec7   :  { %12292 = vrot.lane.b32.xlu1 %v12288_v9, %s16694_s29 }
0x1eca   :  { %12334 = vrot.lane.b32.xlu0 %v12288_v9, %s14540_s22 }
0x1ecb   :  { %12313 = vrot.lane.b32.xlu1 %v12288_v9, %s14539_s20 }
0x1ece   :  { %12371 = vrot.lane.b32.xlu0 %v12367_v10, %s16693_s6 }
0x1ecf   :  { %12336 = vrot.lane.b32.xlu1 %v12289_v48, %s14540_s22 }
0x1ef3   :  { %12215 = vadd.xlane.f32.xlu1 %v12214_v24 }
0x1f04   :  { %12373 = vrot.lane.b32.xlu1 %v12368_v32, %s16693_s6  ;;  %s14541_s6 = smov 0.0  }
0x1f05   :  { %12393 = sst [smem:[#allocation2 + $0x5]] %s14541_s6 }
0x1f06   :  { %12395 = sst [smem:[#allocation2 + $0x6]] %s14541_s6 }
0x1f07   :  { %12397 = sst [smem:[#allocation2 + $0x7]] %s14541_s6 }
0x1f37   :  { %v12247_v45 = vpop.xlane.xlu1 %12246 }
0x1f3b   :  { %v12244_v30 = vpop.xlane.xlu1 %12243 }
0x1f3d   :  { %v12219_v47 = vpop.xlane.xlu0 %12218 }
0x1f3e   :  { %14508 = vlog2.f32 %v12219_v47 }
0x1f3f   :  { %v12316_v34 = vpop.permute.xlu1 %12315 }
0x1f40   :  { %v12320_v41 = vsel %vm12250_vm6, %v12316_v34, 0.0 }
0x1f41   :  { %v12335_v20 = vpop.permute.xlu0 %12334 }
0x1f42   :  { %v12340_v48 = vsel %vm12250_vm6, %v12335_v20, 0.0 }
0x1f43   :  { %v12293_v56 = vpop.permute.xlu1 %12292 }
0x1f44   :  { %v12298_v28 = vsel %vm12250_vm6, %v12293_v56, 0.0 }
0x1f45   :  { %v12300_v42 = vadd.f32 %v12299_v22, %v12298_v28  ;;  %v12372_v51 = vpop.permute.xlu0 %12371 }
0x1f46   :  { %v12377_v13 = vsel %vm706_vm2, %v12372_v51, 0.0 }
0x1f47   :  { %12301 = vadd.xlane.f32.xlu1 %v12300_v42  ;;  %v12314_v39 = vpop.permute.xlu1 %12313 }
0x1f48   :  { %v12319_v44 = vsel %vm12250_vm6, %v12314_v39, 0.0 }
0x1f49   :  { %v12321_v31 = vadd.f32 %v12320_v41, %v12319_v44 }
0x1f4b   :  { %12322 = vadd.xlane.f32.xlu0 %v12321_v31  ;;  %v12337_v43 = vpop.permute.xlu1 %12336  ;;  %v14509_v52 = vpop.eup %14508 }
0x1f4c   :  { %v12223_v17 = vmul.f32 0.6931472, %v14509_v52  ;;  %v12341_v11 = vsel %vm12250_vm6, %v12337_v43, 0.0 }
0x1f4d   :  { %v12342_v59 = vadd.f32 %v12341_v11, %v12340_v48 }
0x1f4e   :  { %v12225_v46 = vadd.f32 %v12223_v17, %v16613_v26 }
0x1f50   :  { %v12249_v58 = vsub.f32 %v12225_v46, %v12247_v45 }
0x1f52   :  { %v12252_v40 = vsel %vm12250_vm6, %v12249_v58, 0.0 }
0x1f7c   :  { %v12216_v3 = vpop.xlane.xlu1 %12215 }
0x1f7d   :  { %14510 = vlog2.f32 %v12216_v3 }
0x1f80   :  { %v12374_v16 = vpop.permute.xlu1 %12373 }
0x1f81   :  { %v12378_v50 = vsel %vm706_vm2, %v12374_v16, 0.0 }
0x1f82   :  { %v12379_v19 = vadd.f32 %v12378_v50, %v12377_v13 }
0x1f84   :  { %12380 = vadd.xlane.f32.xlu1 %v12379_v19 }
0x1f8a   :  { %v14511_v38 = vpop.eup %14510 }
0x1f8b   :  { %v12221_v33 = vmul.f32 0.6931472, %v14511_v38 }
0x1f8d   :  { %v12224_v29 = vadd.f32 %v12221_v33, %v12204_v12 }
0x1f8f   :  { %v12248_v0 = vsub.f32 %v12224_v29, %v12244_v30 }
0x1f91   :  { %v12251_v60 = vsel %vm12250_vm6, %v12248_v0, 0.0 }
0x1f92   :  { %v12253_v62 = vadd.f32 %v12252_v40, %v12251_v60 }
0x1f94   :  { %12254 = vadd.xlane.f32.xlu0 %v12253_v62 }
0x1f98   :  { %12343 = vadd.xlane.f32.xlu0 %v12342_v59 }
0x1fd0   :  { %v12302_v63 = vpop.xlane.xlu1 %12301 }
0x1fd1   :  { %v12303_v8 = vrot.slane %v12302_v63, 4 }
0x1fd3   :  { %v12304_v2 = vadd.f32 %v12303_v8, %v12302_v63 }
0x1fd4   :  { %v12323_v26 = vpop.xlane.xlu0 %12322 }
0x1fd5   :  { %v12324_v53 = vrot.slane %v12323_v26, 4  ;;  %v12305_v23 = vrot.slane %v12304_v2, 2 }
0x1fd7   :  { %v12325_v4 = vadd.f32 %v12324_v53, %v12323_v26  ;;  %v12306_v7 = vadd.f32 %v12305_v23, %v12304_v2 }
0x1fd9   :  { %v12326_v61 = vrot.slane %v12325_v4, 2  ;;  %v12307_v15 = vrot.slane %v12306_v7, 1 }
0x1fdb   :  { %v12327_v36 = vadd.f32 %v12326_v61, %v12325_v4  ;;  %v12308_v45 = vadd.f32 %v12307_v15, %v12306_v7 }
0x1fdd   :  { %v12328_v25 = vrot.slane %v12327_v36, 1 }
0x1fdf   :  { %v12329_v34 = vadd.f32 %v12328_v25, %v12327_v36 }
0x200d   :  { %v12381_v21 = vpop.xlane.xlu1 %12380 }
0x200e   :  { %v12382_v37 = vrot.slane %v12381_v21, 4 }
0x2010   :  { %v12383_v5 = vadd.f32 %v12382_v37, %v12381_v21 }
0x2012   :  { %v12384_v49 = vrot.slane %v12383_v5, 2 }
0x2014   :  { %v12385_v14 = vadd.f32 %v12384_v49, %v12383_v5 }
0x2016   :  { %v12386_v30 = vrot.slane %v12385_v14, 1 }
0x2018   :  { %v12387_v22 = vadd.f32 %v12386_v30, %v12385_v14 }
0x201d   :  { %v12255_v55 = vpop.xlane.xlu0 %12254 }
0x201e   :  { %v12256_v54 = vrot.slane %v12255_v55, 4 }
0x2020   :  { %v12257_v6 = vadd.f32 %v12256_v54, %v12255_v55 }
0x2021   :  { %v12344_v57 = vpop.xlane.xlu0 %12343 }
0x2022   :  { %v12258_v9 = vrot.slane %v12257_v6, 2  ;;  %v12345_v1 = vrot.slane %v12344_v57, 4 }
0x2024   :  { %v12346_v10 = vadd.f32 %v12345_v1, %v12344_v57  ;;  %v12259_v12 = vadd.f32 %v12258_v9, %v12257_v6 }
0x2026   :  { %v12347_v18 = vrot.slane %v12346_v10, 2  ;;  %v12260_v24 = vrot.slane %v12259_v12, 1 }
0x2028   :  { %v12348_v27 = vadd.f32 %v12347_v18, %v12346_v10  ;;  %v12261_v32 = vadd.f32 %v12260_v24, %v12259_v12 }
0x202a   :  { %14321 = vpush %v12261_v32  ;;  %v12349_v35 = vrot.slane %v12348_v27, 1 }
0x202b   :  { %14323 = vpush %v12308_v45 }
0x202c   :  { %14325 = vpush %v12329_v34  ;;  %v12350_v56 = vadd.f32 %v12349_v35, %v12348_v27 }
0x202e   :  { %14327 = vpush %v12350_v56 }
0x202f   :  { %14329 = vpush %v12387_v22 }
0x205b   :  { %s14322_s13 = spop %14321 }
0x205c   :  { %s12263_s14 = smul.f32 0.0625, %s14322_s13  ;;  %s14324_s15 = spop %14323 }
0x205d   :  { %s12310_s2 = smul.f32 0.0625, %s14324_s15  ;;  %s14326_s5 = spop %14325 }
0x205e   :  { %12265 = sst [smem:[#allocation2]] %s12263_s14  ;;  %s12331_s1 = smul.f32 0.0625, %s14326_s5 }
0x205f   :  { %12312 = sst [smem:[#allocation2 + $0x1]] %s12310_s2  ;;  %s14328_s0 = spop %14327 }
0x2060   :  { %12333 = sst [smem:[#allocation2 + $0x2]] %s12331_s1  ;;  %s12352_s4 = smul.f32 0.0625, %s14328_s0 }
0x2061   :  { %s14330_s12 = spop %14329 }
0x2062   :  { %12354 = sst [smem:[#allocation2 + $0x3]] %s12352_s4  ;;  %s12389_s10 = smul.f32 0.0625, %s14330_s12 }
0x2064   :  { %12391 = sst [smem:[#allocation2 + $0x4]] %s12389_s10 }
0x2065   :  { %14529 = shalt.err (!%p14526_p4)
}
0x2066   :  { %s14542_s23 = smov [#allocation2]  }
0x2067   :  { %12407 = dma.smem_to_vmem %s14542_s23, 16, %s12405_s24, [#allocation3]  }
0x2068   :  { %14530 = dma.done.wait [#allocation3], 16  }
0x2069   :  { %14531 = vsyncadd [#allocation3], 4294967280 }
0x206a   :  { %12411 = sfence }
0x206b   :  { %12412 = vsyncpa [#allocation3], 1 }

</bundles_post_ra>
